<compile_context>
chip_gen: v5e
topology: v5e:2x2
jax: 0.10.0
libtpu: 0.0.40
codegen_flags: <defaults>
</compile_context>

<pallas_src>
import functools

import jax
import jax.numpy as jnp
from jax.experimental import pallas as pl
from jax.experimental.pallas import tpu as pltpu

LANE = 128


def _round_up(n, m):
    return ((n + m - 1) // m) * m


# ---------------------------------------------------------------------------
# Fused Pallas kernel: all LSTM layers + final Linear, everything in VMEM.
# ---------------------------------------------------------------------------
def _fused_lstm_glove_kernel(*refs, seq_len, batch, hidden_pad, num_layers):
    """refs layout (inputs, then output, then scratch):

      [0]                 lengths (B, 1)  int32
      [1]                 x       (T*B, D) f32   time-major, row = t*B + b
      [2+3l .. 4+3l]      W_ih_l (D_l, 4*Hp), W_hh_l (Hp, 4*Hp), b_l (1, 4*Hp)
      [2+3L]              W_out  (Hp, O)
      [3+3L]              b_out  (1, O)
      [4+3L]              out    (B, O)          (output)
      [5+3L]              y_sc   (T*B, Hp) f32   (VMEM scratch: layer output seq)
    """
    T, B, Hp, L = seq_len, batch, hidden_pad, num_layers
    len_ref = refs[0]
    x_ref = refs[1]
    wout_ref = refs[2 + 3 * L]
    bout_ref = refs[3 + 3 * L]
    o_ref = refs[4 + 3 * L]
    y_sc = refs[5 + 3 * L]

    lengths = len_ref[...]                                   # (B, 1) int32

    h = None
    for layer in range(L):
        wih_ref = refs[2 + 3 * layer]
        whh_ref = refs[3 + 3 * layer]
        b_ref = refs[4 + 3 * layer]

        inp = x_ref[...] if layer == 0 else y_sc[...]        # (T*B, D_l)

        # Input projection for ALL timesteps at once; bias folded in here so
        # neither the matmul nor the broadcast is repeated inside the loop.
        gx = (jnp.dot(inp, wih_ref[...], preferred_element_type=jnp.float32)
              + b_ref[...])                                  # (T*B, 4*Hp)
        w_hh = whh_ref[...]                                  # (Hp, 4*Hp)

        h = jnp.zeros((B, Hp), jnp.float32)
        c = jnp.zeros((B, Hp), jnp.float32)
        for t in range(T):                                   # fully unrolled, static idx
            gates = (gx[t * B:(t + 1) * B, :]
                     + jnp.dot(h, w_hh, preferred_element_type=jnp.float32))
            # 128-lane-aligned gate blocks -> plain vreg selects, no XLU shuffles.
            i_g = jax.nn.sigmoid(gates[:, 0 * Hp:1 * Hp])
            f_g = jax.nn.sigmoid(gates[:, 1 * Hp:2 * Hp])
            g_g = jnp.tanh(gates[:, 2 * Hp:3 * Hp])
            o_g = jax.nn.sigmoid(gates[:, 3 * Hp:4 * Hp])

            c_new = f_g * c + i_g * g_g
            h_new = o_g * jnp.tanh(c_new)

            # pack_padded_sequence semantics: state frozen once t >= length[b].
            valid = lengths > t                              # (B, 1) bool
            h = jnp.where(valid, h_new, h)
            c = jnp.where(valid, c_new, c)

            if layer < L - 1:                                # only next layer needs it
                y_sc[pl.ds(t * B, B), :] = h                 # lane-dense VMEM store

    # Final Linear on the top layer's final hidden state (== hidden[-1]).
    o_ref[...] = (jnp.dot(h, wout_ref[...], preferred_element_type=jnp.float32)
                  + bout_ref[...]).astype(o_ref.dtype)


# ---------------------------------------------------------------------------
# Host-side parameter padding (each gate gets its own 128-lane block).
# ---------------------------------------------------------------------------
def _pad_gate_cols(w, H, Hp):
    """(rows, 4H) -> (rows, 4*Hp): gate k occupies lanes [k*Hp, k*Hp + H)."""
    rows = w.shape[0]
    w4 = w.reshape(rows, 4, H)
    return jnp.pad(w4, ((0, 0), (0, 0), (0, Hp - H))).reshape(rows, 4 * Hp)


def _prepare_padded_params(params, hidden):
    H = hidden
    Hp = _round_up(H, LANE)
    flat = []
    for layer, (w_ih, w_hh, bias) in enumerate(params["lstm"]):
        w_ih_p = _pad_gate_cols(w_ih, H, Hp)
        if layer > 0:
            # Deeper layers consume the lane-padded hidden state (H -> Hp rows).
            w_ih_p = jnp.pad(w_ih_p, ((0, Hp - H), (0, 0)))
        w_hh_p = jnp.pad(_pad_gate_cols(w_hh, H, Hp), ((0, Hp - H), (0, 0)))
        b_p = _pad_gate_cols(bias.reshape(1, 4 * H), H, Hp)
        flat.extend([w_ih_p, w_hh_p, b_p])
    w_out_p = jnp.pad(params["w_out"], ((0, Hp - H), (0, 0)))
    return flat, w_out_p, params["b_out"], Hp


# ---------------------------------------------------------------------------
# Forward wrapper (single pallas_call, no grid: everything resident in VMEM).
# ---------------------------------------------------------------------------
@jax.jit
def lstm_glove_forward(params, x_train, x_origin_len):
    """x_train: (B, T, D) batch-first (PyTorch layout); x_origin_len: (B,) int."""
    B, T, D = x_train.shape
    layers = len(params["lstm"])
    H = params["lstm"][0][1].shape[0]
    O = params["w_out"].shape[1]

    layer_params, w_out_p, b_out, Hp = _prepare_padded_params(params, H)

    # (B, T, D) -> time-major rows (T*B, D): row index = t*B + b.
    x = jnp.transpose(x_train.astype(jnp.float32), (1, 0, 2)).reshape(T * B, D)
    lengths = x_origin_len.astype(jnp.int32).reshape(B, 1)

    kernel = functools.partial(
        _fused_lstm_glove_kernel,
        seq_len=T, batch=B, hidden_pad=Hp, num_layers=layers)

    return pl.pallas_call(
        kernel,
        out_shape=jax.ShapeDtypeStruct((B, O), jnp.float32),
        scratch_shapes=[pltpu.VMEM((T * B, Hp), jnp.float32)],
    )(lengths, x, *layer_params, w_out_p, b_out)


# ---------------------------------------------------------------------------
# Pure-JAX reference (mirrors PyTorch packed-LSTM + Linear semantics).
# ---------------------------------------------------------------------------
def _reference_forward(params, x_train, x_origin_len):
    x = x_train.astype(jnp.float32)
    B, T, _ = x.shape
    lengths = x_origin_len.astype(jnp.int32)
    inp = x
    h = None
    for (w_ih, w_hh, bias) in params["lstm"]:
        H = w_hh.shape[0]
        h = jnp.zeros((B, H), jnp.float32)
        c = jnp.zeros((B, H), jnp.float32)
        ys = []
        for t in range(T):
            g = inp[:, t, :] @ w_ih + h @ w_hh + bias
            i_g = jax.nn.sigmoid(g[:, :H])
            f_g = jax.nn.sigmoid(g[:, H:2 * H])
            g_g = jnp.tanh(g[:, 2 * H:3 * H])
            o_g = jax.nn.sigmoid(g[:, 3 * H:])
            c_new = f_g * c + i_g * g_g
            h_new = o_g * jnp.tanh(c_new)
            valid = (lengths > t)[:, None]
            h = jnp.where(valid, h_new, h)
            c = jnp.where(valid, c_new, c)
            ys.append(h)
        inp = jnp.stack(ys, axis=1)
    return h @ params["w_out"] + params["b_out"]


# ---------------------------------------------------------------------------
# Deterministic parameter init (shapes from LSTM_GLove.__init__).
# ---------------------------------------------------------------------------
def init_params(key, embedding, hidden, layers, output_size):
    params = {"lstm": []}
    k = 1.0 / jnp.sqrt(hidden)
    for l in range(layers):
        d_in = embedding if l == 0 else hidden
        key, k1, k2, k3, k4 = jax.random.split(key, 5)
        w_ih = jax.random.uniform(k1, (d_in, 4 * hidden), jnp.float32, -k, k)
        w_hh = jax.random.uniform(k2, (hidden, 4 * hidden), jnp.float32, -k, k)
        b_ih = jax.random.uniform(k3, (4 * hidden,), jnp.float32, -k, k)
        b_hh = jax.random.uniform(k4, (4 * hidden,), jnp.float32, -k, k)
        params["lstm"].append((w_ih, w_hh, (b_ih + b_hh).reshape(1, 4 * hidden)))
    key, k1, k2 = jax.random.split(key, 3)
    params["w_out"] = jax.random.uniform(k1, (hidden, output_size), jnp.float32, -k, k)
    params["b_out"] = jax.random.uniform(k2, (1, output_size), jnp.float32, -k, k)
    return params


# ---------------------------------------------------------------------------
if __name__ == "__main__":
    # args = {'embedding': 64, 'hidden_nodes': 32, 'layers': 2, 'output_size': 4}
    EMB, HID, LAYERS, OUT = 64, 32, 2, 4
    B, T = 8, 8

    key = jax.random.PRNGKey(0)
    kx, kp = jax.random.split(key)
    x_train = jax.random.normal(kx, (B, T, EMB), jnp.float32)   # (B, T, D) batch-first
    # variable, unsorted lengths (enforce_sorted=False)
    x_origin_len = jnp.array([8, 3, 5, 8, 1, 6, 4, 7], dtype=jnp.int32)

    params = init_params(kp, EMB, HID, LAYERS, OUT)

    out = lstm_glove_forward(params, x_train, x_origin_len)
    out = jax.block_until_ready(out)
    assert out.shape == (B, OUT)

    ref = _reference_forward(params, x_train, x_origin_len)
    assert jnp.allclose(out, ref, atol=1e-3, rtol=1e-2), (out, ref)

    print("KERNEL_OK")
</pallas_src>

<mosaic_0001>
module attributes {stable_mosaic.version = 11 : i64} {
  func.func @_fused_lstm_glove_kernel(%arg0: memref<8x1xi32, #tpu.memory_space<vmem>>, %arg1: memref<64x64xf32, #tpu.memory_space<vmem>>, %arg2: memref<64x512xf32, #tpu.memory_space<vmem>>, %arg3: memref<128x512xf32, #tpu.memory_space<vmem>>, %arg4: memref<1x512xf32, #tpu.memory_space<vmem>>, %arg5: memref<128x512xf32, #tpu.memory_space<vmem>>, %arg6: memref<128x512xf32, #tpu.memory_space<vmem>>, %arg7: memref<1x512xf32, #tpu.memory_space<vmem>>, %arg8: memref<128x4xf32, #tpu.memory_space<vmem>>, %arg9: memref<1x4xf32, #tpu.memory_space<vmem>>, %arg10: memref<8x4xf32, #tpu.memory_space<vmem>>, %arg11: memref<64x128xf32, #tpu.memory_space<vmem>>) attributes {dimension_semantics = [], scalar_prefetch = 0 : i64, scratch_operands = 1 : i64, tpu.core_type = #tpu.core_type<tc>} {
    %c0 = arith.constant 0 : index
    %c0_0 = arith.constant 0 : index
    %0 = vector.load %arg0[%c0, %c0_0] : memref<8x1xi32, #tpu.memory_space<vmem>>, vector<8x1xi32>
    %c0_1 = arith.constant 0 : index
    %c0_2 = arith.constant 0 : index
    %1 = vector.load %arg1[%c0_1, %c0_2] : memref<64x64xf32, #tpu.memory_space<vmem>>, vector<64x64xf32>
    %c0_3 = arith.constant 0 : index
    %c0_4 = arith.constant 0 : index
    %2 = vector.load %arg2[%c0_3, %c0_4] : memref<64x512xf32, #tpu.memory_space<vmem>>, vector<64x512xf32>
    %cst = arith.constant dense<0.000000e+00> : vector<64x512xf32>
    %3 = tpu.matmul %1, %2, %cst {dimension_numbers = #tpu.dot_dimension_numbers<[1], [0], [0], [1], [0, 0, 1, 1], [], []>} : vector<64x64xf32>, vector<64x512xf32>, vector<64x512xf32> -> vector<64x512xf32>
    %c0_5 = arith.constant 0 : index
    %c0_6 = arith.constant 0 : index
    %4 = vector.load %arg4[%c0_5, %c0_6] : memref<1x512xf32, #tpu.memory_space<vmem>>, vector<1x512xf32>
    %5 = vector.broadcast %4 : vector<1x512xf32> to vector<64x512xf32>
    %6 = arith.addf %3, %5 : vector<64x512xf32>
    %c0_7 = arith.constant 0 : index
    %c0_8 = arith.constant 0 : index
    %7 = vector.load %arg3[%c0_7, %c0_8] : memref<128x512xf32, #tpu.memory_space<vmem>>, vector<128x512xf32>
    %cst_9 = arith.constant 0.000000e+00 : f32
    %8 = vector.broadcast %cst_9 : f32 to vector<8x128xf32>
    %cst_10 = arith.constant 0.000000e+00 : f32
    %9 = vector.broadcast %cst_10 : f32 to vector<8x128xf32>
    %10 = vector.extract_strided_slice %6 {offsets = [0, 0], sizes = [8, 512], strides = [1, 1]} : vector<64x512xf32> to vector<8x512xf32>
    %cst_11 = arith.constant dense<0.000000e+00> : vector<8x512xf32>
    %11 = tpu.matmul %8, %7, %cst_11 {dimension_numbers = #tpu.dot_dimension_numbers<[1], [0], [0], [1], [0, 0, 1, 1], [], []>} : vector<8x128xf32>, vector<128x512xf32>, vector<8x512xf32> -> vector<8x512xf32>
    %12 = arith.addf %10, %11 : vector<8x512xf32>
    %13 = vector.extract_strided_slice %12 {offsets = [0, 0], sizes = [8, 128], strides = [1, 1]} : vector<8x512xf32> to vector<8x128xf32>
    %14 = arith.negf %13 : vector<8x128xf32>
    %15 = math.exp %14 : vector<8x128xf32>
    %cst_12 = arith.constant 1.000000e+00 : f32
    %16 = vector.broadcast %cst_12 : f32 to vector<8x128xf32>
    %17 = arith.addf %16, %15 : vector<8x128xf32>
    %18 = arith.divf %16, %17 : vector<8x128xf32>
    %19 = vector.extract_strided_slice %12 {offsets = [0, 128], sizes = [8, 128], strides = [1, 1]} : vector<8x512xf32> to vector<8x128xf32>
    %20 = arith.negf %19 : vector<8x128xf32>
    %21 = math.exp %20 : vector<8x128xf32>
    %cst_13 = arith.constant 1.000000e+00 : f32
    %22 = vector.broadcast %cst_13 : f32 to vector<8x128xf32>
    %23 = arith.addf %22, %21 : vector<8x128xf32>
    %24 = arith.divf %22, %23 : vector<8x128xf32>
    %25 = vector.extract_strided_slice %12 {offsets = [0, 256], sizes = [8, 128], strides = [1, 1]} : vector<8x512xf32> to vector<8x128xf32>
    %26 = math.tanh %25 : vector<8x128xf32>
    %27 = vector.extract_strided_slice %12 {offsets = [0, 384], sizes = [8, 128], strides = [1, 1]} : vector<8x512xf32> to vector<8x128xf32>
    %28 = arith.negf %27 : vector<8x128xf32>
    %29 = math.exp %28 : vector<8x128xf32>
    %cst_14 = arith.constant 1.000000e+00 : f32
    %30 = vector.broadcast %cst_14 : f32 to vector<8x128xf32>
    %31 = arith.addf %30, %29 : vector<8x128xf32>
    %32 = arith.divf %30, %31 : vector<8x128xf32>
    %33 = arith.mulf %24, %9 : vector<8x128xf32>
    %34 = arith.mulf %18, %26 : vector<8x128xf32>
    %35 = arith.addf %33, %34 : vector<8x128xf32>
    %36 = math.tanh %35 : vector<8x128xf32>
    %37 = arith.mulf %32, %36 : vector<8x128xf32>
    %c0_i32 = arith.constant 0 : i32
    %38 = vector.broadcast %c0_i32 : i32 to vector<8x1xi32>
    %39 = arith.cmpi sgt, %0, %38 : vector<8x1xi32>
    %40 = vector.shape_cast %39 : vector<8x1xi1> to vector<8x1xi1>
    %41 = vector.broadcast %40 : vector<8x1xi1> to vector<8x128xi1>
    %42 = arith.select %41, %37, %8 : vector<8x128xi1>, vector<8x128xf32>
    %43 = vector.shape_cast %39 : vector<8x1xi1> to vector<8x1xi1>
    %44 = vector.broadcast %43 : vector<8x1xi1> to vector<8x128xi1>
    %45 = arith.select %44, %35, %9 : vector<8x128xi1>, vector<8x128xf32>
    %c0_15 = arith.constant 0 : index
    %c0_16 = arith.constant 0 : index
    %46 = vector.load %arg11[%c0_15, %c0_16] : memref<64x128xf32, #tpu.memory_space<vmem>>, vector<8x128xf32>
    tpu.vector_store %arg11[%c0_15, %c0_16], %42 {strides = array<i32>} : memref<64x128xf32, #tpu.memory_space<vmem>>, vector<8x128xf32>,
    %47 = vector.extract_strided_slice %6 {offsets = [8, 0], sizes = [8, 512], strides = [1, 1]} : vector<64x512xf32> to vector<8x512xf32>
    %cst_17 = arith.constant dense<0.000000e+00> : vector<8x512xf32>
    %48 = tpu.matmul %42, %7, %cst_17 {dimension_numbers = #tpu.dot_dimension_numbers<[1], [0], [0], [1], [0, 0, 1, 1], [], []>} : vector<8x128xf32>, vector<128x512xf32>, vector<8x512xf32> -> vector<8x512xf32>
    %49 = arith.addf %47, %48 : vector<8x512xf32>
    %50 = vector.extract_strided_slice %49 {offsets = [0, 0], sizes = [8, 128], strides = [1, 1]} : vector<8x512xf32> to vector<8x128xf32>
    %51 = arith.negf %50 : vector<8x128xf32>
    %52 = math.exp %51 : vector<8x128xf32>
    %cst_18 = arith.constant 1.000000e+00 : f32
    %53 = vector.broadcast %cst_18 : f32 to vector<8x128xf32>
    %54 = arith.addf %53, %52 : vector<8x128xf32>
    %55 = arith.divf %53, %54 : vector<8x128xf32>
    %56 = vector.extract_strided_slice %49 {offsets = [0, 128], sizes = [8, 128], strides = [1, 1]} : vector<8x512xf32> to vector<8x128xf32>
    %57 = arith.negf %56 : vector<8x128xf32>
    %58 = math.exp %57 : vector<8x128xf32>
    %cst_19 = arith.constant 1.000000e+00 : f32
    %59 = vector.broadcast %cst_19 : f32 to vector<8x128xf32>
    %60 = arith.addf %59, %58 : vector<8x128xf32>
    %61 = arith.divf %59, %60 : vector<8x128xf32>
    %62 = vector.extract_strided_slice %49 {offsets = [0, 256], sizes = [8, 128], strides = [1, 1]} : vector<8x512xf32> to vector<8x128xf32>
    %63 = math.tanh %62 : vector<8x128xf32>
    %64 = vector.extract_strided_slice %49 {offsets = [0, 384], sizes = [8, 128], strides = [1, 1]} : vector<8x512xf32> to vector<8x128xf32>
    %65 = arith.negf %64 : vector<8x128xf32>
    %66 = math.exp %65 : vector<8x128xf32>
    %cst_20 = arith.constant 1.000000e+00 : f32
    %67 = vector.broadcast %cst_20 : f32 to vector<8x128xf32>
    %68 = arith.addf %67, %66 : vector<8x128xf32>
    %69 = arith.divf %67, %68 : vector<8x128xf32>
    %70 = arith.mulf %61, %45 : vector<8x128xf32>
    %71 = arith.mulf %55, %63 : vector<8x128xf32>
    %72 = arith.addf %70, %71 : vector<8x128xf32>
    %73 = math.tanh %72 : vector<8x128xf32>
    %74 = arith.mulf %69, %73 : vector<8x128xf32>
    %c1_i32 = arith.constant 1 : i32
    %75 = vector.broadcast %c1_i32 : i32 to vector<8x1xi32>
    %76 = arith.cmpi sgt, %0, %75 : vector<8x1xi32>
    %77 = vector.shape_cast %76 : vector<8x1xi1> to vector<8x1xi1>
    %78 = vector.broadcast %77 : vector<8x1xi1> to vector<8x128xi1>
    %79 = arith.select %78, %74, %42 : vector<8x128xi1>, vector<8x128xf32>
    %80 = vector.shape_cast %76 : vector<8x1xi1> to vector<8x1xi1>
    %81 = vector.broadcast %80 : vector<8x1xi1> to vector<8x128xi1>
    %82 = arith.select %81, %72, %45 : vector<8x128xi1>, vector<8x128xf32>
    %c8 = arith.constant 8 : index
    %c0_21 = arith.constant 0 : index
    %83 = vector.load %arg11[%c8, %c0_21] : memref<64x128xf32, #tpu.memory_space<vmem>>, vector<8x128xf32>
    tpu.vector_store %arg11[%c8, %c0_21], %79 {strides = array<i32>} : memref<64x128xf32, #tpu.memory_space<vmem>>, vector<8x128xf32>,
    %84 = vector.extract_strided_slice %6 {offsets = [16, 0], sizes = [8, 512], strides = [1, 1]} : vector<64x512xf32> to vector<8x512xf32>
    %cst_22 = arith.constant dense<0.000000e+00> : vector<8x512xf32>
    %85 = tpu.matmul %79, %7, %cst_22 {dimension_numbers = #tpu.dot_dimension_numbers<[1], [0], [0], [1], [0, 0, 1, 1], [], []>} : vector<8x128xf32>, vector<128x512xf32>, vector<8x512xf32> -> vector<8x512xf32>
    %86 = arith.addf %84, %85 : vector<8x512xf32>
    %87 = vector.extract_strided_slice %86 {offsets = [0, 0], sizes = [8, 128], strides = [1, 1]} : vector<8x512xf32> to vector<8x128xf32>
    %88 = arith.negf %87 : vector<8x128xf32>
    %89 = math.exp %88 : vector<8x128xf32>
    %cst_23 = arith.constant 1.000000e+00 : f32
    %90 = vector.broadcast %cst_23 : f32 to vector<8x128xf32>
    %91 = arith.addf %90, %89 : vector<8x128xf32>
    %92 = arith.divf %90, %91 : vector<8x128xf32>
    %93 = vector.extract_strided_slice %86 {offsets = [0, 128], sizes = [8, 128], strides = [1, 1]} : vector<8x512xf32> to vector<8x128xf32>
    %94 = arith.negf %93 : vector<8x128xf32>
    %95 = math.exp %94 : vector<8x128xf32>
    %cst_24 = arith.constant 1.000000e+00 : f32
    %96 = vector.broadcast %cst_24 : f32 to vector<8x128xf32>
    %97 = arith.addf %96, %95 : vector<8x128xf32>
    %98 = arith.divf %96, %97 : vector<8x128xf32>
    %99 = vector.extract_strided_slice %86 {offsets = [0, 256], sizes = [8, 128], strides = [1, 1]} : vector<8x512xf32> to vector<8x128xf32>
    %100 = math.tanh %99 : vector<8x128xf32>
    %101 = vector.extract_strided_slice %86 {offsets = [0, 384], sizes = [8, 128], strides = [1, 1]} : vector<8x512xf32> to vector<8x128xf32>
    %102 = arith.negf %101 : vector<8x128xf32>
    %103 = math.exp %102 : vector<8x128xf32>
    %cst_25 = arith.constant 1.000000e+00 : f32
    %104 = vector.broadcast %cst_25 : f32 to vector<8x128xf32>
    %105 = arith.addf %104, %103 : vector<8x128xf32>
    %106 = arith.divf %104, %105 : vector<8x128xf32>
    %107 = arith.mulf %98, %82 : vector<8x128xf32>
    %108 = arith.mulf %92, %100 : vector<8x128xf32>
    %109 = arith.addf %107, %108 : vector<8x128xf32>
    %110 = math.tanh %109 : vector<8x128xf32>
    %111 = arith.mulf %106, %110 : vector<8x128xf32>
    %c2_i32 = arith.constant 2 : i32
    %112 = vector.broadcast %c2_i32 : i32 to vector<8x1xi32>
    %113 = arith.cmpi sgt, %0, %112 : vector<8x1xi32>
    %114 = vector.shape_cast %113 : vector<8x1xi1> to vector<8x1xi1>
    %115 = vector.broadcast %114 : vector<8x1xi1> to vector<8x128xi1>
    %116 = arith.select %115, %111, %79 : vector<8x128xi1>, vector<8x128xf32>
    %117 = vector.shape_cast %113 : vector<8x1xi1> to vector<8x1xi1>
    %118 = vector.broadcast %117 : vector<8x1xi1> to vector<8x128xi1>
    %119 = arith.select %118, %109, %82 : vector<8x128xi1>, vector<8x128xf32>
    %c16 = arith.constant 16 : index
    %c0_26 = arith.constant 0 : index
    %120 = vector.load %arg11[%c16, %c0_26] : memref<64x128xf32, #tpu.memory_space<vmem>>, vector<8x128xf32>
    tpu.vector_store %arg11[%c16, %c0_26], %116 {strides = array<i32>} : memref<64x128xf32, #tpu.memory_space<vmem>>, vector<8x128xf32>,
    %121 = vector.extract_strided_slice %6 {offsets = [24, 0], sizes = [8, 512], strides = [1, 1]} : vector<64x512xf32> to vector<8x512xf32>
    %cst_27 = arith.constant dense<0.000000e+00> : vector<8x512xf32>
    %122 = tpu.matmul %116, %7, %cst_27 {dimension_numbers = #tpu.dot_dimension_numbers<[1], [0], [0], [1], [0, 0, 1, 1], [], []>} : vector<8x128xf32>, vector<128x512xf32>, vector<8x512xf32> -> vector<8x512xf32>
    %123 = arith.addf %121, %122 : vector<8x512xf32>
    %124 = vector.extract_strided_slice %123 {offsets = [0, 0], sizes = [8, 128], strides = [1, 1]} : vector<8x512xf32> to vector<8x128xf32>
    %125 = arith.negf %124 : vector<8x128xf32>
    %126 = math.exp %125 : vector<8x128xf32>
    %cst_28 = arith.constant 1.000000e+00 : f32
    %127 = vector.broadcast %cst_28 : f32 to vector<8x128xf32>
    %128 = arith.addf %127, %126 : vector<8x128xf32>
    %129 = arith.divf %127, %128 : vector<8x128xf32>
    %130 = vector.extract_strided_slice %123 {offsets = [0, 128], sizes = [8, 128], strides = [1, 1]} : vector<8x512xf32> to vector<8x128xf32>
    %131 = arith.negf %130 : vector<8x128xf32>
    %132 = math.exp %131 : vector<8x128xf32>
    %cst_29 = arith.constant 1.000000e+00 : f32
    %133 = vector.broadcast %cst_29 : f32 to vector<8x128xf32>
    %134 = arith.addf %133, %132 : vector<8x128xf32>
    %135 = arith.divf %133, %134 : vector<8x128xf32>
    %136 = vector.extract_strided_slice %123 {offsets = [0, 256], sizes = [8, 128], strides = [1, 1]} : vector<8x512xf32> to vector<8x128xf32>
    %137 = math.tanh %136 : vector<8x128xf32>
    %138 = vector.extract_strided_slice %123 {offsets = [0, 384], sizes = [8, 128], strides = [1, 1]} : vector<8x512xf32> to vector<8x128xf32>
    %139 = arith.negf %138 : vector<8x128xf32>
    %140 = math.exp %139 : vector<8x128xf32>
    %cst_30 = arith.constant 1.000000e+00 : f32
    %141 = vector.broadcast %cst_30 : f32 to vector<8x128xf32>
    %142 = arith.addf %141, %140 : vector<8x128xf32>
    %143 = arith.divf %141, %142 : vector<8x128xf32>
    %144 = arith.mulf %135, %119 : vector<8x128xf32>
    %145 = arith.mulf %129, %137 : vector<8x128xf32>
    %146 = arith.addf %144, %145 : vector<8x128xf32>
    %147 = math.tanh %146 : vector<8x128xf32>
    %148 = arith.mulf %143, %147 : vector<8x128xf32>
    %c3_i32 = arith.constant 3 : i32
    %149 = vector.broadcast %c3_i32 : i32 to vector<8x1xi32>
    %150 = arith.cmpi sgt, %0, %149 : vector<8x1xi32>
    %151 = vector.shape_cast %150 : vector<8x1xi1> to vector<8x1xi1>
    %152 = vector.broadcast %151 : vector<8x1xi1> to vector<8x128xi1>
    %153 = arith.select %152, %148, %116 : vector<8x128xi1>, vector<8x128xf32>
    %154 = vector.shape_cast %150 : vector<8x1xi1> to vector<8x1xi1>
    %155 = vector.broadcast %154 : vector<8x1xi1> to vector<8x128xi1>
    %156 = arith.select %155, %146, %119 : vector<8x128xi1>, vector<8x128xf32>
    %c24 = arith.constant 24 : index
    %c0_31 = arith.constant 0 : index
    %157 = vector.load %arg11[%c24, %c0_31] : memref<64x128xf32, #tpu.memory_space<vmem>>, vector<8x128xf32>
    tpu.vector_store %arg11[%c24, %c0_31], %153 {strides = array<i32>} : memref<64x128xf32, #tpu.memory_space<vmem>>, vector<8x128xf32>,
    %158 = vector.extract_strided_slice %6 {offsets = [32, 0], sizes = [8, 512], strides = [1, 1]} : vector<64x512xf32> to vector<8x512xf32>
    %cst_32 = arith.constant dense<0.000000e+00> : vector<8x512xf32>
    %159 = tpu.matmul %153, %7, %cst_32 {dimension_numbers = #tpu.dot_dimension_numbers<[1], [0], [0], [1], [0, 0, 1, 1], [], []>} : vector<8x128xf32>, vector<128x512xf32>, vector<8x512xf32> -> vector<8x512xf32>
    %160 = arith.addf %158, %159 : vector<8x512xf32>
    %161 = vector.extract_strided_slice %160 {offsets = [0, 0], sizes = [8, 128], strides = [1, 1]} : vector<8x512xf32> to vector<8x128xf32>
    %162 = arith.negf %161 : vector<8x128xf32>
    %163 = math.exp %162 : vector<8x128xf32>
    %cst_33 = arith.constant 1.000000e+00 : f32
    %164 = vector.broadcast %cst_33 : f32 to vector<8x128xf32>
    %165 = arith.addf %164, %163 : vector<8x128xf32>
    %166 = arith.divf %164, %165 : vector<8x128xf32>
    %167 = vector.extract_strided_slice %160 {offsets = [0, 128], sizes = [8, 128], strides = [1, 1]} : vector<8x512xf32> to vector<8x128xf32>
    %168 = arith.negf %167 : vector<8x128xf32>
    %169 = math.exp %168 : vector<8x128xf32>
    %cst_34 = arith.constant 1.000000e+00 : f32
    %170 = vector.broadcast %cst_34 : f32 to vector<8x128xf32>
    %171 = arith.addf %170, %169 : vector<8x128xf32>
    %172 = arith.divf %170, %171 : vector<8x128xf32>
    %173 = vector.extract_strided_slice %160 {offsets = [0, 256], sizes = [8, 128], strides = [1, 1]} : vector<8x512xf32> to vector<8x128xf32>
    %174 = math.tanh %173 : vector<8x128xf32>
    %175 = vector.extract_strided_slice %160 {offsets = [0, 384], sizes = [8, 128], strides = [1, 1]} : vector<8x512xf32> to vector<8x128xf32>
    %176 = arith.negf %175 : vector<8x128xf32>
    %177 = math.exp %176 : vector<8x128xf32>
    %cst_35 = arith.constant 1.000000e+00 : f32
    %178 = vector.broadcast %cst_35 : f32 to vector<8x128xf32>
    %179 = arith.addf %178, %177 : vector<8x128xf32>
    %180 = arith.divf %178, %179 : vector<8x128xf32>
    %181 = arith.mulf %172, %156 : vector<8x128xf32>
    %182 = arith.mulf %166, %174 : vector<8x128xf32>
    %183 = arith.addf %181, %182 : vector<8x128xf32>
    %184 = math.tanh %183 : vector<8x128xf32>
    %185 = arith.mulf %180, %184 : vector<8x128xf32>
    %c4_i32 = arith.constant 4 : i32
    %186 = vector.broadcast %c4_i32 : i32 to vector<8x1xi32>
    %187 = arith.cmpi sgt, %0, %186 : vector<8x1xi32>
    %188 = vector.shape_cast %187 : vector<8x1xi1> to vector<8x1xi1>
    %189 = vector.broadcast %188 : vector<8x1xi1> to vector<8x128xi1>
    %190 = arith.select %189, %185, %153 : vector<8x128xi1>, vector<8x128xf32>
    %191 = vector.shape_cast %187 : vector<8x1xi1> to vector<8x1xi1>
    %192 = vector.broadcast %191 : vector<8x1xi1> to vector<8x128xi1>
    %193 = arith.select %192, %183, %156 : vector<8x128xi1>, vector<8x128xf32>
    %c32 = arith.constant 32 : index
    %c0_36 = arith.constant 0 : index
    %194 = vector.load %arg11[%c32, %c0_36] : memref<64x128xf32, #tpu.memory_space<vmem>>, vector<8x128xf32>
    tpu.vector_store %arg11[%c32, %c0_36], %190 {strides = array<i32>} : memref<64x128xf32, #tpu.memory_space<vmem>>, vector<8x128xf32>,
    %195 = vector.extract_strided_slice %6 {offsets = [40, 0], sizes = [8, 512], strides = [1, 1]} : vector<64x512xf32> to vector<8x512xf32>
    %cst_37 = arith.constant dense<0.000000e+00> : vector<8x512xf32>
    %196 = tpu.matmul %190, %7, %cst_37 {dimension_numbers = #tpu.dot_dimension_numbers<[1], [0], [0], [1], [0, 0, 1, 1], [], []>} : vector<8x128xf32>, vector<128x512xf32>, vector<8x512xf32> -> vector<8x512xf32>
    %197 = arith.addf %195, %196 : vector<8x512xf32>
    %198 = vector.extract_strided_slice %197 {offsets = [0, 0], sizes = [8, 128], strides = [1, 1]} : vector<8x512xf32> to vector<8x128xf32>
    %199 = arith.negf %198 : vector<8x128xf32>
    %200 = math.exp %199 : vector<8x128xf32>
    %cst_38 = arith.constant 1.000000e+00 : f32
    %201 = vector.broadcast %cst_38 : f32 to vector<8x128xf32>
    %202 = arith.addf %201, %200 : vector<8x128xf32>
    %203 = arith.divf %201, %202 : vector<8x128xf32>
    %204 = vector.extract_strided_slice %197 {offsets = [0, 128], sizes = [8, 128], strides = [1, 1]} : vector<8x512xf32> to vector<8x128xf32>
    %205 = arith.negf %204 : vector<8x128xf32>
    %206 = math.exp %205 : vector<8x128xf32>
    %cst_39 = arith.constant 1.000000e+00 : f32
    %207 = vector.broadcast %cst_39 : f32 to vector<8x128xf32>
    %208 = arith.addf %207, %206 : vector<8x128xf32>
    %209 = arith.divf %207, %208 : vector<8x128xf32>
    %210 = vector.extract_strided_slice %197 {offsets = [0, 256], sizes = [8, 128], strides = [1, 1]} : vector<8x512xf32> to vector<8x128xf32>
    %211 = math.tanh %210 : vector<8x128xf32>
    %212 = vector.extract_strided_slice %197 {offsets = [0, 384], sizes = [8, 128], strides = [1, 1]} : vector<8x512xf32> to vector<8x128xf32>
    %213 = arith.negf %212 : vector<8x128xf32>
    %214 = math.exp %213 : vector<8x128xf32>
    %cst_40 = arith.constant 1.000000e+00 : f32
    %215 = vector.broadcast %cst_40 : f32 to vector<8x128xf32>
    %216 = arith.addf %215, %214 : vector<8x128xf32>
    %217 = arith.divf %215, %216 : vector<8x128xf32>
    %218 = arith.mulf %209, %193 : vector<8x128xf32>
    %219 = arith.mulf %203, %211 : vector<8x128xf32>
    %220 = arith.addf %218, %219 : vector<8x128xf32>
    %221 = math.tanh %220 : vector<8x128xf32>
    %222 = arith.mulf %217, %221 : vector<8x128xf32>
    %c5_i32 = arith.constant 5 : i32
    %223 = vector.broadcast %c5_i32 : i32 to vector<8x1xi32>
    %224 = arith.cmpi sgt, %0, %223 : vector<8x1xi32>
    %225 = vector.shape_cast %224 : vector<8x1xi1> to vector<8x1xi1>
    %226 = vector.broadcast %225 : vector<8x1xi1> to vector<8x128xi1>
    %227 = arith.select %226, %222, %190 : vector<8x128xi1>, vector<8x128xf32>
    %228 = vector.shape_cast %224 : vector<8x1xi1> to vector<8x1xi1>
    %229 = vector.broadcast %228 : vector<8x1xi1> to vector<8x128xi1>
    %230 = arith.select %229, %220, %193 : vector<8x128xi1>, vector<8x128xf32>
    %c40 = arith.constant 40 : index
    %c0_41 = arith.constant 0 : index
    %231 = vector.load %arg11[%c40, %c0_41] : memref<64x128xf32, #tpu.memory_space<vmem>>, vector<8x128xf32>
    tpu.vector_store %arg11[%c40, %c0_41], %227 {strides = array<i32>} : memref<64x128xf32, #tpu.memory_space<vmem>>, vector<8x128xf32>,
    %232 = vector.extract_strided_slice %6 {offsets = [48, 0], sizes = [8, 512], strides = [1, 1]} : vector<64x512xf32> to vector<8x512xf32>
    %cst_42 = arith.constant dense<0.000000e+00> : vector<8x512xf32>
    %233 = tpu.matmul %227, %7, %cst_42 {dimension_numbers = #tpu.dot_dimension_numbers<[1], [0], [0], [1], [0, 0, 1, 1], [], []>} : vector<8x128xf32>, vector<128x512xf32>, vector<8x512xf32> -> vector<8x512xf32>
    %234 = arith.addf %232, %233 : vector<8x512xf32>
    %235 = vector.extract_strided_slice %234 {offsets = [0, 0], sizes = [8, 128], strides = [1, 1]} : vector<8x512xf32> to vector<8x128xf32>
    %236 = arith.negf %235 : vector<8x128xf32>
    %237 = math.exp %236 : vector<8x128xf32>
    %cst_43 = arith.constant 1.000000e+00 : f32
    %238 = vector.broadcast %cst_43 : f32 to vector<8x128xf32>
    %239 = arith.addf %238, %237 : vector<8x128xf32>
    %240 = arith.divf %238, %239 : vector<8x128xf32>
    %241 = vector.extract_strided_slice %234 {offsets = [0, 128], sizes = [8, 128], strides = [1, 1]} : vector<8x512xf32> to vector<8x128xf32>
    %242 = arith.negf %241 : vector<8x128xf32>
    %243 = math.exp %242 : vector<8x128xf32>
    %cst_44 = arith.constant 1.000000e+00 : f32
    %244 = vector.broadcast %cst_44 : f32 to vector<8x128xf32>
    %245 = arith.addf %244, %243 : vector<8x128xf32>
    %246 = arith.divf %244, %245 : vector<8x128xf32>
    %247 = vector.extract_strided_slice %234 {offsets = [0, 256], sizes = [8, 128], strides = [1, 1]} : vector<8x512xf32> to vector<8x128xf32>
    %248 = math.tanh %247 : vector<8x128xf32>
    %249 = vector.extract_strided_slice %234 {offsets = [0, 384], sizes = [8, 128], strides = [1, 1]} : vector<8x512xf32> to vector<8x128xf32>
    %250 = arith.negf %249 : vector<8x128xf32>
    %251 = math.exp %250 : vector<8x128xf32>
    %cst_45 = arith.constant 1.000000e+00 : f32
    %252 = vector.broadcast %cst_45 : f32 to vector<8x128xf32>
    %253 = arith.addf %252, %251 : vector<8x128xf32>
    %254 = arith.divf %252, %253 : vector<8x128xf32>
    %255 = arith.mulf %246, %230 : vector<8x128xf32>
    %256 = arith.mulf %240, %248 : vector<8x128xf32>
    %257 = arith.addf %255, %256 : vector<8x128xf32>
    %258 = math.tanh %257 : vector<8x128xf32>
    %259 = arith.mulf %254, %258 : vector<8x128xf32>
    %c6_i32 = arith.constant 6 : i32
    %260 = vector.broadcast %c6_i32 : i32 to vector<8x1xi32>
    %261 = arith.cmpi sgt, %0, %260 : vector<8x1xi32>
    %262 = vector.shape_cast %261 : vector<8x1xi1> to vector<8x1xi1>
    %263 = vector.broadcast %262 : vector<8x1xi1> to vector<8x128xi1>
    %264 = arith.select %263, %259, %227 : vector<8x128xi1>, vector<8x128xf32>
    %265 = vector.shape_cast %261 : vector<8x1xi1> to vector<8x1xi1>
    %266 = vector.broadcast %265 : vector<8x1xi1> to vector<8x128xi1>
    %267 = arith.select %266, %257, %230 : vector<8x128xi1>, vector<8x128xf32>
    %c48 = arith.constant 48 : index
    %c0_46 = arith.constant 0 : index
    %268 = vector.load %arg11[%c48, %c0_46] : memref<64x128xf32, #tpu.memory_space<vmem>>, vector<8x128xf32>
    tpu.vector_store %arg11[%c48, %c0_46], %264 {strides = array<i32>} : memref<64x128xf32, #tpu.memory_space<vmem>>, vector<8x128xf32>,
    %269 = vector.extract_strided_slice %6 {offsets = [56, 0], sizes = [8, 512], strides = [1, 1]} : vector<64x512xf32> to vector<8x512xf32>
    %cst_47 = arith.constant dense<0.000000e+00> : vector<8x512xf32>
    %270 = tpu.matmul %264, %7, %cst_47 {dimension_numbers = #tpu.dot_dimension_numbers<[1], [0], [0], [1], [0, 0, 1, 1], [], []>} : vector<8x128xf32>, vector<128x512xf32>, vector<8x512xf32> -> vector<8x512xf32>
    %271 = arith.addf %269, %270 : vector<8x512xf32>
    %272 = vector.extract_strided_slice %271 {offsets = [0, 0], sizes = [8, 128], strides = [1, 1]} : vector<8x512xf32> to vector<8x128xf32>
    %273 = arith.negf %272 : vector<8x128xf32>
    %274 = math.exp %273 : vector<8x128xf32>
    %cst_48 = arith.constant 1.000000e+00 : f32
    %275 = vector.broadcast %cst_48 : f32 to vector<8x128xf32>
    %276 = arith.addf %275, %274 : vector<8x128xf32>
    %277 = arith.divf %275, %276 : vector<8x128xf32>
    %278 = vector.extract_strided_slice %271 {offsets = [0, 128], sizes = [8, 128], strides = [1, 1]} : vector<8x512xf32> to vector<8x128xf32>
    %279 = arith.negf %278 : vector<8x128xf32>
    %280 = math.exp %279 : vector<8x128xf32>
    %cst_49 = arith.constant 1.000000e+00 : f32
    %281 = vector.broadcast %cst_49 : f32 to vector<8x128xf32>
    %282 = arith.addf %281, %280 : vector<8x128xf32>
    %283 = arith.divf %281, %282 : vector<8x128xf32>
    %284 = vector.extract_strided_slice %271 {offsets = [0, 256], sizes = [8, 128], strides = [1, 1]} : vector<8x512xf32> to vector<8x128xf32>
    %285 = math.tanh %284 : vector<8x128xf32>
    %286 = vector.extract_strided_slice %271 {offsets = [0, 384], sizes = [8, 128], strides = [1, 1]} : vector<8x512xf32> to vector<8x128xf32>
    %287 = arith.negf %286 : vector<8x128xf32>
    %288 = math.exp %287 : vector<8x128xf32>
    %cst_50 = arith.constant 1.000000e+00 : f32
    %289 = vector.broadcast %cst_50 : f32 to vector<8x128xf32>
    %290 = arith.addf %289, %288 : vector<8x128xf32>
    %291 = arith.divf %289, %290 : vector<8x128xf32>
    %292 = arith.mulf %283, %267 : vector<8x128xf32>
    %293 = arith.mulf %277, %285 : vector<8x128xf32>
    %294 = arith.addf %292, %293 : vector<8x128xf32>
    %295 = math.tanh %294 : vector<8x128xf32>
    %296 = arith.mulf %291, %295 : vector<8x128xf32>
    %c7_i32 = arith.constant 7 : i32
    %297 = vector.broadcast %c7_i32 : i32 to vector<8x1xi32>
    %298 = arith.cmpi sgt, %0, %297 : vector<8x1xi32>
    %299 = vector.shape_cast %298 : vector<8x1xi1> to vector<8x1xi1>
    %300 = vector.broadcast %299 : vector<8x1xi1> to vector<8x128xi1>
    %301 = arith.select %300, %296, %264 : vector<8x128xi1>, vector<8x128xf32>
    %c56 = arith.constant 56 : index
    %c0_51 = arith.constant 0 : index
    %302 = vector.load %arg11[%c56, %c0_51] : memref<64x128xf32, #tpu.memory_space<vmem>>, vector<8x128xf32>
    tpu.vector_store %arg11[%c56, %c0_51], %301 {strides = array<i32>} : memref<64x128xf32, #tpu.memory_space<vmem>>, vector<8x128xf32>,
    %c0_52 = arith.constant 0 : index
    %c0_53 = arith.constant 0 : index
    %303 = vector.load %arg11[%c0_52, %c0_53] : memref<64x128xf32, #tpu.memory_space<vmem>>, vector<64x128xf32>
    %c0_54 = arith.constant 0 : index
    %c0_55 = arith.constant 0 : index
    %304 = vector.load %arg5[%c0_54, %c0_55] : memref<128x512xf32, #tpu.memory_space<vmem>>, vector<128x512xf32>
    %cst_56 = arith.constant dense<0.000000e+00> : vector<64x512xf32>
    %305 = tpu.matmul %303, %304, %cst_56 {dimension_numbers = #tpu.dot_dimension_numbers<[1], [0], [0], [1], [0, 0, 1, 1], [], []>} : vector<64x128xf32>, vector<128x512xf32>, vector<64x512xf32> -> vector<64x512xf32>
    %c0_57 = arith.constant 0 : index
    %c0_58 = arith.constant 0 : index
    %306 = vector.load %arg7[%c0_57, %c0_58] : memref<1x512xf32, #tpu.memory_space<vmem>>, vector<1x512xf32>
    %307 = vector.broadcast %306 : vector<1x512xf32> to vector<64x512xf32>
    %308 = arith.addf %305, %307 : vector<64x512xf32>
    %c0_59 = arith.constant 0 : index
    %c0_60 = arith.constant 0 : index
    %309 = vector.load %arg6[%c0_59, %c0_60] : memref<128x512xf32, #tpu.memory_space<vmem>>, vector<128x512xf32>
    %cst_61 = arith.constant 0.000000e+00 : f32
    %310 = vector.broadcast %cst_61 : f32 to vector<8x128xf32>
    %cst_62 = arith.constant 0.000000e+00 : f32
    %311 = vector.broadcast %cst_62 : f32 to vector<8x128xf32>
    %312 = vector.extract_strided_slice %308 {offsets = [0, 0], sizes = [8, 512], strides = [1, 1]} : vector<64x512xf32> to vector<8x512xf32>
    %cst_63 = arith.constant dense<0.000000e+00> : vector<8x512xf32>
    %313 = tpu.matmul %310, %309, %cst_63 {dimension_numbers = #tpu.dot_dimension_numbers<[1], [0], [0], [1], [0, 0, 1, 1], [], []>} : vector<8x128xf32>, vector<128x512xf32>, vector<8x512xf32> -> vector<8x512xf32>
    %314 = arith.addf %312, %313 : vector<8x512xf32>
    %315 = vector.extract_strided_slice %314 {offsets = [0, 0], sizes = [8, 128], strides = [1, 1]} : vector<8x512xf32> to vector<8x128xf32>
    %316 = arith.negf %315 : vector<8x128xf32>
    %317 = math.exp %316 : vector<8x128xf32>
    %cst_64 = arith.constant 1.000000e+00 : f32
    %318 = vector.broadcast %cst_64 : f32 to vector<8x128xf32>
    %319 = arith.addf %318, %317 : vector<8x128xf32>
    %320 = arith.divf %318, %319 : vector<8x128xf32>
    %321 = vector.extract_strided_slice %314 {offsets = [0, 128], sizes = [8, 128], strides = [1, 1]} : vector<8x512xf32> to vector<8x128xf32>
    %322 = arith.negf %321 : vector<8x128xf32>
    %323 = math.exp %322 : vector<8x128xf32>
    %cst_65 = arith.constant 1.000000e+00 : f32
    %324 = vector.broadcast %cst_65 : f32 to vector<8x128xf32>
    %325 = arith.addf %324, %323 : vector<8x128xf32>
    %326 = arith.divf %324, %325 : vector<8x128xf32>
    %327 = vector.extract_strided_slice %314 {offsets = [0, 256], sizes = [8, 128], strides = [1, 1]} : vector<8x512xf32> to vector<8x128xf32>
    %328 = math.tanh %327 : vector<8x128xf32>
    %329 = vector.extract_strided_slice %314 {offsets = [0, 384], sizes = [8, 128], strides = [1, 1]} : vector<8x512xf32> to vector<8x128xf32>
    %330 = arith.negf %329 : vector<8x128xf32>
    %331 = math.exp %330 : vector<8x128xf32>
    %cst_66 = arith.constant 1.000000e+00 : f32
    %332 = vector.broadcast %cst_66 : f32 to vector<8x128xf32>
    %333 = arith.addf %332, %331 : vector<8x128xf32>
    %334 = arith.divf %332, %333 : vector<8x128xf32>
    %335 = arith.mulf %326, %311 : vector<8x128xf32>
    %336 = arith.mulf %320, %328 : vector<8x128xf32>
    %337 = arith.addf %335, %336 : vector<8x128xf32>
    %338 = math.tanh %337 : vector<8x128xf32>
    %339 = arith.mulf %334, %338 : vector<8x128xf32>
    %c0_i32_67 = arith.constant 0 : i32
    %340 = vector.broadcast %c0_i32_67 : i32 to vector<8x1xi32>
    %341 = arith.cmpi sgt, %0, %340 : vector<8x1xi32>
    %342 = vector.shape_cast %341 : vector<8x1xi1> to vector<8x1xi1>
    %343 = vector.broadcast %342 : vector<8x1xi1> to vector<8x128xi1>
    %344 = arith.select %343, %339, %310 : vector<8x128xi1>, vector<8x128xf32>
    %345 = vector.shape_cast %341 : vector<8x1xi1> to vector<8x1xi1>
    %346 = vector.broadcast %345 : vector<8x1xi1> to vector<8x128xi1>
    %347 = arith.select %346, %337, %311 : vector<8x128xi1>, vector<8x128xf32>
    %348 = vector.extract_strided_slice %308 {offsets = [8, 0], sizes = [8, 512], strides = [1, 1]} : vector<64x512xf32> to vector<8x512xf32>
    %cst_68 = arith.constant dense<0.000000e+00> : vector<8x512xf32>
    %349 = tpu.matmul %344, %309, %cst_68 {dimension_numbers = #tpu.dot_dimension_numbers<[1], [0], [0], [1], [0, 0, 1, 1], [], []>} : vector<8x128xf32>, vector<128x512xf32>, vector<8x512xf32> -> vector<8x512xf32>
    %350 = arith.addf %348, %349 : vector<8x512xf32>
    %351 = vector.extract_strided_slice %350 {offsets = [0, 0], sizes = [8, 128], strides = [1, 1]} : vector<8x512xf32> to vector<8x128xf32>
    %352 = arith.negf %351 : vector<8x128xf32>
    %353 = math.exp %352 : vector<8x128xf32>
    %cst_69 = arith.constant 1.000000e+00 : f32
    %354 = vector.broadcast %cst_69 : f32 to vector<8x128xf32>
    %355 = arith.addf %354, %353 : vector<8x128xf32>
    %356 = arith.divf %354, %355 : vector<8x128xf32>
    %357 = vector.extract_strided_slice %350 {offsets = [0, 128], sizes = [8, 128], strides = [1, 1]} : vector<8x512xf32> to vector<8x128xf32>
    %358 = arith.negf %357 : vector<8x128xf32>
    %359 = math.exp %358 : vector<8x128xf32>
    %cst_70 = arith.constant 1.000000e+00 : f32
    %360 = vector.broadcast %cst_70 : f32 to vector<8x128xf32>
    %361 = arith.addf %360, %359 : vector<8x128xf32>
    %362 = arith.divf %360, %361 : vector<8x128xf32>
    %363 = vector.extract_strided_slice %350 {offsets = [0, 256], sizes = [8, 128], strides = [1, 1]} : vector<8x512xf32> to vector<8x128xf32>
    %364 = math.tanh %363 : vector<8x128xf32>
    %365 = vector.extract_strided_slice %350 {offsets = [0, 384], sizes = [8, 128], strides = [1, 1]} : vector<8x512xf32> to vector<8x128xf32>
    %366 = arith.negf %365 : vector<8x128xf32>
    %367 = math.exp %366 : vector<8x128xf32>
    %cst_71 = arith.constant 1.000000e+00 : f32
    %368 = vector.broadcast %cst_71 : f32 to vector<8x128xf32>
    %369 = arith.addf %368, %367 : vector<8x128xf32>
    %370 = arith.divf %368, %369 : vector<8x128xf32>
    %371 = arith.mulf %362, %347 : vector<8x128xf32>
    %372 = arith.mulf %356, %364 : vector<8x128xf32>
    %373 = arith.addf %371, %372 : vector<8x128xf32>
    %374 = math.tanh %373 : vector<8x128xf32>
    %375 = arith.mulf %370, %374 : vector<8x128xf32>
    %c1_i32_72 = arith.constant 1 : i32
    %376 = vector.broadcast %c1_i32_72 : i32 to vector<8x1xi32>
    %377 = arith.cmpi sgt, %0, %376 : vector<8x1xi32>
    %378 = vector.shape_cast %377 : vector<8x1xi1> to vector<8x1xi1>
    %379 = vector.broadcast %378 : vector<8x1xi1> to vector<8x128xi1>
    %380 = arith.select %379, %375, %344 : vector<8x128xi1>, vector<8x128xf32>
    %381 = vector.shape_cast %377 : vector<8x1xi1> to vector<8x1xi1>
    %382 = vector.broadcast %381 : vector<8x1xi1> to vector<8x128xi1>
    %383 = arith.select %382, %373, %347 : vector<8x128xi1>, vector<8x128xf32>
    %384 = vector.extract_strided_slice %308 {offsets = [16, 0], sizes = [8, 512], strides = [1, 1]} : vector<64x512xf32> to vector<8x512xf32>
    %cst_73 = arith.constant dense<0.000000e+00> : vector<8x512xf32>
    %385 = tpu.matmul %380, %309, %cst_73 {dimension_numbers = #tpu.dot_dimension_numbers<[1], [0], [0], [1], [0, 0, 1, 1], [], []>} : vector<8x128xf32>, vector<128x512xf32>, vector<8x512xf32> -> vector<8x512xf32>
    %386 = arith.addf %384, %385 : vector<8x512xf32>
    %387 = vector.extract_strided_slice %386 {offsets = [0, 0], sizes = [8, 128], strides = [1, 1]} : vector<8x512xf32> to vector<8x128xf32>
    %388 = arith.negf %387 : vector<8x128xf32>
    %389 = math.exp %388 : vector<8x128xf32>
    %cst_74 = arith.constant 1.000000e+00 : f32
    %390 = vector.broadcast %cst_74 : f32 to vector<8x128xf32>
    %391 = arith.addf %390, %389 : vector<8x128xf32>
    %392 = arith.divf %390, %391 : vector<8x128xf32>
    %393 = vector.extract_strided_slice %386 {offsets = [0, 128], sizes = [8, 128], strides = [1, 1]} : vector<8x512xf32> to vector<8x128xf32>
    %394 = arith.negf %393 : vector<8x128xf32>
    %395 = math.exp %394 : vector<8x128xf32>
    %cst_75 = arith.constant 1.000000e+00 : f32
    %396 = vector.broadcast %cst_75 : f32 to vector<8x128xf32>
    %397 = arith.addf %396, %395 : vector<8x128xf32>
    %398 = arith.divf %396, %397 : vector<8x128xf32>
    %399 = vector.extract_strided_slice %386 {offsets = [0, 256], sizes = [8, 128], strides = [1, 1]} : vector<8x512xf32> to vector<8x128xf32>
    %400 = math.tanh %399 : vector<8x128xf32>
    %401 = vector.extract_strided_slice %386 {offsets = [0, 384], sizes = [8, 128], strides = [1, 1]} : vector<8x512xf32> to vector<8x128xf32>
    %402 = arith.negf %401 : vector<8x128xf32>
    %403 = math.exp %402 : vector<8x128xf32>
    %cst_76 = arith.constant 1.000000e+00 : f32
    %404 = vector.broadcast %cst_76 : f32 to vector<8x128xf32>
    %405 = arith.addf %404, %403 : vector<8x128xf32>
    %406 = arith.divf %404, %405 : vector<8x128xf32>
    %407 = arith.mulf %398, %383 : vector<8x128xf32>
    %408 = arith.mulf %392, %400 : vector<8x128xf32>
    %409 = arith.addf %407, %408 : vector<8x128xf32>
    %410 = math.tanh %409 : vector<8x128xf32>
    %411 = arith.mulf %406, %410 : vector<8x128xf32>
    %c2_i32_77 = arith.constant 2 : i32
    %412 = vector.broadcast %c2_i32_77 : i32 to vector<8x1xi32>
    %413 = arith.cmpi sgt, %0, %412 : vector<8x1xi32>
    %414 = vector.shape_cast %413 : vector<8x1xi1> to vector<8x1xi1>
    %415 = vector.broadcast %414 : vector<8x1xi1> to vector<8x128xi1>
    %416 = arith.select %415, %411, %380 : vector<8x128xi1>, vector<8x128xf32>
    %417 = vector.shape_cast %413 : vector<8x1xi1> to vector<8x1xi1>
    %418 = vector.broadcast %417 : vector<8x1xi1> to vector<8x128xi1>
    %419 = arith.select %418, %409, %383 : vector<8x128xi1>, vector<8x128xf32>
    %420 = vector.extract_strided_slice %308 {offsets = [24, 0], sizes = [8, 512], strides = [1, 1]} : vector<64x512xf32> to vector<8x512xf32>
    %cst_78 = arith.constant dense<0.000000e+00> : vector<8x512xf32>
    %421 = tpu.matmul %416, %309, %cst_78 {dimension_numbers = #tpu.dot_dimension_numbers<[1], [0], [0], [1], [0, 0, 1, 1], [], []>} : vector<8x128xf32>, vector<128x512xf32>, vector<8x512xf32> -> vector<8x512xf32>
    %422 = arith.addf %420, %421 : vector<8x512xf32>
    %423 = vector.extract_strided_slice %422 {offsets = [0, 0], sizes = [8, 128], strides = [1, 1]} : vector<8x512xf32> to vector<8x128xf32>
    %424 = arith.negf %423 : vector<8x128xf32>
    %425 = math.exp %424 : vector<8x128xf32>
    %cst_79 = arith.constant 1.000000e+00 : f32
    %426 = vector.broadcast %cst_79 : f32 to vector<8x128xf32>
    %427 = arith.addf %426, %425 : vector<8x128xf32>
    %428 = arith.divf %426, %427 : vector<8x128xf32>
    %429 = vector.extract_strided_slice %422 {offsets = [0, 128], sizes = [8, 128], strides = [1, 1]} : vector<8x512xf32> to vector<8x128xf32>
    %430 = arith.negf %429 : vector<8x128xf32>
    %431 = math.exp %430 : vector<8x128xf32>
    %cst_80 = arith.constant 1.000000e+00 : f32
    %432 = vector.broadcast %cst_80 : f32 to vector<8x128xf32>
    %433 = arith.addf %432, %431 : vector<8x128xf32>
    %434 = arith.divf %432, %433 : vector<8x128xf32>
    %435 = vector.extract_strided_slice %422 {offsets = [0, 256], sizes = [8, 128], strides = [1, 1]} : vector<8x512xf32> to vector<8x128xf32>
    %436 = math.tanh %435 : vector<8x128xf32>
    %437 = vector.extract_strided_slice %422 {offsets = [0, 384], sizes = [8, 128], strides = [1, 1]} : vector<8x512xf32> to vector<8x128xf32>
    %438 = arith.negf %437 : vector<8x128xf32>
    %439 = math.exp %438 : vector<8x128xf32>
    %cst_81 = arith.constant 1.000000e+00 : f32
    %440 = vector.broadcast %cst_81 : f32 to vector<8x128xf32>
    %441 = arith.addf %440, %439 : vector<8x128xf32>
    %442 = arith.divf %440, %441 : vector<8x128xf32>
    %443 = arith.mulf %434, %419 : vector<8x128xf32>
    %444 = arith.mulf %428, %436 : vector<8x128xf32>
    %445 = arith.addf %443, %444 : vector<8x128xf32>
    %446 = math.tanh %445 : vector<8x128xf32>
    %447 = arith.mulf %442, %446 : vector<8x128xf32>
    %c3_i32_82 = arith.constant 3 : i32
    %448 = vector.broadcast %c3_i32_82 : i32 to vector<8x1xi32>
    %449 = arith.cmpi sgt, %0, %448 : vector<8x1xi32>
    %450 = vector.shape_cast %449 : vector<8x1xi1> to vector<8x1xi1>
    %451 = vector.broadcast %450 : vector<8x1xi1> to vector<8x128xi1>
    %452 = arith.select %451, %447, %416 : vector<8x128xi1>, vector<8x128xf32>
    %453 = vector.shape_cast %449 : vector<8x1xi1> to vector<8x1xi1>
    %454 = vector.broadcast %453 : vector<8x1xi1> to vector<8x128xi1>
    %455 = arith.select %454, %445, %419 : vector<8x128xi1>, vector<8x128xf32>
    %456 = vector.extract_strided_slice %308 {offsets = [32, 0], sizes = [8, 512], strides = [1, 1]} : vector<64x512xf32> to vector<8x512xf32>
    %cst_83 = arith.constant dense<0.000000e+00> : vector<8x512xf32>
    %457 = tpu.matmul %452, %309, %cst_83 {dimension_numbers = #tpu.dot_dimension_numbers<[1], [0], [0], [1], [0, 0, 1, 1], [], []>} : vector<8x128xf32>, vector<128x512xf32>, vector<8x512xf32> -> vector<8x512xf32>
    %458 = arith.addf %456, %457 : vector<8x512xf32>
    %459 = vector.extract_strided_slice %458 {offsets = [0, 0], sizes = [8, 128], strides = [1, 1]} : vector<8x512xf32> to vector<8x128xf32>
    %460 = arith.negf %459 : vector<8x128xf32>
    %461 = math.exp %460 : vector<8x128xf32>
    %cst_84 = arith.constant 1.000000e+00 : f32
    %462 = vector.broadcast %cst_84 : f32 to vector<8x128xf32>
    %463 = arith.addf %462, %461 : vector<8x128xf32>
    %464 = arith.divf %462, %463 : vector<8x128xf32>
    %465 = vector.extract_strided_slice %458 {offsets = [0, 128], sizes = [8, 128], strides = [1, 1]} : vector<8x512xf32> to vector<8x128xf32>
    %466 = arith.negf %465 : vector<8x128xf32>
    %467 = math.exp %466 : vector<8x128xf32>
    %cst_85 = arith.constant 1.000000e+00 : f32
    %468 = vector.broadcast %cst_85 : f32 to vector<8x128xf32>
    %469 = arith.addf %468, %467 : vector<8x128xf32>
    %470 = arith.divf %468, %469 : vector<8x128xf32>
    %471 = vector.extract_strided_slice %458 {offsets = [0, 256], sizes = [8, 128], strides = [1, 1]} : vector<8x512xf32> to vector<8x128xf32>
    %472 = math.tanh %471 : vector<8x128xf32>
    %473 = vector.extract_strided_slice %458 {offsets = [0, 384], sizes = [8, 128], strides = [1, 1]} : vector<8x512xf32> to vector<8x128xf32>
    %474 = arith.negf %473 : vector<8x128xf32>
    %475 = math.exp %474 : vector<8x128xf32>
    %cst_86 = arith.constant 1.000000e+00 : f32
    %476 = vector.broadcast %cst_86 : f32 to vector<8x128xf32>
    %477 = arith.addf %476, %475 : vector<8x128xf32>
    %478 = arith.divf %476, %477 : vector<8x128xf32>
    %479 = arith.mulf %470, %455 : vector<8x128xf32>
    %480 = arith.mulf %464, %472 : vector<8x128xf32>
    %481 = arith.addf %479, %480 : vector<8x128xf32>
    %482 = math.tanh %481 : vector<8x128xf32>
    %483 = arith.mulf %478, %482 : vector<8x128xf32>
    %c4_i32_87 = arith.constant 4 : i32
    %484 = vector.broadcast %c4_i32_87 : i32 to vector<8x1xi32>
    %485 = arith.cmpi sgt, %0, %484 : vector<8x1xi32>
    %486 = vector.shape_cast %485 : vector<8x1xi1> to vector<8x1xi1>
    %487 = vector.broadcast %486 : vector<8x1xi1> to vector<8x128xi1>
    %488 = arith.select %487, %483, %452 : vector<8x128xi1>, vector<8x128xf32>
    %489 = vector.shape_cast %485 : vector<8x1xi1> to vector<8x1xi1>
    %490 = vector.broadcast %489 : vector<8x1xi1> to vector<8x128xi1>
    %491 = arith.select %490, %481, %455 : vector<8x128xi1>, vector<8x128xf32>
    %492 = vector.extract_strided_slice %308 {offsets = [40, 0], sizes = [8, 512], strides = [1, 1]} : vector<64x512xf32> to vector<8x512xf32>
    %cst_88 = arith.constant dense<0.000000e+00> : vector<8x512xf32>
    %493 = tpu.matmul %488, %309, %cst_88 {dimension_numbers = #tpu.dot_dimension_numbers<[1], [0], [0], [1], [0, 0, 1, 1], [], []>} : vector<8x128xf32>, vector<128x512xf32>, vector<8x512xf32> -> vector<8x512xf32>
    %494 = arith.addf %492, %493 : vector<8x512xf32>
    %495 = vector.extract_strided_slice %494 {offsets = [0, 0], sizes = [8, 128], strides = [1, 1]} : vector<8x512xf32> to vector<8x128xf32>
    %496 = arith.negf %495 : vector<8x128xf32>
    %497 = math.exp %496 : vector<8x128xf32>
    %cst_89 = arith.constant 1.000000e+00 : f32
    %498 = vector.broadcast %cst_89 : f32 to vector<8x128xf32>
    %499 = arith.addf %498, %497 : vector<8x128xf32>
    %500 = arith.divf %498, %499 : vector<8x128xf32>
    %501 = vector.extract_strided_slice %494 {offsets = [0, 128], sizes = [8, 128], strides = [1, 1]} : vector<8x512xf32> to vector<8x128xf32>
    %502 = arith.negf %501 : vector<8x128xf32>
    %503 = math.exp %502 : vector<8x128xf32>
    %cst_90 = arith.constant 1.000000e+00 : f32
    %504 = vector.broadcast %cst_90 : f32 to vector<8x128xf32>
    %505 = arith.addf %504, %503 : vector<8x128xf32>
    %506 = arith.divf %504, %505 : vector<8x128xf32>
    %507 = vector.extract_strided_slice %494 {offsets = [0, 256], sizes = [8, 128], strides = [1, 1]} : vector<8x512xf32> to vector<8x128xf32>
    %508 = math.tanh %507 : vector<8x128xf32>
    %509 = vector.extract_strided_slice %494 {offsets = [0, 384], sizes = [8, 128], strides = [1, 1]} : vector<8x512xf32> to vector<8x128xf32>
    %510 = arith.negf %509 : vector<8x128xf32>
    %511 = math.exp %510 : vector<8x128xf32>
    %cst_91 = arith.constant 1.000000e+00 : f32
    %512 = vector.broadcast %cst_91 : f32 to vector<8x128xf32>
    %513 = arith.addf %512, %511 : vector<8x128xf32>
    %514 = arith.divf %512, %513 : vector<8x128xf32>
    %515 = arith.mulf %506, %491 : vector<8x128xf32>
    %516 = arith.mulf %500, %508 : vector<8x128xf32>
    %517 = arith.addf %515, %516 : vector<8x128xf32>
    %518 = math.tanh %517 : vector<8x128xf32>
    %519 = arith.mulf %514, %518 : vector<8x128xf32>
    %c5_i32_92 = arith.constant 5 : i32
    %520 = vector.broadcast %c5_i32_92 : i32 to vector<8x1xi32>
    %521 = arith.cmpi sgt, %0, %520 : vector<8x1xi32>
    %522 = vector.shape_cast %521 : vector<8x1xi1> to vector<8x1xi1>
    %523 = vector.broadcast %522 : vector<8x1xi1> to vector<8x128xi1>
    %524 = arith.select %523, %519, %488 : vector<8x128xi1>, vector<8x128xf32>
    %525 = vector.shape_cast %521 : vector<8x1xi1> to vector<8x1xi1>
    %526 = vector.broadcast %525 : vector<8x1xi1> to vector<8x128xi1>
    %527 = arith.select %526, %517, %491 : vector<8x128xi1>, vector<8x128xf32>
    %528 = vector.extract_strided_slice %308 {offsets = [48, 0], sizes = [8, 512], strides = [1, 1]} : vector<64x512xf32> to vector<8x512xf32>
    %cst_93 = arith.constant dense<0.000000e+00> : vector<8x512xf32>
    %529 = tpu.matmul %524, %309, %cst_93 {dimension_numbers = #tpu.dot_dimension_numbers<[1], [0], [0], [1], [0, 0, 1, 1], [], []>} : vector<8x128xf32>, vector<128x512xf32>, vector<8x512xf32> -> vector<8x512xf32>
    %530 = arith.addf %528, %529 : vector<8x512xf32>
    %531 = vector.extract_strided_slice %530 {offsets = [0, 0], sizes = [8, 128], strides = [1, 1]} : vector<8x512xf32> to vector<8x128xf32>
    %532 = arith.negf %531 : vector<8x128xf32>
    %533 = math.exp %532 : vector<8x128xf32>
    %cst_94 = arith.constant 1.000000e+00 : f32
    %534 = vector.broadcast %cst_94 : f32 to vector<8x128xf32>
    %535 = arith.addf %534, %533 : vector<8x128xf32>
    %536 = arith.divf %534, %535 : vector<8x128xf32>
    %537 = vector.extract_strided_slice %530 {offsets = [0, 128], sizes = [8, 128], strides = [1, 1]} : vector<8x512xf32> to vector<8x128xf32>
    %538 = arith.negf %537 : vector<8x128xf32>
    %539 = math.exp %538 : vector<8x128xf32>
    %cst_95 = arith.constant 1.000000e+00 : f32
    %540 = vector.broadcast %cst_95 : f32 to vector<8x128xf32>
    %541 = arith.addf %540, %539 : vector<8x128xf32>
    %542 = arith.divf %540, %541 : vector<8x128xf32>
    %543 = vector.extract_strided_slice %530 {offsets = [0, 256], sizes = [8, 128], strides = [1, 1]} : vector<8x512xf32> to vector<8x128xf32>
    %544 = math.tanh %543 : vector<8x128xf32>
    %545 = vector.extract_strided_slice %530 {offsets = [0, 384], sizes = [8, 128], strides = [1, 1]} : vector<8x512xf32> to vector<8x128xf32>
    %546 = arith.negf %545 : vector<8x128xf32>
    %547 = math.exp %546 : vector<8x128xf32>
    %cst_96 = arith.constant 1.000000e+00 : f32
    %548 = vector.broadcast %cst_96 : f32 to vector<8x128xf32>
    %549 = arith.addf %548, %547 : vector<8x128xf32>
    %550 = arith.divf %548, %549 : vector<8x128xf32>
    %551 = arith.mulf %542, %527 : vector<8x128xf32>
    %552 = arith.mulf %536, %544 : vector<8x128xf32>
    %553 = arith.addf %551, %552 : vector<8x128xf32>
    %554 = math.tanh %553 : vector<8x128xf32>
    %555 = arith.mulf %550, %554 : vector<8x128xf32>
    %c6_i32_97 = arith.constant 6 : i32
    %556 = vector.broadcast %c6_i32_97 : i32 to vector<8x1xi32>
    %557 = arith.cmpi sgt, %0, %556 : vector<8x1xi32>
    %558 = vector.shape_cast %557 : vector<8x1xi1> to vector<8x1xi1>
    %559 = vector.broadcast %558 : vector<8x1xi1> to vector<8x128xi1>
    %560 = arith.select %559, %555, %524 : vector<8x128xi1>, vector<8x128xf32>
    %561 = vector.shape_cast %557 : vector<8x1xi1> to vector<8x1xi1>
    %562 = vector.broadcast %561 : vector<8x1xi1> to vector<8x128xi1>
    %563 = arith.select %562, %553, %527 : vector<8x128xi1>, vector<8x128xf32>
    %564 = vector.extract_strided_slice %308 {offsets = [56, 0], sizes = [8, 512], strides = [1, 1]} : vector<64x512xf32> to vector<8x512xf32>
    %cst_98 = arith.constant dense<0.000000e+00> : vector<8x512xf32>
    %565 = tpu.matmul %560, %309, %cst_98 {dimension_numbers = #tpu.dot_dimension_numbers<[1], [0], [0], [1], [0, 0, 1, 1], [], []>} : vector<8x128xf32>, vector<128x512xf32>, vector<8x512xf32> -> vector<8x512xf32>
    %566 = arith.addf %564, %565 : vector<8x512xf32>
    %567 = vector.extract_strided_slice %566 {offsets = [0, 0], sizes = [8, 128], strides = [1, 1]} : vector<8x512xf32> to vector<8x128xf32>
    %568 = arith.negf %567 : vector<8x128xf32>
    %569 = math.exp %568 : vector<8x128xf32>
    %cst_99 = arith.constant 1.000000e+00 : f32
    %570 = vector.broadcast %cst_99 : f32 to vector<8x128xf32>
    %571 = arith.addf %570, %569 : vector<8x128xf32>
    %572 = arith.divf %570, %571 : vector<8x128xf32>
    %573 = vector.extract_strided_slice %566 {offsets = [0, 128], sizes = [8, 128], strides = [1, 1]} : vector<8x512xf32> to vector<8x128xf32>
    %574 = arith.negf %573 : vector<8x128xf32>
    %575 = math.exp %574 : vector<8x128xf32>
    %cst_100 = arith.constant 1.000000e+00 : f32
    %576 = vector.broadcast %cst_100 : f32 to vector<8x128xf32>
    %577 = arith.addf %576, %575 : vector<8x128xf32>
    %578 = arith.divf %576, %577 : vector<8x128xf32>
    %579 = vector.extract_strided_slice %566 {offsets = [0, 256], sizes = [8, 128], strides = [1, 1]} : vector<8x512xf32> to vector<8x128xf32>
    %580 = math.tanh %579 : vector<8x128xf32>
    %581 = vector.extract_strided_slice %566 {offsets = [0, 384], sizes = [8, 128], strides = [1, 1]} : vector<8x512xf32> to vector<8x128xf32>
    %582 = arith.negf %581 : vector<8x128xf32>
    %583 = math.exp %582 : vector<8x128xf32>
    %cst_101 = arith.constant 1.000000e+00 : f32
    %584 = vector.broadcast %cst_101 : f32 to vector<8x128xf32>
    %585 = arith.addf %584, %583 : vector<8x128xf32>
    %586 = arith.divf %584, %585 : vector<8x128xf32>
    %587 = arith.mulf %578, %563 : vector<8x128xf32>
    %588 = arith.mulf %572, %580 : vector<8x128xf32>
    %589 = arith.addf %587, %588 : vector<8x128xf32>
    %590 = math.tanh %589 : vector<8x128xf32>
    %591 = arith.mulf %586, %590 : vector<8x128xf32>
    %c7_i32_102 = arith.constant 7 : i32
    %592 = vector.broadcast %c7_i32_102 : i32 to vector<8x1xi32>
    %593 = arith.cmpi sgt, %0, %592 : vector<8x1xi32>
    %594 = vector.shape_cast %593 : vector<8x1xi1> to vector<8x1xi1>
    %595 = vector.broadcast %594 : vector<8x1xi1> to vector<8x128xi1>
    %596 = arith.select %595, %591, %560 : vector<8x128xi1>, vector<8x128xf32>
    %c0_103 = arith.constant 0 : index
    %c0_104 = arith.constant 0 : index
    %597 = vector.load %arg8[%c0_103, %c0_104] : memref<128x4xf32, #tpu.memory_space<vmem>>, vector<128x4xf32>
    %cst_105 = arith.constant dense<0.000000e+00> : vector<8x4xf32>
    %598 = tpu.matmul %596, %597, %cst_105 {dimension_numbers = #tpu.dot_dimension_numbers<[1], [0], [0], [1], [0, 0, 1, 1], [], []>} : vector<8x128xf32>, vector<128x4xf32>, vector<8x4xf32> -> vector<8x4xf32>
    %c0_106 = arith.constant 0 : index
    %c0_107 = arith.constant 0 : index
    %599 = vector.load %arg9[%c0_106, %c0_107] : memref<1x4xf32, #tpu.memory_space<vmem>>, vector<1x4xf32>
    %600 = vector.broadcast %599 : vector<1x4xf32> to vector<8x4xf32>
    %601 = arith.addf %598, %600 : vector<8x4xf32>
    %c0_108 = arith.constant 0 : index
    %c0_109 = arith.constant 0 : index
    %602 = vector.load %arg10[%c0_108, %c0_109] : memref<8x4xf32, #tpu.memory_space<vmem>>, vector<8x4xf32>
    tpu.vector_store %arg10[%c0_108, %c0_109], %601 {strides = array<i32>} : memref<8x4xf32, #tpu.memory_space<vmem>>, vector<8x4xf32>,
    return
  }
}

</mosaic_0001>

<bundles_post_ra>
// kernel: lstm_glove_forward.1
= control target key start
LH: loop header
LB: loop body
LE: loop exit
PB: predicated region body
PF: predicated region fallthrough
CT: control target
= control target key end

     0   :  { %vm86_vm0 = vcmask 523264   ;;  %s7065_s2 = inlined_call_operand.vmem [shape: f32[64,512], index: 2, kind: input, shape index: {}]   ;;  %s7066_s1 = inlined_call_operand.vmem [shape: f32[64,64], index: 1, kind: input, shape index: {}]   ;;  %s7067_s3 = inlined_call_operand.vmem [shape: f32[128,512], index: 3, kind: input, shape index: {}]   ;;  %s7068_s0 = inlined_call_operand.vmem [shape: s32[8,1], index: 0, kind: input, shape index: {}]   ;;  %s7069_s4 = inlined_call_operand.vmem [shape: f32[1,512], index: 4, kind: input, shape index: {}]   ;;  %s7070_s5 = inlined_call_operand.vmem [shape: f32[128,512], index: 5, kind: input, shape index: {}]   ;;  %s7071_s6 = inlined_call_operand.vmem [shape: f32[128,512], index: 6, kind: input, shape index: {}]   ;;  %s7072_s7 = inlined_call_operand.vmem [shape: f32[1,512], index: 7, kind: input, shape index: {}]   ;;  %s7073_s9 = inlined_call_operand.vmem [shape: f32[1,4], index: 9, kind: input, shape index: {}]   ;;  %s7074_s8 = inlined_call_operand.vmem [shape: f32[128,4], index: 8, kind: input, shape index: {}]   ;;  %s7075_s10 = inlined_call_operand.vmem [shape: f32[8,4], index: 10, kind: output, shape index: {}]  }
   0x1   :  { %v72_v0 = vld [vmem:[%s7065_s2 + $0xe0] sm:$0xff]  ;;  %v75_v1 = vld [vmem:[%s7065_s2 + $0xf8] sm:$0xff]  ;;  %v3745_v17 = vld [vmem:[%s7066_s1 + $0x28] sm:$0xff] }
   0x2   :  { %v68_v2 = vld [vmem:[%s7065_s2 + $0xc0] sm:$0xff]  ;;  %119 = vmatpush.msra.mxu0 %v72_v0  ;;  %3225 = vmatpush.msra.mxu1 %v72_v0  ;;  %v71_v3 = vld [vmem:[%s7065_s2 + $0xd8] sm:$0xff]  ;;  %v73_v18 = vld [vmem:[%s7065_s2 + $0xe8] sm:$0xff] }
   0x3   :  { %3226 = vmatpush.msra.mxu2 %v72_v0  ;;  %242 = vmatpush.msra.mxu3 %v75_v1  ;;  %v64_v4 = vld [vmem:[%s7065_s2 + $0xa0] sm:$0xff]  ;;  %v67_v5 = vld [vmem:[%s7065_s2 + $0xb8] sm:$0xff]  ;;  %v74_v19 = vld [vmem:[%s7065_s2 + $0xf0] sm:$0xff] }
   0x4   :  { %120 = vmatpush.msra.mxu0 %v68_v2  ;;  %3227 = vmatpush.msra.mxu1 %v68_v2  ;;  %v60_v6 = vld [vmem:[%s7065_s2 + $0x80] sm:$0xff]  ;;  %v63_v7 = vld [vmem:[%s7065_s2 + $0x98] sm:$0xff]  ;;  %v69_v21 = vld [vmem:[%s7065_s2 + $0xc8] sm:$0xff] }
   0x5   :  { %3228 = vmatpush.msra.mxu2 %v68_v2  ;;  %243 = vmatpush.msra.mxu3 %v71_v3  ;;  %v56_v8 = vld [vmem:[%s7065_s2 + $0x60] sm:$0xff]  ;;  %v59_v9 = vld [vmem:[%s7065_s2 + $0x78] sm:$0xff]  ;;  %v70_v22 = vld [vmem:[%s7065_s2 + $0xd0] sm:$0xff] }
   0x6   :  { %121 = vmatpush.msra.mxu0 %v64_v4  ;;  %3229 = vmatpush.msra.mxu1 %v64_v4  ;;  %v52_v10 = vld [vmem:[%s7065_s2 + $0x40] sm:$0xff]  ;;  %v55_v11 = vld [vmem:[%s7065_s2 + $0x58] sm:$0xff]  ;;  %v65_v25 = vld [vmem:[%s7065_s2 + $0xa8] sm:$0xff] }
   0x7   :  { %3230 = vmatpush.msra.mxu2 %v64_v4  ;;  %244 = vmatpush.msra.mxu3 %v67_v5  ;;  %v48_v12 = vld [vmem:[%s7065_s2 + $0x20] sm:$0xff]  ;;  %v51_v13 = vld [vmem:[%s7065_s2 + $0x38] sm:$0xff]  ;;  %v66_v26 = vld [vmem:[%s7065_s2 + $0xb0] sm:$0xff] }
   0x8   :  { %122 = vmatpush.msra.mxu0 %v60_v6  ;;  %3231 = vmatpush.msra.mxu1 %v60_v6  ;;  %v44_v14 = vld [vmem:[%s7065_s2] sm:$0xff]  ;;  %v47_v15 = vld [vmem:[%s7065_s2 + $0x18] sm:$0xff]  ;;  %v61_v29 = vld [vmem:[%s7065_s2 + $0x88] sm:$0xff] }
   0x9   :  { %3232 = vmatpush.msra.mxu2 %v60_v6  ;;  %245 = vmatpush.msra.mxu3 %v63_v7  ;;  %v3740_v16 = vld [vmem:[%s7066_s1] sm:$0xff]  ;;  %v3756_v20 = vld [vmem:[%s7066_s1 + $0x38] sm:$0xff]  ;;  %v62_v30 = vld [vmem:[%s7065_s2 + $0x90] sm:$0xff] }
   0xa   :  { %123 = vmatpush.msra.mxu0 %v56_v8  ;;  %3233 = vmatpush.msra.mxu1 %v56_v8  ;;  %v3771_v23 = vld [vmem:[%s7067_s3 + $0x1e0] sm:$0xff]  ;;  %v3776_v24 = vld [vmem:[%s7067_s3 + $0x1f8] sm:$0xff]  ;;  %v3809_v31 = vld [vmem:[%s7066_s1 + $0x8] sm:$0xff] }
   0xb   :  { %3234 = vmatpush.msra.mxu2 %v56_v8  ;;  %246 = vmatpush.msra.mxu3 %v59_v9  ;;  %7354 = vst [vmem:[#allocation3_spill] sm:$0xff] %v3771_v23  ;;  %v3791_v27 = vld [vmem:[%s7067_s3 + $0x1c0] sm:$0xff]  ;;  %v3796_v28 = vld [vmem:[%s7067_s3 + $0x1d8] sm:$0xff]  ;;  %v3814_v32 = vld [vmem:[%s7066_s1 + $0x30] sm:$0xff] }
   0xc   :  { %124 = vmatpush.msra.mxu0 %v52_v10  ;;  %3235 = vmatpush.msra.mxu1 %v52_v10  ;;  %7355 = vst [vmem:[#allocation4_spill] sm:$0xff] %v3791_v27  ;;  %v57_v33 = vld [vmem:[%s7065_s2 + $0x68] sm:$0xff]  ;;  %v58_v34 = vld [vmem:[%s7065_s2 + $0x70] sm:$0xff]  ;;  %v3827_v35 = vld [vmem:[%s7067_s3 + $0x1a0] sm:$0xff] }
   0xd   :  { %3236 = vmatpush.msra.mxu2 %v52_v10  ;;  %247 = vmatpush.msra.mxu3 %v55_v11  ;;  %7356 = vst [vmem:[#allocation5_spill] sm:$0xff] %v3827_v35  ;;  %v53_v36 = vld [vmem:[%s7065_s2 + $0x48] sm:$0xff]  ;;  %v54_v37 = vld [vmem:[%s7065_s2 + $0x50] sm:$0xff]  ;;  %v3842_v38 = vld [vmem:[%s7067_s3 + $0x180] sm:$0xff] }
   0xe   :  { %125 = vmatpush.msra.mxu0 %v48_v12  ;;  %3237 = vmatpush.msra.mxu1 %v48_v12  ;;  %v3847_v39 = vld [vmem:[%s7067_s3 + $0x1b8] sm:$0xff]  ;;  %v49_v40 = vld [vmem:[%s7065_s2 + $0x28] sm:$0xff]  ;;  %v50_v41 = vld [vmem:[%s7065_s2 + $0x30] sm:$0xff] }
   0xf   :  { %3238 = vmatpush.msra.mxu2 %v48_v12  ;;  %248 = vmatpush.msra.mxu3 %v51_v13  ;;  %v3861_v42 = vld [vmem:[%s7067_s3 + $0x160] sm:$0xff]  ;;  %v3866_v43 = vld [vmem:[%s7067_s3 + $0x198] sm:$0xff]  ;;  %v45_v44 = vld [vmem:[%s7065_s2 + $0x8] sm:$0xff] }
  0x10   :  { %126 = vmatpush.msra.mxu0 %v44_v14  ;;  %3239 = vmatpush.msra.mxu1 %v44_v14  ;;  %v46_v45 = vld [vmem:[%s7065_s2 + $0x10] sm:$0xff]  ;;  %v3885_v47 = vld [vmem:[%s7067_s3 + $0x140] sm:$0xff]  ;;  %v3891_v48 = vld [vmem:[%s7067_s3 + $0x1e8] sm:$0xff] }
  0x11   :  { %3240 = vmatpush.msra.mxu2 %v44_v14  ;;  %249 = vmatpush.msra.mxu3 %v47_v15  ;;  %v3879_v46 = vld [vmem:[%s7066_s1 + $0x10] sm:$0xff]  ;;  %v3900_v49 = vld [vmem:[%s7067_s3 + $0x120] sm:$0xff]  ;;  %v3913_v51 = vld [vmem:[%s7067_s3 + $0x1c8] sm:$0xff] }
  0x12   :  { %3133 = vmatmul.msk.f32.vlgmr.msra.gmra.mxu0 %vm86_vm0, %v3740_v16  ;;  %3138 = vmatmul.msk.f32.vlgmr.msra.gmra.mxu1 %vm86_vm0, %v3745_v17  ;;  %v3905_v50 = vld [vmem:[%s7067_s3 + $0x1f0] sm:$0xff]  ;;  %v3918_v52 = vld [vmem:[%s7067_s3 + $0x178] sm:$0xff]  ;;  %v3926_v53 = vld [vmem:[%s7067_s3 + $0x100] sm:$0xff] }
  0x13   :  { %160 = vmatpush.msrb.mxu1 %v73_v18  ;;  %201 = vmatpush.msrb.mxu2 %v74_v19  ;;  %v3931_v54 = vld [vmem:[%s7067_s3 + $0x1d0] sm:$0xff]  ;;  %v3937_v55 = vld [vmem:[%s7067_s3 + $0x1a8] sm:$0xff]  ;;  %v3943_v56 = vld [vmem:[%s7067_s3 + $0x158] sm:$0xff] }
  0x14   :  { %3157 = vmatmul.msk.f32.vlgmr.msra.gmra.mxu3 %vm86_vm0, %v3740_v16  ;;  %3140 = vmatmul.msk.f32.vlgmr.msra.gmra.mxu2 %vm86_vm0, %v3756_v20  ;;  %v3949_v57 = vld [vmem:[%s7067_s3 + $0xe0] sm:$0xff]  ;;  %v3955_v58 = vld [vmem:[%s7067_s3 + $0x1b0] sm:$0xff]  ;;  %v3961_v59 = vld [vmem:[%s7066_s1 + $0x18] sm:$0xff] }
  0x15   :  { %161 = vmatpush.msrb.mxu1 %v69_v21  ;;  %202 = vmatpush.msrb.mxu2 %v70_v22  ;;  %v3968_v60 = vld [vmem:[%s7067_s3 + $0xc0] sm:$0xff]  ;;  %v3975_v61 = vld [vmem:[%s7067_s3 + $0x188] sm:$0xff]  ;;  %v3990_v63 = vld [vmem:[%s7067_s3 + $0x190] sm:$0xff] }
  0x16   :  { %339 = vmatpush.msrb.mxu0 %v3771_v23  ;;  %399 = vmatpush.msrb.mxu3 %v3776_v24  ;;  %v3985_v62 = vld [vmem:[%s7067_s3 + $0xa0] sm:$0xff]  ;;  %v3998_v0 = vld [vmem:[%s7067_s3 + $0x168] sm:$0xff]  ;;  %v4003_v1 = vld [vmem:[%s7067_s3 + $0x138] sm:$0xff] }
  0x17   :  { %162 = vmatpush.msrb.mxu1 %v65_v25  ;;  %203 = vmatpush.msrb.mxu2 %v66_v26  ;;  %7357 = vst [vmem:[#allocation6_spill] sm:$0xff] %v3985_v62  ;;  %v4011_v2 = vld [vmem:[%s7067_s3 + $0x80] sm:$0xff]  ;;  %v4016_v3 = vld [vmem:[%s7067_s3 + $0x170] sm:$0xff]  ;;  %v4022_v4 = vld [vmem:[%s7067_s3 + $0x148] sm:$0xff]  ;;  %v7076_v26 = vmov 0.0  }
  0x18   :  { %340 = vmatpush.msrb.mxu0 %v3791_v27  ;;  %400 = vmatpush.msrb.mxu3 %v3796_v28  ;;  %7358 = vst [vmem:[#allocation7_spill] sm:$0xff] %v4011_v2  ;;  %v4028_v5 = vld [vmem:[%s7067_s3 + $0x118] sm:$0xff]  ;;  %v4034_v6 = vld [vmem:[%s7067_s3 + $0x60] sm:$0xff]  ;;  %v4040_v7 = vld [vmem:[%s7067_s3 + $0x150] sm:$0xff] }
  0x19   :  { %163 = vmatpush.msrb.mxu1 %v61_v29  ;;  %204 = vmatpush.msrb.mxu2 %v62_v30  ;;  %7359 = vst [vmem:[#allocation8_spill] sm:$0xff] %v4034_v6  ;;  %v4046_v8 = vld [vmem:[%s7066_s1 + $0x20] sm:$0xff]  ;;  %v4060_v10 = vld [vmem:[%s7067_s3 + $0x128] sm:$0xff]  ;;  %v4075_v12 = vld [vmem:[%s7067_s3 + $0xf8] sm:$0xff] }
  0x1a   :  { %3134 = vmatmul.msk.f32.gmra.mxu0 %vm86_vm0, %v3809_v31  ;;  %3139 = vmatmul.msk.f32.gmra.mxu1 %vm86_vm0, %v3814_v32  ;;  %v4052_v9 = vld [vmem:[%s7067_s3 + $0x40] sm:$0xff]  ;;  %v4083_v13 = vld [vmem:[%s7067_s3 + $0x108] sm:$0xff]  ;;  %v4088_v14 = vld [vmem:[%s7067_s3 + $0x130] sm:$0xff] }
  0x1b   :  { %164 = vmatpush.msrb.mxu1 %v57_v33  ;;  %205 = vmatpush.msrb.mxu2 %v58_v34  ;;  %7360 = vst [vmem:[#allocation9_spill] sm:$0xff] %v4052_v9  ;;  %v4070_v11 = vld [vmem:[%s7067_s3 + $0x20] sm:$0xff]  ;;  %v4107_v18 = vld [vmem:[%s7067_s3 + $0xe8] sm:$0xff]  ;;  %v4113_v19 = vld [vmem:[%s7067_s3 + $0x110] sm:$0xff] }
  0x1c   :  { %3158 = vmatmul.msk.f32.gmra.mxu3 %vm86_vm0, %v3809_v31  ;;  %341 = vmatpush.msrb.mxu0 %v3827_v35  ;;  %7361 = vst [vmem:[#allocation10_spill] sm:$0xff] %v4070_v11  ;;  %v4095_v15 = vld [vmem:[%s7067_s3] sm:$0xff]  ;;  %v4119_v21 = vld [vmem:[%s7067_s3 + $0xb8] sm:$0xff]  ;;  %v4134_v25 = vld [vmem:[%s7067_s3 + $0xc8] sm:$0xff] }
  0x1d   :  { %165 = vmatpush.msrb.mxu1 %v53_v36  ;;  %206 = vmatpush.msrb.mxu2 %v54_v37  ;;  %7362 = vst [vmem:[#allocation11_spill] sm:$0xff] %v4095_v15  ;;  %v4128_v22 = vld [vmem:[%s7067_s3 + $0x98] sm:$0xff]  ;;  %v4149_v30 = vld [vmem:[%s7067_s3 + $0xf0] sm:$0xff]  ;;  %v4176_v36 = vld [vmem:[%s7067_s3 + $0x88] sm:$0xff] }
  0x1e   :  { %342 = vmatpush.msrb.mxu0 %v3842_v38  ;;  %401 = vmatpush.msrb.mxu3 %v3847_v39  ;;  %7364 = vst [vmem:[#allocation13_spill] sm:$0xff] %v4119_v21  ;;  %v4144_v29 = vld [vmem:[%s7067_s3 + $0x78] sm:$0xff]  ;;  %v4170_v34 = vld [vmem:[%s7067_s3 + $0xd0] sm:$0xff] }
  0x1f   :  { %166 = vmatpush.msrb.mxu1 %v49_v40  ;;  %207 = vmatpush.msrb.mxu2 %v50_v41  ;;  %7365 = vst [vmem:[#allocation14_spill] sm:$0xff] %v4128_v22  ;;  %v4165_v33 = vld [vmem:[%s7067_s3 + $0x58] sm:$0xff]  ;;  %v4188_v40 = vld [vmem:[%s7067_s3 + $0xb0] sm:$0xff]  ;;  %v4195_v41 = vld [vmem:[%s7067_s3 + $0x68] sm:$0xff] }
  0x20   :  { %343 = vmatpush.msrb.mxu0 %v3861_v42  ;;  %402 = vmatpush.msrb.mxu3 %v3866_v43  ;;  %7366 = vst [vmem:[#allocation15_spill] sm:$0xff] %v4144_v29  ;;  %v4183_v37 = vld [vmem:[%s7067_s3 + $0x38] sm:$0xff] }
  0x21   :  { %167 = vmatpush.msrb.mxu1 %v45_v44  ;;  %208 = vmatpush.msrb.mxu2 %v46_v45  ;;  %7368 = vst [vmem:[#allocation17_spill] sm:$0xff] %v4165_v33  ;;  %v4202_v44 = vld [vmem:[%s7067_s3 + $0x18] sm:$0xff]  ;;  %v4209_v45 = vld [vmem:[%s7067_s3 + $0x48] sm:$0xff] }
  0x22   :  { %3149 = vmatmul.msk.f32.vlgmr.msrb.gmra.mxu2 %vm86_vm0, %v3740_v16  ;;  %3135 = vmatmul.msk.f32.gmra.mxu0 %vm86_vm0, %v3879_v46  ;;  %7369 = vst [vmem:[#allocation18_spill] sm:$0xff] %v4176_v36 }
  0x23   :  { %3141 = vmatmul.msk.f32.vlgmr.msrb.gmra.mxu1 %vm86_vm0, %v3740_v16  ;;  %344 = vmatpush.msrb.mxu0 %v3885_v47  ;;  %v4101_v16 = vld [vmem:[%s7067_s3 + $0xd8] sm:$0xff]  ;;  %7370 = vst [vmem:[#allocation19_spill] sm:$0xff] %v4183_v37 }
  0x24   :  { %3159 = vmatmul.msk.f32.gmra.mxu3 %vm86_vm0, %v3879_v46  ;;  %359 = vmatpush.msra.mxu1 %v3891_v48  ;;  %7363 = vst [vmem:[#allocation12_spill] sm:$0xff] %v4101_v16 }
  0x25   :  { %345 = vmatpush.msrb.mxu0 %v3900_v49  ;;  %379 = vmatpush.msra.mxu2 %v3905_v50  ;;  %7371 = vst [vmem:[#allocation20_spill] sm:$0xff] %v4188_v40 }
  0x26   :  { %360 = vmatpush.msra.mxu1 %v3913_v51  ;;  %403 = vmatpush.msrb.mxu3 %v3918_v52  ;;  %7372 = vst [vmem:[#allocation21_spill] sm:$0xff] %v4195_v41 }
  0x27   :  { %346 = vmatpush.msrb.mxu0 %v3926_v53  ;;  %380 = vmatpush.msra.mxu2 %v3931_v54  ;;  %7373 = vst [vmem:[#allocation22_spill] sm:$0xff] %v4202_v44 }
  0x28   :  { %361 = vmatpush.msra.mxu1 %v3937_v55  ;;  %404 = vmatpush.msrb.mxu3 %v3943_v56  ;;  %7374 = vst [vmem:[#allocation23_spill] sm:$0xff] %v4209_v45 }
  0x29   :  { %347 = vmatpush.msrb.mxu0 %v3949_v57  ;;  %381 = vmatpush.msra.mxu2 %v3955_v58 }
  0x2a   :  { %3150 = vmatmul.msk.f32.gmra.mxu2 %vm86_vm0, %v3809_v31  ;;  %3136 = vmatmul.msk.f32.gmra.mxu0 %vm86_vm0, %v3961_v59 }
  0x2b   :  { %3142 = vmatmul.msk.f32.gmra.mxu1 %vm86_vm0, %v3809_v31  ;;  %348 = vmatpush.msrb.mxu0 %v3968_v60  ;;  %v4157_v31 = vld [vmem:[%s7067_s3 + $0xa8] sm:$0xff] }
  0x2c   :  { %3160 = vmatmul.msk.f32.gmra.mxu3 %vm86_vm0, %v3961_v59  ;;  %362 = vmatpush.msra.mxu1 %v3975_v61  ;;  %7367 = vst [vmem:[#allocation16_spill] sm:$0xff] %v4157_v31 }
  0x2d   :  { %349 = vmatpush.msrb.mxu0 %v3985_v62  ;;  %382 = vmatpush.msra.mxu2 %v3990_v63 }
  0x2e   :  { %363 = vmatpush.msra.mxu1 %v3998_v0  ;;  %405 = vmatpush.msrb.mxu3 %v4003_v1 }
  0x2f   :  { %350 = vmatpush.msrb.mxu0 %v4011_v2  ;;  %383 = vmatpush.msra.mxu2 %v4016_v3 }
  0x30   :  { %364 = vmatpush.msra.mxu1 %v4022_v4  ;;  %406 = vmatpush.msrb.mxu3 %v4028_v5 }
  0x31   :  { %351 = vmatpush.msrb.mxu0 %v4034_v6  ;;  %384 = vmatpush.msra.mxu2 %v4040_v7 }
  0x32   :  { %3151 = vmatmul.msk.f32.gmra.mxu2 %vm86_vm0, %v3879_v46  ;;  %3137 = vmatmul.msk.f32.gmra.mxu0 %vm86_vm0, %v4046_v8 }
  0x33   :  { %3143 = vmatmul.msk.f32.gmra.mxu1 %vm86_vm0, %v3879_v46  ;;  %352 = vmatpush.msrb.mxu0 %v4052_v9  ;;  %v4218_v46 = vld [vmem:[%s7067_s3 + $0x90] sm:$0xff] }
  0x34   :  { %3161 = vmatmul.msk.f32.gmra.mxu3 %vm86_vm0, %v4046_v8  ;;  %365 = vmatpush.msra.mxu1 %v4060_v10  ;;  %7375 = vst [vmem:[#allocation24_spill] sm:$0xff] %v4218_v46 }
  0x35   :  { %353 = vmatpush.msrb.mxu0 %v4070_v11  ;;  %407 = vmatpush.msrb.mxu3 %v4075_v12 }
  0x36   :  { %366 = vmatpush.msra.mxu1 %v4083_v13  ;;  %385 = vmatpush.msra.mxu2 %v4088_v14 }
  0x37   :  { %354 = vmatpush.msrb.mxu0 %v4095_v15  ;;  %408 = vmatpush.msrb.mxu3 %v4101_v16 }
  0x38   :  { %367 = vmatpush.msra.mxu1 %v4107_v18  ;;  %386 = vmatpush.msra.mxu2 %v4113_v19 }
  0x39   :  { %409 = vmatpush.msrb.mxu3 %v4119_v21  ;;  %495 = vmatpush.msra.mxu0 %v3771_v23 }
  0x3a   :  { %3152 = vmatmul.msk.f32.gmra.mxu2 %vm86_vm0, %v3961_v59  ;;  %355 = vmatmul.f32.vlgmr.msrb.gmra.mxu0 %v7076_v26  ;;  %v4231_v26 = vld [vmem:[%s7068_s0] sm:$0xff] }
  0x3b   :  { %3144 = vmatmul.msk.f32.gmra.mxu1 %vm86_vm0, %v3961_v59  ;;  %410 = vmatpush.msrb.mxu3 %v4128_v22  ;;  %v4226_v59 = vld [vmem:[%s7067_s3 + $0x28] sm:$0xff]  ;;  %7377 = vst [vmem:[#allocation26_spill] sm:$0xff] %v4231_v26  ;;  %vm486_vm1 = vcmp.gt.s32.totalorder %v4231_v26, 0  ;;  %v4262_v26 = vld [vmem:[%s7067_s3 + $0x30] sm:$0xff] }
  0x3c   :  { %3162 = vmatmul.msk.f32.gmra.mxu3 %vm86_vm0, %v3745_v17  ;;  %368 = vmatpush.msra.mxu1 %v4134_v25  ;;  %7376 = vst [vmem:[#allocation25_spill] sm:$0xff] %v4226_v59 }
  0x3d   :  { %411 = vmatpush.msrb.mxu3 %v4144_v29  ;;  %387 = vmatpush.msra.mxu2 %v4149_v30  ;;  %7381 = vst [vmem:[#allocation30_spill] sm:$0xff] %v4262_v26 }
  0x3e   :  { %369 = vmatpush.msra.mxu1 %v4157_v31  ;;  %496 = vmatpush.msra.mxu0 %v3791_v27  ;;  %v7088_v27 = vmov 0  }
  0x3f   :  { %412 = vmatpush.msrb.mxu3 %v4165_v33  ;;  %388 = vmatpush.msra.mxu2 %v4170_v34  ;;  %v487_v23 = vsel %vm486_vm1, 1, %v7088_v27 }
  0x40   :  { %370 = vmatpush.msra.mxu1 %v4176_v36  ;;  %497 = vmatpush.msra.mxu0 %v3827_v35  ;;  %v4246_v35 = vld [vmem:[%s7067_s3 + $0x8] sm:$0xff] }
  0x41   :  { %413 = vmatpush.msrb.mxu3 %v4183_v37  ;;  %389 = vmatpush.msra.mxu2 %v4188_v40  ;;  %7379 = vst [vmem:[#allocation28_spill] sm:$0xff] %v4246_v35 }
  0x42   :  { %3153 = vmatmul.msk.f32.gmra.mxu2 %vm86_vm0, %v4046_v8  ;;  %371 = vmatpush.msra.mxu1 %v4195_v41 }
  0x43   :  { %3145 = vmatmul.msk.f32.gmra.mxu1 %vm86_vm0, %v4046_v8  ;;  %414 = vmatpush.msrb.mxu3 %v4202_v44  ;;  %v4239_v8 = vld [vmem:[%s7067_s3 + $0x70] sm:$0xff] }
  0x44   :  { %3163 = vmatmul.msk.f32.gmra.mxu3 %vm86_vm0, %v3814_v32  ;;  %372 = vmatpush.msra.mxu1 %v4209_v45  ;;  %7378 = vst [vmem:[#allocation27_spill] sm:$0xff] %v4239_v8  ;;  %v4254_v44 = vld [vmem:[%s7067_s3 + $0x50] sm:$0xff] }
  0x45   :  { %390 = vmatpush.msra.mxu2 %v4218_v46  ;;  %3243 = vset.pattern.permute.xlu0 %v7088_v27  ;;  %7380 = vst [vmem:[#allocation29_spill] sm:$0xff] %v4254_v44  ;;  %v7386_v27 = vld [vmem:[#allocation26_spill] sm:$0xff] }
  0x46   :  { %373 = vmatpush.msra.mxu1 %v4226_v59  ;;  %489 = vperm.xlu0 %3243, %v487_v23   ;;  %v4272_v23 = vld [vmem:[%s7067_s3 + $0x10] sm:$0xff]  ;;  %vm642_vm2 = vcmp.gt.s32.totalorder %v7386_v27, 1  ;;  %vm1422_vm3 = vcmp.gt.s32.totalorder %v7386_v27, 6 }
  0x47   :  { %391 = vmatpush.msra.mxu2 %v4239_v8  ;;  %555 = vmatpush.msra.mxu3 %v3776_v24  ;;  %7382 = vst [vmem:[#allocation31_spill] sm:$0xff] %v4272_v23 }
  0x48   :  { %374 = vmatpush.msra.mxu1 %v4246_v35  ;;  %498 = vmatpush.msra.mxu0 %v3842_v38  ;;  %v7391_v27 = vld [vmem:[#allocation28_spill] sm:$0xff] }
  0x49   :  { %392 = vmatpush.msra.mxu2 %v4254_v44  ;;  %556 = vmatpush.msra.mxu3 %v3796_v28 }
  0x4a   :  { %515 = vmatpush.msrb.mxu1 %v3891_v48  ;;  %3154 = vmatmul.msk.f32.gmra.mxu2 %vm86_vm0, %v3745_v17 }
  0x4b   :  { %3146 = vmatmul.msk.f32.gmra.mxu1 %vm86_vm0, %v3745_v17  ;;  %393 = vmatpush.msra.mxu2 %v4262_v26  ;;  %v7383_v17 = vmov 0.0  }
  0x4c   :  { %3164 = vmatmul.msk.f32.gmra.mxu3 %vm86_vm0, %v3756_v20  ;;  %516 = vmatpush.msrb.mxu1 %v3913_v51 }
  0x4d   :  { %394 = vmatpush.msra.mxu2 %v4272_v23  ;;  %557 = vmatpush.msra.mxu3 %v3847_v39 }
  0x4e   :  { %517 = vmatpush.msrb.mxu1 %v3937_v55  ;;  %499 = vmatpush.msra.mxu0 %v3861_v42 }
  0x4f   :  { %535 = vmatpush.msrb.mxu2 %v3905_v50  ;;  %558 = vmatpush.msra.mxu3 %v3866_v43 }
  0x50   :  { %518 = vmatpush.msrb.mxu1 %v3975_v61  ;;  %500 = vmatpush.msra.mxu0 %v3885_v47 }
  0x51   :  { %536 = vmatpush.msrb.mxu2 %v3931_v54  ;;  %559 = vmatpush.msra.mxu3 %v3918_v52 }
  0x52   :  { %3155 = vmatmul.msk.f32.gmra.mxu2 %vm86_vm0, %v3814_v32  ;;  %519 = vmatpush.msrb.mxu1 %v3998_v0 }
  0x53   :  { %3147 = vmatmul.msk.f32.gmra.mxu1 %vm86_vm0, %v3814_v32  ;;  %537 = vmatpush.msrb.mxu2 %v3955_v58  ;;  %v7385_v32 = vld [vmem:[#allocation3_spill] sm:$0xff] }
  0x54   :  { %415 = vmatmul.f32.vlgmr.msrb.gmra.mxu3 %v7383_v17  ;;  %520 = vmatpush.msrb.mxu1 %v4022_v4 }
  0x55   :  { %538 = vmatpush.msrb.mxu2 %v3990_v63  ;;  %560 = vmatpush.msra.mxu3 %v3943_v56 }
  0x56   :  { %501 = vmatpush.msra.mxu0 %v3900_v49  ;;  %521 = vmatpush.msrb.mxu1 %v4060_v10 }
  0x57   :  { %539 = vmatpush.msrb.mxu2 %v4016_v3  ;;  %561 = vmatpush.msra.mxu3 %v4003_v1 }
  0x58   :  { %502 = vmatpush.msra.mxu0 %v3926_v53  ;;  %522 = vmatpush.msrb.mxu1 %v4083_v13 }
  0x59   :  { %540 = vmatpush.msrb.mxu2 %v4040_v7  ;;  %562 = vmatpush.msra.mxu3 %v4028_v5 }
  0x5a   :  { %3156 = vmatmul.msk.f32.gmra.mxu2 %vm86_vm0, %v3756_v20  ;;  %503 = vmatpush.msra.mxu0 %v3949_v57 }
  0x5b   :  { %3148 = vmatmul.msk.f32.gmra.mxu1 %vm86_vm0, %v3756_v20  ;;  %541 = vmatpush.msrb.mxu2 %v4088_v14  ;;  %v7384_v20 = vld [vmem:[#allocation22_spill] sm:$0xff] }
  0x5c   :  { %523 = vmatpush.msrb.mxu1 %v4107_v18  ;;  %563 = vmatpush.msra.mxu3 %v4075_v12 }
  0x5d   :  { %542 = vmatpush.msrb.mxu2 %v4113_v19  ;;  %504 = vmatpush.msra.mxu0 %v3968_v60 }
  0x5e   :  { %524 = vmatpush.msrb.mxu1 %v4134_v25  ;;  %564 = vmatpush.msra.mxu3 %v4101_v16 }
  0x5f   :  { %543 = vmatpush.msrb.mxu2 %v4149_v30  ;;  %505 = vmatpush.msra.mxu0 %v3985_v62 }
  0x60   :  { %525 = vmatpush.msrb.mxu1 %v4157_v31  ;;  %565 = vmatpush.msra.mxu3 %v4119_v21 }
  0x61   :  { %544 = vmatpush.msrb.mxu2 %v4170_v34  ;;  %506 = vmatpush.msra.mxu0 %v4011_v2 }
  0x62   :  { %395 = vmatmul.f32.vlgmr.msra.gmra.mxu2 %v7383_v17  ;;  %526 = vmatpush.msrb.mxu1 %v4176_v36 }
  0x63   :  { %375 = vmatmul.f32.vlgmr.msra.gmra.mxu1 %v7383_v17  ;;  %545 = vmatpush.msrb.mxu2 %v4188_v40  ;;  %v7387_v17 = vld [vmem:[#allocation4_spill] sm:$0xff] }
  0x64   :  { %566 = vmatpush.msra.mxu3 %v4128_v22  ;;  %507 = vmatpush.msra.mxu0 %v4034_v6 }
  0x65   :  { %546 = vmatpush.msrb.mxu2 %v4218_v46  ;;  %527 = vmatpush.msrb.mxu1 %v4195_v41 }
  0x66   :  { %567 = vmatpush.msra.mxu3 %v4144_v29  ;;  %508 = vmatpush.msra.mxu0 %v4052_v9 }
  0x67   :  { %547 = vmatpush.msrb.mxu2 %v4239_v8  ;;  %528 = vmatpush.msrb.mxu1 %v4209_v45 }
  0x68   :  { %568 = vmatpush.msra.mxu3 %v4165_v33  ;;  %509 = vmatpush.msra.mxu0 %v4070_v11 }
  0x69   :  { %548 = vmatpush.msrb.mxu2 %v4254_v44  ;;  %529 = vmatpush.msrb.mxu1 %v4226_v59 }
  0x6a   :  { %569 = vmatpush.msra.mxu3 %v4183_v37  ;;  %510 = vmatpush.msra.mxu0 %v4095_v15  ;;  %v7388_v15 = vmov 0  }
  0x6b   :  { %549 = vmatpush.msrb.mxu2 %v4262_v26  ;;  %530 = vmatpush.msrb.mxu1 %v4246_v35  ;;  %v643_v35 = vsel %vm642_vm2, 1, %v7388_v15 }
  0x6c   :  { %570 = vmatpush.msra.mxu3 %v7384_v20  ;;  %651 = vmatpush.msrb.mxu0 %v7385_v32  ;;  %v7389_v32 = vld [vmem:[#allocation5_spill] sm:$0xff] }
  0x6d   :  { %550 = vmatpush.msrb.mxu2 %v4272_v23  ;;  %671 = vmatpush.msra.mxu1 %v3891_v48 }
  0x6e   :  { %711 = vmatpush.msrb.mxu3 %v3776_v24  ;;  %652 = vmatpush.msrb.mxu0 %v7387_v17 }
  0x6f   :  { %691 = vmatpush.msra.mxu2 %v3905_v50  ;;  %672 = vmatpush.msra.mxu1 %v3913_v51 }
  0x70   :  { %712 = vmatpush.msrb.mxu3 %v3796_v28  ;;  %645 = vperm.xlu0 %3243, %v643_v35   ;;  %v1423_v35 = vsel %vm1422_vm3, 1, %v7388_v15 }
  0x71   :  { %692 = vmatpush.msra.mxu2 %v3931_v54  ;;  %653 = vmatpush.msrb.mxu0 %v7389_v32 }
  0x72   :  { %673 = vmatpush.msra.mxu1 %v3937_v55  ;;  %713 = vmatpush.msrb.mxu3 %v3847_v39 }
  0x73   :  { %693 = vmatpush.msra.mxu2 %v3955_v58  ;;  %654 = vmatpush.msrb.mxu0 %v3842_v38 }
  0x74   :  { %674 = vmatpush.msra.mxu1 %v3975_v61  ;;  %714 = vmatpush.msrb.mxu3 %v3866_v43 }
  0x75   :  { %694 = vmatpush.msra.mxu2 %v3990_v63  ;;  %655 = vmatpush.msrb.mxu0 %v3861_v42 }
  0x76   :  { %675 = vmatpush.msra.mxu1 %v3998_v0  ;;  %715 = vmatpush.msrb.mxu3 %v3918_v52 }
  0x77   :  { %695 = vmatpush.msra.mxu2 %v4016_v3  ;;  %656 = vmatpush.msrb.mxu0 %v3885_v47 }
  0x78   :  { %676 = vmatpush.msra.mxu1 %v4022_v4  ;;  %1425 = vperm.xlu0 %3243, %v1423_v35   ;;  %v7390_v35 = vld [vmem:[#allocation11_spill] sm:$0xff] }
  0x79   :  { %696 = vmatpush.msra.mxu2 %v4040_v7  ;;  %716 = vmatpush.msrb.mxu3 %v3943_v56 }
  0x7a   :  { %657 = vmatpush.msrb.mxu0 %v3900_v49  ;;  %677 = vmatpush.msra.mxu1 %v4060_v10 }
  0x7b   :  { %697 = vmatpush.msra.mxu2 %v4088_v14  ;;  %717 = vmatpush.msrb.mxu3 %v4003_v1 }
  0x7c   :  { %658 = vmatpush.msrb.mxu0 %v3926_v53  ;;  %678 = vmatpush.msra.mxu1 %v4083_v13 }
  0x7d   :  { %698 = vmatpush.msra.mxu2 %v4113_v19  ;;  %718 = vmatpush.msrb.mxu3 %v4028_v5 }
  0x7e   :  { %659 = vmatpush.msrb.mxu0 %v3949_v57  ;;  %679 = vmatpush.msra.mxu1 %v4107_v18 }
  0x7f   :  { %699 = vmatpush.msra.mxu2 %v4149_v30  ;;  %719 = vmatpush.msrb.mxu3 %v4075_v12 }
  0x80   :  { %660 = vmatpush.msrb.mxu0 %v3968_v60  ;;  %680 = vmatpush.msra.mxu1 %v4134_v25 }
  0x81   :  { %700 = vmatpush.msra.mxu2 %v4170_v34  ;;  %720 = vmatpush.msrb.mxu3 %v4101_v16 }
  0x82   :  { %661 = vmatpush.msrb.mxu0 %v3985_v62  ;;  %681 = vmatpush.msra.mxu1 %v4157_v31 }
  0x83   :  { %701 = vmatpush.msra.mxu2 %v4188_v40  ;;  %721 = vmatpush.msrb.mxu3 %v4119_v21 }
  0x84   :  { %662 = vmatpush.msrb.mxu0 %v4011_v2  ;;  %682 = vmatpush.msra.mxu1 %v4176_v36 }
  0x85   :  { %702 = vmatpush.msra.mxu2 %v4218_v46  ;;  %722 = vmatpush.msrb.mxu3 %v4128_v22 }
  0x86   :  { %663 = vmatpush.msrb.mxu0 %v4034_v6  ;;  %683 = vmatpush.msra.mxu1 %v4195_v41 }
  0x87   :  { %703 = vmatpush.msra.mxu2 %v4239_v8  ;;  %723 = vmatpush.msrb.mxu3 %v4144_v29 }
  0x88   :  { %664 = vmatpush.msrb.mxu0 %v4052_v9  ;;  %684 = vmatpush.msra.mxu1 %v4209_v45 }
  0x89   :  { %704 = vmatpush.msra.mxu2 %v4254_v44  ;;  %724 = vmatpush.msrb.mxu3 %v4165_v33 }
  0x8a   :  { %665 = vmatpush.msrb.mxu0 %v4070_v11  ;;  %685 = vmatpush.msra.mxu1 %v4226_v59 }
  0x8b   :  { %705 = vmatpush.msra.mxu2 %v4262_v26  ;;  %725 = vmatpush.msrb.mxu3 %v4183_v37 }
  0x8c   :  { %666 = vmatpush.msrb.mxu0 %v7390_v35  ;;  %686 = vmatpush.msra.mxu1 %v7391_v27 }
  0x8d   :  { %706 = vmatpush.msra.mxu2 %v4272_v23  ;;  %726 = vmatpush.msrb.mxu3 %v7384_v20 }
  0x8e   :  { %3244 = vset.pattern.permute.xlu1 %v7388_v15  ;;  %3245 = vset.pattern.permute.xlu2 %v7388_v15 }
  0x8f   :  { %v4419_v33 = vpop.f32.mrf.mxu1  ;;  %v128_v26 = vpop.f32.mrf.mxu0 }
  0x90   :  { %7392 = vst [vmem:[#allocation4_spill] sm:$0xff] %v4419_v33 }
  0x97   :  { %v251_v11 = vpop.f32.mrf.mxu3  ;;  %v4421_v59 = vpop.f32.mrf.mxu1 }
  0x98   :  { %7393 = vst [vmem:[#allocation5_spill] sm:$0xff] %v4421_v59  ;;  %v4423_v44 = vpop.f32.mrf.mxu2  ;;  %v4427_v27 = vpop.f32.mrf.mxu0 }
  0x99   :  { %7394 = vst [vmem:[#allocation32_spill] sm:$0xff] %v4423_v44 }
  0x9a   :  { %7396 = vst [vmem:[#allocation34_spill] sm:$0xff] %v4427_v27 }
  0x9f   :  { %v4425_v37 = vpop.f32.mrf.mxu3 }
  0xa0   :  { %7395 = vst [vmem:[#allocation33_spill] sm:$0xff] %v4425_v37  ;;  %v169_v35 = vpop.f32.mrf.mxu1  ;;  %v4433_v9 = vpop.f32.mrf.mxu0 }
  0xa1   :  { %7399 = vst [vmem:[#allocation37_spill] sm:$0xff] %v4433_v9 }
  0xa5   :  { %v210_v23 = vpop.f32.mrf.mxu2 }
  0xa7   :  { %v4429_v45 = vpop.f32.mrf.mxu3 }
  0xa8   :  { %7397 = vst [vmem:[#allocation35_spill] sm:$0xff] %v4429_v45  ;;  %v4431_v20 = vpop.f32.mrf.mxu1  ;;  %v4443_v44 = vpop.f32.mrf.mxu0 }
  0xa9   :  { %7398 = vst [vmem:[#allocation36_spill] sm:$0xff] %v4431_v20 }
  0xaa   :  { %7404 = vst [vmem:[#allocation42_spill] sm:$0xff] %v4443_v44 }
  0xad   :  { %v4435_v15 = vpop.f32.mrf.mxu2 }
  0xae   :  { %7400 = vst [vmem:[#allocation38_spill] sm:$0xff] %v4435_v15 }
  0xaf   :  { %v4437_v33 = vpop.f32.mrf.mxu3 }
  0xb0   :  { %7401 = vst [vmem:[#allocation39_spill] sm:$0xff] %v4437_v33  ;;  %v4439_v59 = vpop.f32.mrf.mxu1  ;;  %v4455_v9 = vpop.f32.mrf.mxu0  ;;  %v76_v33 = vld [vmem:[%s7069_s4] sm:$0xf] }
  0xb1   :  { %7402 = vst [vmem:[#allocation40_spill] sm:$0xff] %v4439_v59  ;;  %v4475_v6 = vperm.slane %v76_v33, 3  ;;  %v4480_v46 = vperm.slane %v76_v33, 1  ;;  %v4487_v36 = vperm.slane %v76_v33, 2 }
  0xb2   :  { %7410 = vst [vmem:[#allocation48_spill] sm:$0xff] %v4455_v9 }
  0xb3   :  { %7418 = vst [vmem:[#allocation56_spill] sm:$0xff] %v4475_v6 }
  0xb4   :  { %7420 = vst [vmem:[#allocation58_spill] sm:$0xff] %v4480_v46 }
  0xb5   :  { %v4441_v29 = vpop.f32.mrf.mxu2  ;;  %7423 = vst [vmem:[#allocation61_spill] sm:$0xff] %v4487_v36 }
  0xb6   :  { %7403 = vst [vmem:[#allocation41_spill] sm:$0xff] %v4441_v29  ;;  %v4462_v29 = vperm.slane %v76_v33, 0 }
  0xb7   :  { %v4445_v37 = vpop.f32.mrf.mxu3 }
  0xb8   :  { %7405 = vst [vmem:[#allocation43_spill] sm:$0xff] %v4445_v37  ;;  %v4447_v27 = vpop.f32.mrf.mxu1 }
  0xb9   :  { %7406 = vst [vmem:[#allocation44_spill] sm:$0xff] %v4447_v27  ;;  %v356_v27 = vpop.f32.mrf.mxu0 }
  0xba   :  { %7412 = vst [vmem:[#allocation50_spill] sm:$0xff] %v4462_v29 }
  0xbd   :  { %v4449_v8 = vpop.f32.mrf.mxu2 }
  0xbe   :  { %7407 = vst [vmem:[#allocation45_spill] sm:$0xff] %v4449_v8  ;;  %v129_v8 = vadd.f32 %v128_v26, %v4462_v29 }
  0xbf   :  { %v4451_v45 = vpop.f32.mrf.mxu3 }
  0xc0   :  { %7408 = vst [vmem:[#allocation46_spill] sm:$0xff] %v4451_v45  ;;  %v4453_v20 = vpop.f32.mrf.mxu1  ;;  %v419_v45 = vadd.f32 %v356_v27, %v129_v8 }
  0xc1   :  { %7409 = vst [vmem:[#allocation47_spill] sm:$0xff] %v4453_v20 }
  0xc2   :  { %v3165_v9 = vmul.f32 -1.442695, %v419_v45 }
  0xc4   :  { %3247 = vpow2.f32 %v3165_v9 }
  0xc5   :  { %v4464_v44 = vpop.f32.mrf.mxu2 }
  0xc6   :  { %7413 = vst [vmem:[#allocation51_spill] sm:$0xff] %v4464_v44 }
  0xc7   :  { %v4460_v59 = vpop.f32.mrf.mxu3 }
  0xc8   :  { %7411 = vst [vmem:[#allocation49_spill] sm:$0xff] %v4460_v59  ;;  %v4466_v37 = vpop.f32.mrf.mxu1  ;;  %v252_v59 = vadd.f32 %v251_v11, %v4475_v6 }
  0xc9   :  { %7414 = vst [vmem:[#allocation52_spill] sm:$0xff] %v4466_v37 }
  0xca   :  { %v3248_v26 = vpop.eup %3247 }
  0xcb   :  { %v426_v45 = vadd.f32 1.0, %v3248_v26  ;;  %v211_v26 = vadd.f32 %v210_v23, %v4487_v36 }
  0xcd   :  { %v4473_v41 = vpop.f32.mrf.mxu2  ;;  %vm432_vm5 = vweird.f32 %v426_v45  ;;  %v438_v33 = vand.u32 2147483648, %v426_v45  ;;  %v436_v21 = vand.u32 2147483647, %v426_v45 }
  0xce   :  { %7417 = vst [vmem:[#allocation55_spill] sm:$0xff] %v4473_v41 }
  0xcf   :  { %v4469_v15 = vpop.f32.mrf.mxu3  ;;  %v439_v36 = vor.u32 1.1754944e-38, %v438_v33  ;;  %vm437_vm10 = vcmp.eq.f32.partialorder %v436_v21, 8.507059e+37 }
  0xd0   :  { %7415 = vst [vmem:[#allocation53_spill] sm:$0xff] %v4469_v15  ;;  %v4471_v20 = vpop.f32.mrf.mxu1  ;;  %v170_v15 = vadd.f32 %v169_v35, %v4480_v46 }
  0xd1   :  { %7416 = vst [vmem:[#allocation54_spill] sm:$0xff] %v4471_v20 }
  0xd5   :  { %v4482_v27 = vpop.f32.mrf.mxu2 }
  0xd6   :  { %7421 = vst [vmem:[#allocation59_spill] sm:$0xff] %v4482_v27 }
  0xd7   :  { %v416_v22 = vpop.f32.mrf.mxu3 }
  0xd8   :  { %v4478_v44 = vpop.f32.mrf.mxu1  ;;  %v422_v37 = vadd.f32 %v416_v22, %v252_v59 }
  0xd9   :  { %7419 = vst [vmem:[#allocation57_spill] sm:$0xff] %v4478_v44 }
  0xda   :  { %v3167_v8 = vmul.f32 -1.442695, %v422_v37 }
  0xdc   :  { %3249 = vpow2.f32 %v3167_v8 }
  0xdd   :  { %3251 = vrcp.f32 %v426_v45  ;;  %v4485_v29 = vpop.f32.mrf.mxu2 }
  0xde   :  { %7422 = vst [vmem:[#allocation60_spill] sm:$0xff] %v4485_v29 }
  0xe0   :  { %v376_v20 = vpop.f32.mrf.mxu1 }
  0xe1   :  { %v420_v41 = vadd.f32 %v376_v20, %v170_v15 }
  0xe2   :  { %v3250_v11 = vpop.eup %3249 }
  0xe3   :  { %v3166_v9 = vmul.f32 -1.442695, %v420_v41  ;;  %v3252_v44 = vpop.eup %3251  ;;  %v465_v22 = vadd.f32 1.0, %v3250_v11 }
  0xe4   :  { %v428_v6 = vmul.f32 %v3252_v44, %v426_v45  ;;  %vm433_vm4 = vweird.f32 %v3252_v44 }
  0xe5   :  { %3253 = vpow2.f32 %v3166_v9  ;;  %v396_v35 = vpop.f32.mrf.mxu2  ;;  %vm434_vm7 = vmor %vm432_vm5, %vm433_vm4  ;;  %vm471_vm13 = vweird.f32 %v465_v22 }
  0xe6   :  { %3255 = vrcp.f32 %v465_v22  ;;  %v429_v37 = vsub.f32 1.0, %v428_v6  ;;  %v421_v15 = vadd.f32 %v396_v35, %v211_v26 }
  0xe8   :  { %v430_v41 = vmul.f32 %v3252_v44, %v429_v37 }
  0xea   :  { %v431_v11 = vadd.f32 %v3252_v44, %v430_v41 }
  0xeb   :  { %v3254_v59 = vpop.eup %3253 }
  0xec   :  { %v445_v27 = vadd.f32 1.0, %v3254_v59  ;;  %v3256_v20 = vpop.eup %3255  ;;  %v435_v23 = vsel %vm434_vm7, %v3252_v44, %v431_v11  ;;  %v475_v44 = vand.u32 2147483647, %v465_v22 }
  0xed   :  { %v467_v9 = vmul.f32 %v3256_v20, %v465_v22  ;;  %v440_v41 = vsel %vm437_vm10, %v439_v36, %v435_v23  ;;  %vm472_vm12 = vweird.f32 %v3256_v20  ;;  %v4495_v36 = vpop.permute.xlu0 %489 }
  0xee   :  { %3257 = vrcp.f32 %v445_v27  ;;  %v457_v2 = vand.u32 2147483648, %v445_v27  ;;  %v455_v6 = vand.u32 2147483647, %v445_v27  ;;  %vm451_vm8 = vweird.f32 %v445_v27  ;;  %vm473_vm14 = vmor %vm471_vm13, %vm472_vm12  ;;  %7425 = vst [vmem:[#allocation63_spill] sm:$0xff] %v4495_v36 }
  0xef   :  { %3259 = vtanh.f32 %v421_v15  ;;  %v468_v40 = vsub.f32 1.0, %v467_v9  ;;  %v477_v9 = vand.u32 2147483648, %v465_v22  ;;  %vm476_vm15 = vcmp.eq.f32.partialorder %v475_v44, 8.507059e+37  ;;  %v7457_v22 = vld [vmem:[#allocation33_spill] sm:$0xff]  ;;  %v7461_v44 = vld [vmem:[#allocation38_spill] sm:$0xff] }
  0xf0   :  { %v458_v26 = vor.u32 1.1754944e-38, %v457_v2  ;;  %vm456_vm11 = vcmp.eq.f32.partialorder %v455_v6, 8.507059e+37  ;;  %vm491_vm0 = vcmp.eq.s32.totalorder %v4495_v36, 1  ;;  %v7480_v36 = vld [vmem:[#allocation40_spill] sm:$0xff] }
  0xf1   :  { %v469_v15 = vmul.f32 %v3256_v20, %v468_v40 }
  0xf3   :  { %v470_v16 = vadd.f32 %v3256_v20, %v469_v15  ;;  %v7459_v15 = vmov 0  }
  0xf4   :  { %v3258_v8 = vpop.eup %3257 }
  0xf5   :  { %v447_v29 = vmul.f32 %v3258_v8, %v445_v27  ;;  %vm452_vm6 = vweird.f32 %v3258_v8  ;;  %v3260_v37 = vpop.eup %3259  ;;  %v474_v2 = vsel %vm473_vm14, %v3256_v20, %v470_v16  ;;  %v478_v27 = vor.u32 1.1754944e-38, %v477_v9  ;;  %v7460_v9 = vld [vmem:[#allocation61_spill] sm:$0xff] }
  0xf6   :  { %vm453_vm9 = vmor %vm451_vm8, %vm452_vm6 }
  0xf7   :  { %v448_v46 = vsub.f32 1.0, %v447_v29 }
  0xf9   :  { %v449_v59 = vmul.f32 %v3258_v8, %v448_v46  ;;  %v482_v46 = vmul.f32 %v3260_v37, %v440_v41 }
  0xfb   :  { %v450_v35 = vadd.f32 %v3258_v8, %v449_v59 }
  0xfd   :  { %v454_v29 = vsel %vm453_vm9, %v3258_v8, %v450_v35  ;;  %v479_v8 = vsel %vm476_vm15, %v478_v27, %v474_v2  ;;  %v214_v2 = vadd.f32 %v7461_v44, %v7460_v9 }
  0xfe   :  { %v459_v31 = vsel %vm456_vm11, %v458_v26, %v454_v29  ;;  %v7458_v26 = vld [vmem:[#allocation26_spill] sm:$0xff] }
  0xff   :  { %v481_v62 = vmul.f32 0.0, %v459_v31  ;;  %vm798_vm1 = vcmp.gt.s32.totalorder %v7458_v26, 2  ;;  %vm954_vm2 = vcmp.gt.s32.totalorder %v7458_v26, 3  ;;  %vm1578_vm8 = vcmp.gt.s32.totalorder %v7458_v26, 7 }
 0x100   :  { %v799_v41 = vsel %vm798_vm1, 1, %v7459_v15 }
 0x101   :  { %v4490_v45 = vadd.f32 %v482_v46, %v481_v62  ;;  %v7426_v62 = vld [vmem:[#allocation3_spill] sm:$0xff]  ;;  %801 = vperm.xlu1 %3244, %v799_v41  }
 0x103   :  { %3261 = vtanh.f32 %v4490_v45 }
 0x109   :  { %v3262_v21 = vpop.eup %3261 }
 0x10a   :  { %v4493_v40 = vmul.f32 %v3262_v21, %v479_v8 }
 0x10c   :  { %7424 = vst [vmem:[#allocation62_spill] sm:$0xff] %v4493_v40  ;;  %3168 = vmatmul.msk.f32.vlgmr.msra.gmra.mxu0 %vm491_vm0, %v4493_v40  ;;  %3169 = vmatmul.msk.f32.vlgmr.msrb.gmra.mxu1 %vm491_vm0, %v4493_v40 }
 0x10d   :  { %3170 = vmatmul.msk.f32.vlgmr.msrb.gmra.mxu2 %vm491_vm0, %v4493_v40  ;;  %3171 = vmatmul.msk.f32.vlgmr.msra.gmra.mxu3 %vm491_vm0, %v4493_v40 }
 0x10e   :  { %807 = vmatpush.msra.mxu0 %v7426_v62  ;;  %827 = vmatpush.msrb.mxu1 %v3891_v48  ;;  %v7434_v48 = vld [vmem:[#allocation24_spill] sm:$0xff] }
 0x10f   :  { %847 = vmatpush.msrb.mxu2 %v3905_v50  ;;  %867 = vmatpush.msra.mxu3 %v3776_v24  ;;  %v7427_v24 = vld [vmem:[#allocation12_spill] sm:$0xff] }
 0x110   :  { %808 = vmatpush.msra.mxu0 %v7387_v17  ;;  %828 = vmatpush.msrb.mxu1 %v3913_v51  ;;  %v7436_v50 = vld [vmem:[#allocation8_spill] sm:$0xff]  ;;  %v7437_v51 = vld [vmem:[#allocation21_spill] sm:$0xff] }
 0x111   :  { %848 = vmatpush.msrb.mxu2 %v3931_v54  ;;  %868 = vmatpush.msra.mxu3 %v3796_v28  ;;  %v7428_v28 = vld [vmem:[#allocation6_spill] sm:$0xff]  ;;  %v7440_v54 = vld [vmem:[#allocation9_spill] sm:$0xff] }
 0x112   :  { %809 = vmatpush.msra.mxu0 %v7389_v32  ;;  %829 = vmatpush.msrb.mxu1 %v3937_v55  ;;  %v7441_v55 = vld [vmem:[#allocation23_spill] sm:$0xff]  ;;  %v7456_v32 = vld [vmem:[#allocation56_spill] sm:$0xff] }
 0x113   :  { %849 = vmatpush.msrb.mxu2 %v3955_v58  ;;  %869 = vmatpush.msra.mxu3 %v3847_v39  ;;  %v7430_v39 = vld [vmem:[#allocation20_spill] sm:$0xff]  ;;  %v7444_v58 = vld [vmem:[#allocation10_spill] sm:$0xff]  ;;  %v255_v20 = vadd.f32 %v7457_v22, %v7456_v32 }
 0x114   :  { %810 = vmatpush.msra.mxu0 %v3842_v38  ;;  %830 = vmatpush.msrb.mxu1 %v3975_v61  ;;  %v7429_v38 = vld [vmem:[#allocation16_spill] sm:$0xff]  ;;  %v7446_v61 = vld [vmem:[#allocation30_spill] sm:$0xff] }
 0x115   :  { %850 = vmatpush.msrb.mxu2 %v3990_v63  ;;  %870 = vmatpush.msra.mxu3 %v3866_v43  ;;  %v7432_v43 = vld [vmem:[#allocation7_spill] sm:$0xff] }
 0x116   :  { %811 = vmatpush.msra.mxu0 %v3861_v42  ;;  %831 = vmatpush.msrb.mxu1 %v3998_v0  ;;  %v7431_v42 = vld [vmem:[#allocation13_spill] sm:$0xff]  ;;  %v7447_v63 = vld [vmem:[#allocation19_spill] sm:$0xff] }
 0x117   :  { %851 = vmatpush.msrb.mxu2 %v4016_v3  ;;  %871 = vmatpush.msra.mxu3 %v3918_v52  ;;  %v7438_v52 = vld [vmem:[#allocation27_spill] sm:$0xff] }
 0x118   :  { %812 = vmatpush.msra.mxu0 %v3885_v47  ;;  %832 = vmatpush.msrb.mxu1 %v4022_v4  ;;  %v7433_v47 = vld [vmem:[#allocation18_spill] sm:$0xff]  ;;  %v7448_v0 = vld [vmem:[#allocation11_spill] sm:$0xff] }
 0x119   :  { %852 = vmatpush.msrb.mxu2 %v4040_v7  ;;  %872 = vmatpush.msra.mxu3 %v3943_v56  ;;  %v7442_v56 = vld [vmem:[#allocation29_spill] sm:$0xff]  ;;  %v7450_v3 = vld [vmem:[#allocation31_spill] sm:$0xff]  ;;  %v7451_v4 = vld [vmem:[#allocation22_spill] sm:$0xff] }
 0x11a   :  { %813 = vmatpush.msra.mxu0 %v3900_v49  ;;  %833 = vmatpush.msrb.mxu1 %v4060_v10  ;;  %v7435_v49 = vld [vmem:[#allocation14_spill] sm:$0xff] }
 0x11b   :  { %853 = vmatpush.msrb.mxu2 %v4088_v14  ;;  %873 = vmatpush.msra.mxu3 %v4003_v1  ;;  %v7449_v1 = vld [vmem:[#allocation28_spill] sm:$0xff]  ;;  %v7453_v7 = vld [vmem:[#allocation34_spill] sm:$0xff] }
 0x11c   :  { %814 = vmatpush.msra.mxu0 %v3926_v53  ;;  %834 = vmatpush.msrb.mxu1 %v4083_v13  ;;  %v7439_v53 = vld [vmem:[#allocation15_spill] sm:$0xff]  ;;  %v7455_v13 = vld [vmem:[#allocation36_spill] sm:$0xff] }
 0x11d   :  { %854 = vmatpush.msrb.mxu2 %v4113_v19  ;;  %874 = vmatpush.msra.mxu3 %v4028_v5  ;;  %v7452_v5 = vld [vmem:[#allocation50_spill] sm:$0xff] }
 0x11e   :  { %815 = vmatpush.msra.mxu0 %v3949_v57  ;;  %835 = vmatpush.msrb.mxu1 %v4107_v18  ;;  %v7443_v57 = vld [vmem:[#allocation17_spill] sm:$0xff]  ;;  %v132_v10 = vadd.f32 %v7453_v7, %v7452_v5 }
 0x11f   :  { %855 = vmatpush.msrb.mxu2 %v4149_v30  ;;  %875 = vmatpush.msra.mxu3 %v4075_v12  ;;  %v7454_v12 = vld [vmem:[#allocation58_spill] sm:$0xff] }
 0x120   :  { %816 = vmatpush.msra.mxu0 %v3968_v60  ;;  %836 = vmatpush.msrb.mxu1 %v4134_v25  ;;  %v7445_v60 = vld [vmem:[#allocation25_spill] sm:$0xff]  ;;  %v173_v14 = vadd.f32 %v7455_v13, %v7454_v12 }
 0x121   :  { %856 = vmatpush.msrb.mxu2 %v4170_v34  ;;  %876 = vmatpush.msra.mxu3 %v7427_v24 }
 0x122   :  { %817 = vmatpush.msra.mxu0 %v7428_v28  ;;  %837 = vmatpush.msrb.mxu1 %v7429_v38 }
 0x123   :  { %857 = vmatpush.msrb.mxu2 %v7430_v39  ;;  %877 = vmatpush.msra.mxu3 %v7431_v42  ;;  %v955_v42 = vsel %vm954_vm2, 1, %v7459_v15 }
 0x124   :  { %818 = vmatpush.msra.mxu0 %v7432_v43  ;;  %838 = vmatpush.msrb.mxu1 %v7433_v47 }
 0x125   :  { %858 = vmatpush.msrb.mxu2 %v7434_v48  ;;  %878 = vmatpush.msra.mxu3 %v7435_v49 }
 0x126   :  { %819 = vmatpush.msra.mxu0 %v7436_v50  ;;  %839 = vmatpush.msrb.mxu1 %v7437_v51 }
 0x127   :  { %859 = vmatpush.msrb.mxu2 %v7438_v52  ;;  %879 = vmatpush.msra.mxu3 %v7439_v53 }
 0x128   :  { %820 = vmatpush.msra.mxu0 %v7440_v54  ;;  %840 = vmatpush.msrb.mxu1 %v7441_v55 }
 0x129   :  { %860 = vmatpush.msrb.mxu2 %v7442_v56  ;;  %880 = vmatpush.msra.mxu3 %v7443_v57 }
 0x12a   :  { %821 = vmatpush.msra.mxu0 %v7444_v58  ;;  %841 = vmatpush.msrb.mxu1 %v7445_v60 }
 0x12b   :  { %861 = vmatpush.msrb.mxu2 %v7446_v61  ;;  %881 = vmatpush.msra.mxu3 %v7447_v63 }
 0x12c   :  { %822 = vmatpush.msra.mxu0 %v7448_v0  ;;  %842 = vmatpush.msrb.mxu1 %v7449_v1 }
 0x12d   :  { %862 = vmatpush.msrb.mxu2 %v7450_v3  ;;  %882 = vmatpush.msra.mxu3 %v7451_v4 }
 0x12e   :  { %957 = vperm.xlu1 %3244, %v955_v42   ;;  %v4648_v42 = vld [vmem:[%s7067_s3 + $0x1d0] sm:$0xff] }
 0x189   :  { %v512_v16 = vpop.f32.mrf.mxu0  ;;  %v532_v18 = vpop.f32.mrf.mxu1 }
 0x18a   :  { %v575_v19 = vadd.f32 %v512_v16, %v132_v10  ;;  %v576_v25 = vadd.f32 %v532_v18, %v173_v14 }
 0x18c   :  { %v3172_v31 = vmul.f32 -1.442695, %v575_v19  ;;  %v3173_v17 = vmul.f32 -1.442695, %v576_v25 }
 0x18e   :  { %3263 = vpow2.f32 %v3172_v31  ;;  %v493_v31 = vsel %vm491_vm0, %v4490_v45, 0.0 }
 0x18f   :  { %3265 = vpow2.f32 %v3173_v17 }
 0x190   :  { %v572_v11 = vpop.f32.mrf.mxu3  ;;  %v552_v29 = vpop.f32.mrf.mxu2 }
 0x191   :  { %v578_v33 = vadd.f32 %v572_v11, %v255_v20  ;;  %v577_v8 = vadd.f32 %v552_v29, %v214_v2  ;;  %v1579_v20 = vsel %vm1578_vm8, 1, %v7459_v15  ;;  %v492_v2 = vsel %vm491_vm0, %v4493_v40, 0.0 }
 0x192   :  { %1581 = vperm.xlu1 %3244, %v1579_v20   ;;  %v4780_v20 = vld [vmem:[%s7067_s3 + $0x100] sm:$0xff]  ;;  %v176_v40 = vadd.f32 %v7480_v36, %v7454_v12 }
 0x193   :  { %v3174_v59 = vmul.f32 -1.442695, %v578_v33 }
 0x194   :  { %v3264_v6 = vpop.eup %3263 }
 0x195   :  { %v3266_v23 = vpop.eup %3265  ;;  %v582_v35 = vadd.f32 1.0, %v3264_v6  ;;  %3267 = vpow2.f32 %v3174_v59  ;;  %v4591_v59 = vpop.permute.xlu0 %645 }
 0x196   :  { %v601_v37 = vadd.f32 1.0, %v3266_v23  ;;  %7462 = vst [vmem:[#allocation3_spill] sm:$0xff] %v4591_v59  ;;  %vm647_vm12 = vcmp.eq.s32.totalorder %v4591_v59, 1 }
 0x197   :  { %3269 = vrcp.f32 %v582_v35  ;;  %v594_v49 = vand.u32 2147483648, %v582_v35  ;;  %v592_v54 = vand.u32 2147483647, %v582_v35  ;;  %vm588_vm6 = vweird.f32 %v582_v35 }
 0x198   :  { %3271 = vrcp.f32 %v601_v37  ;;  %v613_v50 = vand.u32 2147483648, %v601_v37  ;;  %v611_v58 = vand.u32 2147483647, %v601_v37  ;;  %vm607_vm5 = vweird.f32 %v601_v37 }
 0x199   :  { %v595_v4 = vor.u32 1.1754944e-38, %v594_v49  ;;  %vm593_vm10 = vcmp.eq.f32.partialorder %v592_v54, 8.507059e+37  ;;  %v4660_v49 = vld [vmem:[%s7067_s3 + $0x1a0] sm:$0xff]  ;;  %v4678_v54 = vld [vmem:[%s7067_s3 + $0x1b8] sm:$0xff] }
 0x19a   :  { %v614_v13 = vor.u32 1.1754944e-38, %v613_v50  ;;  %vm612_vm11 = vcmp.eq.f32.partialorder %v611_v58, 8.507059e+37  ;;  %v4666_v50 = vld [vmem:[%s7067_s3 + $0x1a8] sm:$0xff] }
 0x19b   :  { %v3268_v46 = vpop.eup %3267  ;;  %v4690_v58 = vld [vmem:[%s7067_s3 + $0x188] sm:$0xff] }
 0x19c   :  { %v621_v27 = vadd.f32 1.0, %v3268_v46 }
 0x19d   :  { %v3270_v21 = vpop.eup %3269 }
 0x19e   :  { %v3272_v62 = vpop.eup %3271  ;;  %v584_v24 = vmul.f32 %v3270_v21, %v582_v35  ;;  %3273 = vrcp.f32 %v621_v27  ;;  %vm589_vm3 = vweird.f32 %v3270_v21  ;;  %v633_v35 = vand.u32 2147483648, %v621_v27 }
 0x19f   :  { %v603_v28 = vmul.f32 %v3272_v62, %v601_v37  ;;  %3275 = vtanh.f32 %v577_v8  ;;  %vm608_vm4 = vweird.f32 %v3272_v62  ;;  %vm590_vm7 = vmor %vm588_vm6, %vm589_vm3  ;;  %vm627_vm14 = vweird.f32 %v621_v27  ;;  %v4618_v8 = vld [vmem:[%s7067_s3 + $0x1e8] sm:$0xff] }
 0x1a0   :  { %v585_v38 = vsub.f32 1.0, %v584_v24  ;;  %vm609_vm9 = vmor %vm607_vm5, %vm608_vm4  ;;  %v631_v45 = vand.u32 2147483647, %v621_v27  ;;  %v634_v29 = vor.u32 1.1754944e-38, %v633_v35  ;;  %v4630_v24 = vld [vmem:[%s7067_s3 + $0x1f8] sm:$0xff]  ;;  %v4810_v35 = vld [vmem:[%s7067_s3 + $0xe8] sm:$0xff] }
 0x1a1   :  { %v604_v43 = vsub.f32 1.0, %v603_v28  ;;  %v4636_v28 = vld [vmem:[%s7067_s3 + $0x1c0] sm:$0xff] }
 0x1a2   :  { %v586_v53 = vmul.f32 %v3270_v21, %v585_v38  ;;  %vm632_vm1 = vcmp.eq.f32.partialorder %v631_v45, 8.507059e+37  ;;  %v4642_v38 = vld [vmem:[%s7067_s3 + $0x1c8] sm:$0xff]  ;;  %v4817_v45 = vld [vmem:[%s7067_s3 + $0xf8] sm:$0xff] }
 0x1a3   :  { %v605_v57 = vmul.f32 %v3272_v62, %v604_v43  ;;  %v4654_v43 = vld [vmem:[%s7067_s3 + $0x1d8] sm:$0xff] }
 0x1a4   :  { %v3274_v63 = vpop.eup %3273  ;;  %v587_v0 = vadd.f32 %v3270_v21, %v586_v53  ;;  %v4672_v53 = vld [vmem:[%s7067_s3 + $0x1b0] sm:$0xff] }
 0x1a5   :  { %v606_v7 = vadd.f32 %v3272_v62, %v605_v57  ;;  %v623_v10 = vmul.f32 %v3274_v63, %v621_v27  ;;  %v3276_v16 = vpop.eup %3275  ;;  %vm628_vm13 = vweird.f32 %v3274_v63  ;;  %v4612_v27 = vld [vmem:[%s7067_s3 + $0x1e0] sm:$0xff] }
 0x1a6   :  { %v591_v14 = vsel %vm590_vm7, %v3270_v21, %v587_v0  ;;  %vm629_vm15 = vmor %vm627_vm14, %vm628_vm13  ;;  %v4684_v57 = vld [vmem:[%s7067_s3 + $0x180] sm:$0xff]  ;;  %v4702_v0 = vld [vmem:[%s7067_s3 + $0x198] sm:$0xff] }
 0x1a7   :  { %v596_v18 = vsel %vm593_vm10, %v595_v4, %v591_v14  ;;  %v610_v19 = vsel %vm609_vm9, %v3272_v62, %v606_v7  ;;  %v624_v25 = vsub.f32 1.0, %v623_v10  ;;  %v4624_v62 = vld [vmem:[%s7067_s3 + $0x1f0] sm:$0xff]  ;;  %v4708_v4 = vld [vmem:[%s7067_s3 + $0x160] sm:$0xff]  ;;  %v4714_v7 = vld [vmem:[%s7067_s3 + $0x168] sm:$0xff] }
 0x1a8   :  { %v615_v17 = vsel %vm612_vm11, %v614_v13, %v610_v19  ;;  %v638_v22 = vmul.f32 %v3276_v16, %v596_v18  ;;  %v4720_v10 = vld [vmem:[%s7067_s3 + $0x170] sm:$0xff]  ;;  %v4726_v13 = vld [vmem:[%s7067_s3 + $0x178] sm:$0xff]  ;;  %v4732_v14 = vld [vmem:[%s7067_s3 + $0x140] sm:$0xff] }
 0x1a9   :  { %v637_v11 = vmul.f32 %v615_v17, %v493_v31  ;;  %v625_v33 = vmul.f32 %v3274_v63, %v624_v25  ;;  %v4738_v16 = vld [vmem:[%s7067_s3 + $0x148] sm:$0xff]  ;;  %v4744_v18 = vld [vmem:[%s7067_s3 + $0x150] sm:$0xff]  ;;  %v4750_v19 = vld [vmem:[%s7067_s3 + $0x158] sm:$0xff] }
 0x1aa   :  { %v4756_v25 = vld [vmem:[%s7067_s3 + $0x120] sm:$0xff]  ;;  %v4768_v17 = vld [vmem:[%s7067_s3 + $0x130] sm:$0xff] }
 0x1ab   :  { %v639_v6 = vadd.f32 %v638_v22, %v637_v11  ;;  %v626_v23 = vadd.f32 %v3274_v63, %v625_v33  ;;  %v4774_v22 = vld [vmem:[%s7067_s3 + $0x138] sm:$0xff]  ;;  %v4786_v11 = vld [vmem:[%s7067_s3 + $0x108] sm:$0xff]  ;;  %v4792_v33 = vld [vmem:[%s7067_s3 + $0x110] sm:$0xff] }
 0x1ad   :  { %3277 = vtanh.f32 %v639_v6  ;;  %v4596_v37 = vsel %vm647_vm12, %v639_v6, %v493_v31  ;;  %v630_v26 = vsel %vm629_vm15, %v3274_v63, %v626_v23  ;;  %v4696_v63 = vld [vmem:[%s7067_s3 + $0x190] sm:$0xff]  ;;  %v4762_v31 = vld [vmem:[%s7067_s3 + $0x128] sm:$0xff]  ;;  %v4798_v6 = vld [vmem:[%s7067_s3 + $0x118] sm:$0xff] }
 0x1ae   :  { %v635_v46 = vsel %vm632_vm1, %v634_v29, %v630_v26  ;;  %v4804_v23 = vld [vmem:[%s7067_s3 + $0xe0] sm:$0xff]  ;;  %v4829_v29 = vld [vmem:[%s7067_s3 + $0xc8] sm:$0xff] }
 0x1af   :  { %v4823_v26 = vld [vmem:[%s7067_s3 + $0xc0] sm:$0xff]  ;;  %7464 = vst [vmem:[#allocation6_spill] sm:$0xff] %v4829_v29 }
 0x1b3   :  { %v3278_v41 = vpop.eup %3277 }
 0x1b4   :  { %v641_v44 = vmul.f32 %v3278_v41, %v635_v46  ;;  %v4842_v41 = vld [vmem:[%s7067_s3 + $0xa0] sm:$0xff]  ;;  %v4848_v46 = vld [vmem:[%s7067_s3 + $0xa8] sm:$0xff] }
 0x1b5   :  { %7466 = vst [vmem:[#allocation20_spill] sm:$0xff] %v4842_v41 }
 0x1b6   :  { %v4603_v21 = vsel %vm647_vm12, %v641_v44, %v492_v2  ;;  %7467 = vst [vmem:[#allocation13_spill] sm:$0xff] %v4848_v46  ;;  %v4861_v44 = vld [vmem:[%s7067_s3 + $0x80] sm:$0xff] }
 0x1b7   :  { %7463 = vst [vmem:[#allocation12_spill] sm:$0xff] %v4603_v21  ;;  %667 = vmatmul.f32.vlgmr.msrb.gmra.mxu0 %v4603_v21  ;;  %687 = vmatmul.f32.vlgmr.msra.gmra.mxu1 %v4603_v21  ;;  %v4875_v2 = vld [vmem:[%s7067_s3 + $0x60] sm:$0xff] }
 0x1b8   :  { %707 = vmatmul.f32.vlgmr.msra.gmra.mxu2 %v4603_v21  ;;  %727 = vmatmul.f32.vlgmr.msrb.gmra.mxu3 %v4603_v21  ;;  %7469 = vst [vmem:[#allocation18_spill] sm:$0xff] %v4861_v44 }
 0x1b9   :  { %963 = vmatpush.msrb.mxu0 %v4612_v27  ;;  %983 = vmatpush.msra.mxu1 %v4618_v8  ;;  %7471 = vst [vmem:[#allocation14_spill] sm:$0xff] %v4875_v2 }
 0x1ba   :  { %1003 = vmatpush.msra.mxu2 %v4624_v62  ;;  %1023 = vmatpush.msrb.mxu3 %v4630_v24 }
 0x1bb   :  { %964 = vmatpush.msrb.mxu0 %v4636_v28  ;;  %984 = vmatpush.msra.mxu1 %v4642_v38 }
 0x1bc   :  { %1004 = vmatpush.msra.mxu2 %v4648_v42  ;;  %1024 = vmatpush.msrb.mxu3 %v4654_v43 }
 0x1bd   :  { %965 = vmatpush.msrb.mxu0 %v4660_v49  ;;  %985 = vmatpush.msra.mxu1 %v4666_v50 }
 0x1be   :  { %1005 = vmatpush.msra.mxu2 %v4672_v53  ;;  %1025 = vmatpush.msrb.mxu3 %v4678_v54 }
 0x1bf   :  { %966 = vmatpush.msrb.mxu0 %v4684_v57  ;;  %986 = vmatpush.msra.mxu1 %v4690_v58 }
 0x1c0   :  { %1006 = vmatpush.msra.mxu2 %v4696_v63  ;;  %1026 = vmatpush.msrb.mxu3 %v4702_v0 }
 0x1c1   :  { %967 = vmatpush.msrb.mxu0 %v4708_v4  ;;  %987 = vmatpush.msra.mxu1 %v4714_v7 }
 0x1c2   :  { %1007 = vmatpush.msra.mxu2 %v4720_v10  ;;  %1027 = vmatpush.msrb.mxu3 %v4726_v13 }
 0x1c3   :  { %968 = vmatpush.msrb.mxu0 %v4732_v14  ;;  %988 = vmatpush.msra.mxu1 %v4738_v16 }
 0x1c4   :  { %1008 = vmatpush.msra.mxu2 %v4744_v18  ;;  %1028 = vmatpush.msrb.mxu3 %v4750_v19 }
 0x1c5   :  { %969 = vmatpush.msrb.mxu0 %v4756_v25  ;;  %989 = vmatpush.msra.mxu1 %v4762_v31 }
 0x1c6   :  { %1009 = vmatpush.msra.mxu2 %v4768_v17  ;;  %1029 = vmatpush.msrb.mxu3 %v4774_v22 }
 0x1c7   :  { %970 = vmatpush.msrb.mxu0 %v4780_v20  ;;  %990 = vmatpush.msra.mxu1 %v4786_v11 }
 0x1c8   :  { %1010 = vmatpush.msra.mxu2 %v4792_v33  ;;  %1030 = vmatpush.msrb.mxu3 %v4798_v6 }
 0x1c9   :  { %971 = vmatpush.msrb.mxu0 %v4804_v23  ;;  %991 = vmatpush.msra.mxu1 %v4810_v35 }
 0x1ca   :  { %1011 = vmatpush.msra.mxu2 %v4149_v30  ;;  %1031 = vmatpush.msrb.mxu3 %v4817_v45  ;;  %v4836_v30 = vld [vmem:[%s7067_s3 + $0xd8] sm:$0xff] }
 0x1cb   :  { %972 = vmatpush.msrb.mxu0 %v4823_v26  ;;  %992 = vmatpush.msra.mxu1 %v4829_v29  ;;  %7465 = vst [vmem:[#allocation16_spill] sm:$0xff] %v4836_v30  ;;  %v4936_v29 = vpop.permute.xlu1 %801 }
 0x1cc   :  { %1012 = vmatpush.msra.mxu2 %v4170_v34  ;;  %1032 = vmatpush.msrb.mxu3 %v4836_v30  ;;  %v4855_v34 = vld [vmem:[%s7067_s3 + $0xb8] sm:$0xff]  ;;  %7483 = vst [vmem:[#allocation17_spill] sm:$0xff] %v4936_v29  ;;  %vm803_vm10 = vcmp.eq.s32.totalorder %v4936_v29, 1 }
 0x1cd   :  { %973 = vmatpush.msrb.mxu0 %v4842_v41  ;;  %993 = vmatpush.msra.mxu1 %v4848_v46  ;;  %7468 = vst [vmem:[#allocation7_spill] sm:$0xff] %v4855_v34 }
 0x1ce   :  { %1013 = vmatpush.msra.mxu2 %v7430_v39  ;;  %1033 = vmatpush.msrb.mxu3 %v4855_v34  ;;  %v4869_v39 = vld [vmem:[%s7067_s3 + $0x98] sm:$0xff] }
 0x1cf   :  { %974 = vmatpush.msrb.mxu0 %v4861_v44  ;;  %994 = vmatpush.msra.mxu1 %v7433_v47  ;;  %7470 = vst [vmem:[#allocation24_spill] sm:$0xff] %v4869_v39  ;;  %v4883_v47 = vld [vmem:[%s7067_s3 + $0x78] sm:$0xff] }
 0x1d0   :  { %1014 = vmatpush.msra.mxu2 %v7434_v48  ;;  %1034 = vmatpush.msrb.mxu3 %v4869_v39  ;;  %7472 = vst [vmem:[#allocation8_spill] sm:$0xff] %v4883_v47  ;;  %v4889_v48 = vld [vmem:[%s7067_s3 + $0x40] sm:$0xff] }
 0x1d1   :  { %975 = vmatpush.msrb.mxu0 %v4875_v2  ;;  %995 = vmatpush.msra.mxu1 %v7437_v51  ;;  %7473 = vst [vmem:[#allocation21_spill] sm:$0xff] %v4889_v48  ;;  %v4897_v51 = vld [vmem:[%s7067_s3 + $0x58] sm:$0xff] }
 0x1d2   :  { %1015 = vmatpush.msra.mxu2 %v7438_v52  ;;  %1035 = vmatpush.msrb.mxu3 %v4883_v47  ;;  %7474 = vst [vmem:[#allocation27_spill] sm:$0xff] %v4897_v51  ;;  %v4903_v52 = vld [vmem:[%s7067_s3 + $0x20] sm:$0xff] }
 0x1d3   :  { %976 = vmatpush.msrb.mxu0 %v4889_v48  ;;  %996 = vmatpush.msra.mxu1 %v7441_v55  ;;  %7475 = vst [vmem:[#allocation15_spill] sm:$0xff] %v4903_v52  ;;  %v4911_v55 = vld [vmem:[%s7067_s3 + $0x38] sm:$0xff] }
 0x1d4   :  { %1016 = vmatpush.msra.mxu2 %v7442_v56  ;;  %1036 = vmatpush.msrb.mxu3 %v4897_v51  ;;  %7476 = vst [vmem:[#allocation9_spill] sm:$0xff] %v4911_v55  ;;  %v4917_v56 = vld [vmem:[%s7067_s3] sm:$0xff] }
 0x1d5   :  { %977 = vmatpush.msrb.mxu0 %v4903_v52  ;;  %997 = vmatpush.msra.mxu1 %v7445_v60  ;;  %7477 = vst [vmem:[#allocation23_spill] sm:$0xff] %v4917_v56  ;;  %v4925_v60 = vld [vmem:[%s7067_s3 + $0x18] sm:$0xff] }
 0x1d6   :  { %1017 = vmatpush.msra.mxu2 %v7446_v61  ;;  %1037 = vmatpush.msrb.mxu3 %v4911_v55  ;;  %7478 = vst [vmem:[#allocation29_spill] sm:$0xff] %v4925_v60  ;;  %v7479_v61 = vld [vmem:[#allocation37_spill] sm:$0xff] }
 0x1d7   :  { %978 = vmatpush.msrb.mxu0 %v4917_v56  ;;  %998 = vmatpush.msra.mxu1 %v7449_v1  ;;  %v135_v59 = vadd.f32 %v7479_v61, %v7452_v5 }
 0x1d8   :  { %1018 = vmatpush.msra.mxu2 %v7450_v3  ;;  %1038 = vmatpush.msrb.mxu3 %v4925_v60  ;;  %v7481_v3 = vld [vmem:[#allocation35_spill] sm:$0xff] }
 0x1d9   :  { %v258_v48 = vadd.f32 %v7481_v3, %v7456_v32 }
 0x1dc   :  { %v7508_v29 = vld [vmem:[#allocation23_spill] sm:$0xff] }
 0x234   :  { %v668_v15 = vpop.f32.mrf.mxu0  ;;  %v688_v55 = vpop.f32.mrf.mxu1 }
 0x235   :  { %v731_v56 = vadd.f32 %v668_v15, %v135_v59  ;;  %v732_v52 = vadd.f32 %v688_v55, %v176_v40  ;;  %v7482_v40 = vld [vmem:[#allocation41_spill] sm:$0xff] }
 0x236   :  { %v217_v59 = vadd.f32 %v7482_v40, %v7460_v9 }
 0x237   :  { %v3175_v1 = vmul.f32 -1.442695, %v731_v56  ;;  %v3176_v51 = vmul.f32 -1.442695, %v732_v52 }
 0x239   :  { %3279 = vpow2.f32 %v3175_v1 }
 0x23a   :  { %3281 = vpow2.f32 %v3176_v51 }
 0x23b   :  { %v728_v47 = vpop.f32.mrf.mxu3  ;;  %v708_v36 = vpop.f32.mrf.mxu2 }
 0x23c   :  { %v734_v2 = vadd.f32 %v728_v47, %v258_v48  ;;  %v733_v56 = vadd.f32 %v708_v36, %v217_v59 }
 0x23e   :  { %v3177_v60 = vmul.f32 -1.442695, %v734_v2 }
 0x23f   :  { %v3280_v39 = vpop.eup %3279 }
 0x240   :  { %v3282_v44 = vpop.eup %3281  ;;  %v738_v61 = vadd.f32 1.0, %v3280_v39  ;;  %3283 = vpow2.f32 %v3177_v60 }
 0x241   :  { %v757_v5 = vadd.f32 1.0, %v3282_v44 }
 0x242   :  { %3285 = vrcp.f32 %v738_v61  ;;  %v750_v3 = vand.u32 2147483648, %v738_v61  ;;  %v748_v44 = vand.u32 2147483647, %v738_v61  ;;  %vm744_vm4 = vweird.f32 %v738_v61 }
 0x243   :  { %3287 = vrcp.f32 %v757_v5  ;;  %v769_v60 = vand.u32 2147483648, %v757_v5  ;;  %v767_v12 = vand.u32 2147483647, %v757_v5  ;;  %vm763_vm6 = vweird.f32 %v757_v5 }
 0x244   :  { %v751_v36 = vor.u32 1.1754944e-38, %v750_v3  ;;  %vm749_vm7 = vcmp.eq.f32.partialorder %v748_v44, 8.507059e+37  ;;  %v7487_v44 = vld [vmem:[#allocation16_spill] sm:$0xff] }
 0x245   :  { %vm768_vm9 = vcmp.eq.f32.partialorder %v767_v12, 8.507059e+37 }
 0x246   :  { %v3284_v15 = vpop.eup %3283 }
 0x247   :  { %v777_v52 = vadd.f32 1.0, %v3284_v15 }
 0x248   :  { %v3286_v55 = vpop.eup %3285 }
 0x249   :  { %v3288_v1 = vpop.eup %3287  ;;  %v740_v51 = vmul.f32 %v3286_v55, %v738_v61  ;;  %3289 = vrcp.f32 %v777_v52  ;;  %vm745_vm2 = vweird.f32 %v3286_v55  ;;  %vm783_vm13 = vweird.f32 %v777_v52 }
 0x24a   :  { %v759_v47 = vmul.f32 %v3288_v1, %v757_v5  ;;  %3291 = vtanh.f32 %v733_v56  ;;  %vm764_vm3 = vweird.f32 %v3288_v1  ;;  %vm746_vm5 = vmor %vm744_vm4, %vm745_vm2  ;;  %v787_v12 = vand.u32 2147483647, %v777_v52 }
 0x24b   :  { %v741_v2 = vsub.f32 1.0, %v740_v51  ;;  %vm765_vm8 = vmor %vm763_vm6, %vm764_vm3  ;;  %v770_v51 = vor.u32 1.1754944e-38, %v769_v60  ;;  %v7488_v60 = vld [vmem:[#allocation20_spill] sm:$0xff] }
 0x24c   :  { %v760_v48 = vsub.f32 1.0, %v759_v47  ;;  %vm788_vm15 = vcmp.eq.f32.partialorder %v787_v12, 8.507059e+37  ;;  %v5051_v12 = vld [vmem:[%s7067_s3 + $0x50] sm:$0xff] }
 0x24d   :  { %v742_v39 = vmul.f32 %v3286_v55, %v741_v2  ;;  %7502 = vst [vmem:[#allocation34_spill] sm:$0xff] %v5051_v12 }
 0x24e   :  { %v761_v32 = vmul.f32 %v3288_v1, %v760_v48 }
 0x24f   :  { %v3290_v34 = vpop.eup %3289  ;;  %v743_v40 = vadd.f32 %v3286_v55, %v742_v39 }
 0x250   :  { %v779_v15 = vmul.f32 %v3290_v34, %v777_v52  ;;  %v762_v59 = vadd.f32 %v3288_v1, %v761_v32  ;;  %v3292_v56 = vpop.eup %3291  ;;  %vm784_vm11 = vweird.f32 %v3290_v34 }
 0x251   :  { %v747_v9 = vsel %vm746_vm5, %v3286_v55, %v743_v40  ;;  %v789_v55 = vand.u32 2147483648, %v777_v52  ;;  %vm785_vm14 = vmor %vm783_vm13, %vm784_vm11  ;;  %v5000_v52 = vld [vmem:[%s7067_s3 + $0xd0] sm:$0xff] }
 0x252   :  { %v752_v47 = vsel %vm749_vm7, %v751_v36, %v747_v9  ;;  %v780_v2 = vsub.f32 1.0, %v779_v15  ;;  %v766_v46 = vsel %vm765_vm8, %v3288_v1, %v762_v59  ;;  %7486 = vst [vmem:[#allocation25_spill] sm:$0xff] %v5000_v52  ;;  %v7489_v40 = vld [vmem:[#allocation13_spill] sm:$0xff]  ;;  %v7491_v15 = vld [vmem:[#allocation7_spill] sm:$0xff]  ;;  %v7492_v59 = vld [vmem:[#allocation18_spill] sm:$0xff] }
 0x253   :  { %v794_v48 = vmul.f32 %v3292_v56, %v752_v47  ;;  %v771_v41 = vsel %vm768_vm9, %v770_v51, %v766_v46  ;;  %v790_v1 = vor.u32 1.1754944e-38, %v789_v55  ;;  %v5009_v36 = vld [vmem:[%s7067_s3 + $0xb0] sm:$0xff]  ;;  %v5017_v51 = vld [vmem:[%s7067_s3 + $0x88] sm:$0xff] }
 0x254   :  { %v781_v30 = vmul.f32 %v3290_v34, %v780_v2  ;;  %v793_v61 = vmul.f32 %v771_v41, %v4596_v37  ;;  %7490 = vst [vmem:[#allocation30_spill] sm:$0xff] %v5009_v36  ;;  %v5023_v56 = vld [vmem:[%s7067_s3 + $0x90] sm:$0xff]  ;;  %v7495_v47 = vld [vmem:[#allocation24_spill] sm:$0xff]  ;;  %v7496_v2 = vld [vmem:[#allocation14_spill] sm:$0xff] }
 0x255   :  { %7493 = vst [vmem:[#allocation19_spill] sm:$0xff] %v5017_v51  ;;  %v5045_v55 = vld [vmem:[%s7067_s3 + $0x48] sm:$0xff] }
 0x256   :  { %v795_v32 = vadd.f32 %v794_v48, %v793_v61  ;;  %v782_v5 = vadd.f32 %v3290_v34, %v781_v30  ;;  %7494 = vst [vmem:[#allocation11_spill] sm:$0xff] %v5023_v56  ;;  %v5031_v48 = vld [vmem:[%s7067_s3 + $0x68] sm:$0xff]  ;;  %v5037_v61 = vld [vmem:[%s7067_s3 + $0x70] sm:$0xff] }
 0x257   :  { %7497 = vst [vmem:[#allocation28_spill] sm:$0xff] %v5031_v48 }
 0x258   :  { %3293 = vtanh.f32 %v795_v32  ;;  %v4943_v9 = vsel %vm803_vm10, %v795_v32, %v4596_v37  ;;  %v786_v46 = vsel %vm785_vm14, %v3290_v34, %v782_v5  ;;  %v4991_v37 = vld [vmem:[%s7067_s3 + $0xf0] sm:$0xff]  ;;  %v7485_v34 = vld [vmem:[#allocation6_spill] sm:$0xff]  ;;  %7498 = vst [vmem:[#allocation31_spill] sm:$0xff] %v5037_v61  ;;  %v7499_v32 = vld [vmem:[#allocation8_spill] sm:$0xff] }
 0x259   :  { %v791_v41 = vsel %vm788_vm15, %v790_v1, %v786_v46  ;;  %v7500_v5 = vld [vmem:[#allocation21_spill] sm:$0xff]  ;;  %7501 = vst [vmem:[#allocation22_spill] sm:$0xff] %v5045_v55  ;;  %v7503_v46 = vld [vmem:[#allocation27_spill] sm:$0xff] }
 0x25a   :  { %v7504_v1 = vld [vmem:[#allocation15_spill] sm:$0xff] }
 0x25e   :  { %v3294_v3 = vpop.eup %3293 }
 0x25f   :  { %v797_v39 = vmul.f32 %v3294_v3, %v791_v41  ;;  %v5059_v3 = vld [vmem:[%s7067_s3 + $0x28] sm:$0xff]  ;;  %v5065_v41 = vld [vmem:[%s7067_s3 + $0x30] sm:$0xff] }
 0x260   :  { %7505 = vst [vmem:[#allocation36_spill] sm:$0xff] %v5059_v3 }
 0x261   :  { %v4948_v30 = vsel %vm803_vm10, %v797_v39, %v4603_v21  ;;  %7506 = vst [vmem:[#allocation33_spill] sm:$0xff] %v5065_v41  ;;  %v7507_v39 = vld [vmem:[#allocation9_spill] sm:$0xff]  ;;  %v5073_v21 = vld [vmem:[%s7067_s3 + $0x8] sm:$0xff] }
 0x262   :  { %7484 = vst [vmem:[#allocation10_spill] sm:$0xff] %v4948_v30  ;;  %823 = vmatmul.f32.vlgmr.msra.gmra.mxu0 %v4948_v30  ;;  %843 = vmatmul.f32.vlgmr.msrb.gmra.mxu1 %v4948_v30 }
 0x263   :  { %863 = vmatmul.f32.vlgmr.msrb.gmra.mxu2 %v4948_v30  ;;  %883 = vmatmul.f32.vlgmr.msra.gmra.mxu3 %v4948_v30  ;;  %7509 = vst [vmem:[#allocation26_spill] sm:$0xff] %v5073_v21 }
 0x264   :  { %1119 = vmatpush.msra.mxu0 %v4612_v27  ;;  %1139 = vmatpush.msrb.mxu1 %v4618_v8 }
 0x265   :  { %1159 = vmatpush.msrb.mxu2 %v4624_v62  ;;  %1179 = vmatpush.msra.mxu3 %v4630_v24 }
 0x266   :  { %1120 = vmatpush.msra.mxu0 %v4636_v28  ;;  %1140 = vmatpush.msrb.mxu1 %v4642_v38 }
 0x267   :  { %1160 = vmatpush.msrb.mxu2 %v4648_v42  ;;  %1180 = vmatpush.msra.mxu3 %v4654_v43 }
 0x268   :  { %1121 = vmatpush.msra.mxu0 %v4660_v49  ;;  %1141 = vmatpush.msrb.mxu1 %v4666_v50 }
 0x269   :  { %1161 = vmatpush.msrb.mxu2 %v4672_v53  ;;  %1181 = vmatpush.msra.mxu3 %v4678_v54 }
 0x26a   :  { %1122 = vmatpush.msra.mxu0 %v4684_v57  ;;  %1142 = vmatpush.msrb.mxu1 %v4690_v58 }
 0x26b   :  { %1162 = vmatpush.msrb.mxu2 %v4696_v63  ;;  %1182 = vmatpush.msra.mxu3 %v4702_v0 }
 0x26c   :  { %1123 = vmatpush.msra.mxu0 %v4708_v4  ;;  %1143 = vmatpush.msrb.mxu1 %v4714_v7 }
 0x26d   :  { %1163 = vmatpush.msrb.mxu2 %v4720_v10  ;;  %1183 = vmatpush.msra.mxu3 %v4726_v13 }
 0x26e   :  { %1124 = vmatpush.msra.mxu0 %v4732_v14  ;;  %1144 = vmatpush.msrb.mxu1 %v4738_v16 }
 0x26f   :  { %1164 = vmatpush.msrb.mxu2 %v4744_v18  ;;  %1184 = vmatpush.msra.mxu3 %v4750_v19 }
 0x270   :  { %1125 = vmatpush.msra.mxu0 %v4756_v25  ;;  %1145 = vmatpush.msrb.mxu1 %v4762_v31 }
 0x271   :  { %1165 = vmatpush.msrb.mxu2 %v4768_v17  ;;  %1185 = vmatpush.msra.mxu3 %v4774_v22 }
 0x272   :  { %1126 = vmatpush.msra.mxu0 %v4780_v20  ;;  %1146 = vmatpush.msrb.mxu1 %v4786_v11 }
 0x273   :  { %1166 = vmatpush.msrb.mxu2 %v4792_v33  ;;  %1186 = vmatpush.msra.mxu3 %v4798_v6 }
 0x274   :  { %1127 = vmatpush.msra.mxu0 %v4804_v23  ;;  %1147 = vmatpush.msrb.mxu1 %v4810_v35 }
 0x275   :  { %1167 = vmatpush.msrb.mxu2 %v4991_v37  ;;  %1187 = vmatpush.msra.mxu3 %v4817_v45 }
 0x276   :  { %1128 = vmatpush.msra.mxu0 %v4823_v26  ;;  %1148 = vmatpush.msrb.mxu1 %v7485_v34 }
 0x277   :  { %1168 = vmatpush.msrb.mxu2 %v5000_v52  ;;  %1188 = vmatpush.msra.mxu3 %v7487_v44 }
 0x278   :  { %1129 = vmatpush.msra.mxu0 %v7488_v60  ;;  %1149 = vmatpush.msrb.mxu1 %v7489_v40 }
 0x279   :  { %1169 = vmatpush.msrb.mxu2 %v5009_v36  ;;  %1189 = vmatpush.msra.mxu3 %v7491_v15 }
 0x27a   :  { %1130 = vmatpush.msra.mxu0 %v7492_v59  ;;  %1150 = vmatpush.msrb.mxu1 %v5017_v51 }
 0x27b   :  { %1170 = vmatpush.msrb.mxu2 %v5023_v56  ;;  %1190 = vmatpush.msra.mxu3 %v7495_v47  ;;  %v7516_v47 = vld [vmem:[#allocation56_spill] sm:$0xff]  ;;  %v7517_v56 = vld [vmem:[#allocation39_spill] sm:$0xff] }
 0x27c   :  { %1131 = vmatpush.msra.mxu0 %v7496_v2  ;;  %1151 = vmatpush.msrb.mxu1 %v5031_v48  ;;  %v261_v51 = vadd.f32 %v7517_v56, %v7516_v47 }
 0x27d   :  { %1171 = vmatpush.msrb.mxu2 %v5037_v61  ;;  %1191 = vmatpush.msra.mxu3 %v7499_v32 }
 0x27e   :  { %1132 = vmatpush.msra.mxu0 %v7500_v5  ;;  %1152 = vmatpush.msrb.mxu1 %v5045_v55 }
 0x27f   :  { %1172 = vmatpush.msrb.mxu2 %v5051_v12  ;;  %1192 = vmatpush.msra.mxu3 %v7503_v46  ;;  %v7515_v12 = vld [vmem:[#allocation44_spill] sm:$0xff] }
 0x280   :  { %1133 = vmatpush.msra.mxu0 %v7504_v1  ;;  %1153 = vmatpush.msrb.mxu1 %v5059_v3  ;;  %v5079_v3 = vld [vmem:[%s7067_s3 + $0x10] sm:$0xff] }
 0x281   :  { %1173 = vmatpush.msrb.mxu2 %v5065_v41  ;;  %1193 = vmatpush.msra.mxu3 %v7507_v39  ;;  %7510 = vst [vmem:[#allocation38_spill] sm:$0xff] %v5079_v3  ;;  %v7511_v1 = vld [vmem:[#allocation29_spill] sm:$0xff]  ;;  %v7512_v41 = vld [vmem:[#allocation50_spill] sm:$0xff] }
 0x282   :  { %1134 = vmatpush.msra.mxu0 %v7508_v29  ;;  %1154 = vmatpush.msrb.mxu1 %v5073_v21  ;;  %v7513_v39 = vld [vmem:[#allocation42_spill] sm:$0xff] }
 0x283   :  { %1174 = vmatpush.msrb.mxu2 %v5079_v3  ;;  %1194 = vmatpush.msra.mxu3 %v7511_v1  ;;  %v138_v46 = vadd.f32 %v7513_v39, %v7512_v41  ;;  %v7514_v29 = vld [vmem:[#allocation58_spill] sm:$0xff] }
 0x284   :  { %v179_v55 = vadd.f32 %v7515_v12, %v7514_v29 }
 0x2df   :  { %v824_v5 = vpop.f32.mrf.mxu0  ;;  %v844_v32 = vpop.f32.mrf.mxu1 }
 0x2e0   :  { %v887_v61 = vadd.f32 %v824_v5, %v138_v46  ;;  %v888_v48 = vadd.f32 %v844_v32, %v179_v55  ;;  %v7520_v5 = vld [vmem:[#allocation45_spill] sm:$0xff] }
 0x2e2   :  { %v3178_v21 = vmul.f32 -1.442695, %v887_v61  ;;  %v3179_v2 = vmul.f32 -1.442695, %v888_v48  ;;  %v3567_v61 = vld [vmem:[%s7068_s0] sm:$0xff]  ;;  %v7518_v48 = vmov 0  }
 0x2e3   :  { %vm1110_vm1 = vcmp.gt.s32.totalorder %v3567_v61, 4  ;;  %vm1266_vm2 = vcmp.gt.s32.totalorder %v3567_v61, 5 }
 0x2e4   :  { %3295 = vpow2.f32 %v3178_v21  ;;  %v1111_v32 = vsel %vm1110_vm1, 1, %v7518_v48 }
 0x2e5   :  { %3297 = vpow2.f32 %v3179_v2  ;;  %v7519_v2 = vld [vmem:[#allocation61_spill] sm:$0xff]  ;;  %1113 = vperm.xlu2 %3245, %v1111_v32  }
 0x2e6   :  { %v884_v3 = vpop.f32.mrf.mxu3  ;;  %v864_v21 = vpop.f32.mrf.mxu2 }
 0x2e7   :  { %v890_v59 = vadd.f32 %v884_v3, %v261_v51  ;;  %v220_v51 = vadd.f32 %v7520_v5, %v7519_v2  ;;  %v1267_v3 = vsel %vm1266_vm2, 1, %v7518_v48 }
 0x2e9   :  { %v3180_v1 = vmul.f32 -1.442695, %v890_v59 }
 0x2ea   :  { %v3296_v15 = vpop.eup %3295 }
 0x2eb   :  { %v3298_v36 = vpop.eup %3297  ;;  %v894_v39 = vadd.f32 1.0, %v3296_v15  ;;  %3299 = vpow2.f32 %v3180_v1  ;;  %v889_v15 = vadd.f32 %v864_v21, %v220_v51 }
 0x2ec   :  { %v913_v41 = vadd.f32 1.0, %v3298_v36 }
 0x2ed   :  { %3301 = vrcp.f32 %v894_v39  ;;  %v906_v29 = vand.u32 2147483648, %v894_v39  ;;  %v904_v44 = vand.u32 2147483647, %v894_v39  ;;  %1269 = vperm.xlu2 %3245, %v1267_v3   ;;  %vm900_vm5 = vweird.f32 %v894_v39 }
 0x2ee   :  { %3303 = vrcp.f32 %v913_v41  ;;  %v925_v40 = vand.u32 2147483648, %v913_v41  ;;  %v923_v32 = vand.u32 2147483647, %v913_v41  ;;  %vm919_vm6 = vweird.f32 %v913_v41 }
 0x2ef   :  { %vm905_vm9 = vcmp.eq.f32.partialorder %v904_v44, 8.507059e+37 }
 0x2f0   :  { %v926_v48 = vor.u32 1.1754944e-38, %v925_v40  ;;  %vm924_vm11 = vcmp.eq.f32.partialorder %v923_v32, 8.507059e+37 }
 0x2f1   :  { %v3300_v56 = vpop.eup %3299 }
 0x2f2   :  { %v933_v59 = vadd.f32 1.0, %v3300_v56  ;;  %v907_v56 = vor.u32 1.1754944e-38, %v906_v29 }
 0x2f3   :  { %v3302_v55 = vpop.eup %3301 }
 0x2f4   :  { %v3304_v36 = vpop.eup %3303  ;;  %v896_v12 = vmul.f32 %v3302_v55, %v894_v39  ;;  %3305 = vrcp.f32 %v933_v59  ;;  %vm901_vm3 = vweird.f32 %v3302_v55  ;;  %v5097_v39 = vpop.permute.xlu1 %957  ;;  %v945_v40 = vand.u32 2147483648, %v933_v59 }
 0x2f5   :  { %v915_v46 = vmul.f32 %v3304_v36, %v913_v41  ;;  %3307 = vtanh.f32 %v889_v15  ;;  %vm920_vm4 = vweird.f32 %v3304_v36  ;;  %vm902_vm7 = vmor %vm900_vm5, %vm901_vm3  ;;  %7521 = vst [vmem:[#allocation37_spill] sm:$0xff] %v5097_v39  ;;  %vm959_vm13 = vcmp.eq.s32.totalorder %v5097_v39, 1  ;;  %v7545_v39 = vld [vmem:[#allocation23_spill] sm:$0xff] }
 0x2f6   :  { %v897_v1 = vsub.f32 1.0, %v896_v12  ;;  %vm921_vm8 = vmor %vm919_vm6, %vm920_vm4  ;;  %vm939_vm15 = vweird.f32 %v933_v59 }
 0x2f7   :  { %v916_v47 = vsub.f32 1.0, %v915_v46 }
 0x2f8   :  { %v898_v60 = vmul.f32 %v3302_v55, %v897_v1 }
 0x2f9   :  { %v917_v5 = vmul.f32 %v3304_v36, %v916_v47 }
 0x2fa   :  { %v3306_v21 = vpop.eup %3305  ;;  %v899_v61 = vadd.f32 %v3302_v55, %v898_v60 }
 0x2fb   :  { %v918_v51 = vadd.f32 %v3304_v36, %v917_v5  ;;  %v935_v12 = vmul.f32 %v3306_v21, %v933_v59  ;;  %v3308_v15 = vpop.eup %3307  ;;  %vm940_vm14 = vweird.f32 %v3306_v21 }
 0x2fc   :  { %v903_v46 = vsel %vm902_vm7, %v3302_v55, %v899_v61  ;;  %vm941_vm1 = vmor %vm939_vm15, %vm940_vm14  ;;  %v7525_v61 = vld [vmem:[#allocation20_spill] sm:$0xff] }
 0x2fd   :  { %v908_v1 = vsel %vm905_vm9, %v907_v56, %v903_v46  ;;  %v922_v2 = vsel %vm921_vm8, %v3304_v36, %v918_v51  ;;  %v936_v47 = vsub.f32 1.0, %v935_v12  ;;  %v7526_v56 = vld [vmem:[#allocation13_spill] sm:$0xff]  ;;  %v7527_v51 = vld [vmem:[#allocation30_spill] sm:$0xff]  ;;  %v7528_v12 = vld [vmem:[#allocation7_spill] sm:$0xff] }
 0x2fe   :  { %v927_v52 = vsel %vm924_vm11, %v926_v48, %v922_v2  ;;  %v950_v34 = vmul.f32 %v3308_v15, %v908_v1  ;;  %v943_v2 = vand.u32 2147483647, %v933_v59  ;;  %v7523_v59 = vld [vmem:[#allocation25_spill] sm:$0xff]  ;;  %v7529_v48 = vld [vmem:[#allocation18_spill] sm:$0xff]  ;;  %v7530_v46 = vld [vmem:[#allocation19_spill] sm:$0xff] }
 0x2ff   :  { %v949_v3 = vmul.f32 %v927_v52, %v4943_v9  ;;  %v937_v60 = vmul.f32 %v3306_v21, %v936_v47  ;;  %v946_v52 = vor.u32 1.1754944e-38, %v945_v40  ;;  %v7531_v15 = vld [vmem:[#allocation11_spill] sm:$0xff]  ;;  %v7532_v1 = vld [vmem:[#allocation24_spill] sm:$0xff]  ;;  %v7533_v47 = vld [vmem:[#allocation14_spill] sm:$0xff] }
 0x300   :  { %vm944_vm2 = vcmp.eq.f32.partialorder %v943_v2, 8.507059e+37  ;;  %v7538_v40 = vld [vmem:[#allocation22_spill] sm:$0xff] }
 0x301   :  { %v951_v41 = vadd.f32 %v950_v34, %v949_v3  ;;  %v938_v29 = vadd.f32 %v3306_v21, %v937_v60  ;;  %v7534_v3 = vld [vmem:[#allocation28_spill] sm:$0xff]  ;;  %v7535_v60 = vld [vmem:[#allocation31_spill] sm:$0xff]  ;;  %v7539_v2 = vld [vmem:[#allocation34_spill] sm:$0xff] }
 0x303   :  { %3309 = vtanh.f32 %v951_v41  ;;  %v5103_v44 = vsel %vm959_vm13, %v951_v41, %v4943_v9  ;;  %v942_v55 = vsel %vm941_vm1, %v3306_v21, %v938_v29  ;;  %v7522_v9 = vld [vmem:[#allocation6_spill] sm:$0xff]  ;;  %v7524_v21 = vld [vmem:[#allocation16_spill] sm:$0xff]  ;;  %v7537_v29 = vld [vmem:[#allocation21_spill] sm:$0xff] }
 0x304   :  { %v947_v5 = vsel %vm944_vm2, %v946_v52, %v942_v55  ;;  %v7536_v41 = vld [vmem:[#allocation8_spill] sm:$0xff]  ;;  %v7540_v55 = vld [vmem:[#allocation27_spill] sm:$0xff] }
 0x305   :  { %v7541_v52 = vld [vmem:[#allocation15_spill] sm:$0xff] }
 0x309   :  { %v3310_v36 = vpop.eup %3309 }
 0x30a   :  { %v953_v34 = vmul.f32 %v3310_v36, %v947_v5  ;;  %v7542_v36 = vld [vmem:[#allocation36_spill] sm:$0xff]  ;;  %v7543_v5 = vld [vmem:[#allocation33_spill] sm:$0xff] }
 0x30c   :  { %v5108_v32 = vsel %vm959_vm13, %v953_v34, %v4948_v30  ;;  %v7544_v34 = vld [vmem:[#allocation9_spill] sm:$0xff]  ;;  %v7546_v30 = vld [vmem:[#allocation26_spill] sm:$0xff] }
 0x30d   :  { %979 = vmatmul.f32.vlgmr.msrb.gmra.mxu0 %v5108_v32  ;;  %999 = vmatmul.f32.vlgmr.msra.gmra.mxu1 %v5108_v32 }
 0x30e   :  { %1019 = vmatmul.f32.vlgmr.msra.gmra.mxu2 %v5108_v32  ;;  %1039 = vmatmul.f32.vlgmr.msrb.gmra.mxu3 %v5108_v32 }
 0x30f   :  { %1275 = vmatpush.msrb.mxu0 %v4612_v27  ;;  %1295 = vmatpush.msra.mxu1 %v4618_v8 }
 0x310   :  { %1315 = vmatpush.msra.mxu2 %v4624_v62  ;;  %1335 = vmatpush.msrb.mxu3 %v4630_v24 }
 0x311   :  { %1276 = vmatpush.msrb.mxu0 %v4636_v28  ;;  %1296 = vmatpush.msra.mxu1 %v4642_v38 }
 0x312   :  { %1316 = vmatpush.msra.mxu2 %v4648_v42  ;;  %1336 = vmatpush.msrb.mxu3 %v4654_v43 }
 0x313   :  { %1277 = vmatpush.msrb.mxu0 %v4660_v49  ;;  %1297 = vmatpush.msra.mxu1 %v4666_v50 }
 0x314   :  { %1317 = vmatpush.msra.mxu2 %v4672_v53  ;;  %1337 = vmatpush.msrb.mxu3 %v4678_v54 }
 0x315   :  { %1278 = vmatpush.msrb.mxu0 %v4684_v57  ;;  %1298 = vmatpush.msra.mxu1 %v4690_v58 }
 0x316   :  { %1318 = vmatpush.msra.mxu2 %v4696_v63  ;;  %1338 = vmatpush.msrb.mxu3 %v4702_v0 }
 0x317   :  { %1279 = vmatpush.msrb.mxu0 %v4708_v4  ;;  %1299 = vmatpush.msra.mxu1 %v4714_v7 }
 0x318   :  { %1319 = vmatpush.msra.mxu2 %v4720_v10  ;;  %1339 = vmatpush.msrb.mxu3 %v4726_v13 }
 0x319   :  { %1280 = vmatpush.msrb.mxu0 %v4732_v14  ;;  %1300 = vmatpush.msra.mxu1 %v4738_v16 }
 0x31a   :  { %1320 = vmatpush.msra.mxu2 %v4744_v18  ;;  %1340 = vmatpush.msrb.mxu3 %v4750_v19 }
 0x31b   :  { %1281 = vmatpush.msrb.mxu0 %v4756_v25  ;;  %1301 = vmatpush.msra.mxu1 %v4762_v31 }
 0x31c   :  { %1321 = vmatpush.msra.mxu2 %v4768_v17  ;;  %1341 = vmatpush.msrb.mxu3 %v4774_v22 }
 0x31d   :  { %1282 = vmatpush.msrb.mxu0 %v4780_v20  ;;  %1302 = vmatpush.msra.mxu1 %v4786_v11 }
 0x31e   :  { %1322 = vmatpush.msra.mxu2 %v4792_v33  ;;  %1342 = vmatpush.msrb.mxu3 %v4798_v6 }
 0x31f   :  { %1283 = vmatpush.msrb.mxu0 %v4804_v23  ;;  %1303 = vmatpush.msra.mxu1 %v4810_v35 }
 0x320   :  { %1323 = vmatpush.msra.mxu2 %v4991_v37  ;;  %1343 = vmatpush.msrb.mxu3 %v4817_v45 }
 0x321   :  { %1284 = vmatpush.msrb.mxu0 %v4823_v26  ;;  %1304 = vmatpush.msra.mxu1 %v7522_v9 }
 0x322   :  { %1324 = vmatpush.msra.mxu2 %v7523_v59  ;;  %1344 = vmatpush.msrb.mxu3 %v7524_v21 }
 0x323   :  { %1285 = vmatpush.msrb.mxu0 %v7525_v61  ;;  %1305 = vmatpush.msra.mxu1 %v7526_v56 }
 0x324   :  { %1325 = vmatpush.msra.mxu2 %v7527_v51  ;;  %1345 = vmatpush.msrb.mxu3 %v7528_v12 }
 0x325   :  { %1286 = vmatpush.msrb.mxu0 %v7529_v48  ;;  %1306 = vmatpush.msra.mxu1 %v7530_v46  ;;  %v7554_v46 = vld [vmem:[#allocation43_spill] sm:$0xff] }
 0x326   :  { %1326 = vmatpush.msra.mxu2 %v7531_v15  ;;  %1346 = vmatpush.msrb.mxu3 %v7532_v1 }
 0x327   :  { %1287 = vmatpush.msrb.mxu0 %v7533_v47  ;;  %1307 = vmatpush.msra.mxu1 %v7534_v3  ;;  %v7552_v3 = vld [vmem:[#allocation47_spill] sm:$0xff] }
 0x328   :  { %1327 = vmatpush.msra.mxu2 %v7535_v60  ;;  %1347 = vmatpush.msrb.mxu3 %v7536_v41  ;;  %v7547_v41 = vld [vmem:[#allocation38_spill] sm:$0xff] }
 0x329   :  { %1288 = vmatpush.msrb.mxu0 %v7537_v29  ;;  %1308 = vmatpush.msra.mxu1 %v7538_v40  ;;  %v7548_v29 = vld [vmem:[#allocation29_spill] sm:$0xff]  ;;  %v7549_v40 = vld [vmem:[#allocation50_spill] sm:$0xff] }
 0x32a   :  { %1328 = vmatpush.msra.mxu2 %v7539_v2  ;;  %1348 = vmatpush.msrb.mxu3 %v7540_v55  ;;  %v7550_v2 = vld [vmem:[#allocation48_spill] sm:$0xff]  ;;  %v7551_v55 = vld [vmem:[#allocation58_spill] sm:$0xff] }
 0x32b   :  { %1289 = vmatpush.msrb.mxu0 %v7541_v52  ;;  %1309 = vmatpush.msra.mxu1 %v7542_v36  ;;  %v141_v60 = vadd.f32 %v7550_v2, %v7549_v40  ;;  %v182_v52 = vadd.f32 %v7552_v3, %v7551_v55 }
 0x32c   :  { %1329 = vmatpush.msra.mxu2 %v7543_v5  ;;  %1349 = vmatpush.msrb.mxu3 %v7544_v34 }
 0x32d   :  { %1290 = vmatpush.msrb.mxu0 %v7545_v39  ;;  %1310 = vmatpush.msra.mxu1 %v7546_v30  ;;  %v7553_v39 = vld [vmem:[#allocation56_spill] sm:$0xff] }
 0x32e   :  { %1330 = vmatpush.msra.mxu2 %v7547_v41  ;;  %1350 = vmatpush.msrb.mxu3 %v7548_v29  ;;  %v264_v30 = vadd.f32 %v7554_v46, %v7553_v39 }
 0x33f   :  { %v5186_v21 = vpop.permute.xlu2 %1113 }
 0x340   :  { %7557 = vst [vmem:[#allocation40_spill] sm:$0xff] %v5186_v21  ;;  %vm1115_vm14 = vcmp.eq.s32.totalorder %v5186_v21, 1 }
 0x38a   :  { %v980_v47 = vpop.f32.mrf.mxu0  ;;  %v1000_v36 = vpop.f32.mrf.mxu1 }
 0x38b   :  { %v1043_v1 = vadd.f32 %v980_v47, %v141_v60  ;;  %v1044_v5 = vadd.f32 %v1000_v36, %v182_v52  ;;  %v7555_v60 = vld [vmem:[#allocation61_spill] sm:$0xff] }
 0x38d   :  { %v3181_v15 = vmul.f32 -1.442695, %v1043_v1  ;;  %v3182_v34 = vmul.f32 -1.442695, %v1044_v5  ;;  %v7556_v1 = vld [vmem:[#allocation51_spill] sm:$0xff] }
 0x38e   :  { %v223_v52 = vadd.f32 %v7556_v1, %v7555_v60 }
 0x38f   :  { %3311 = vpow2.f32 %v3181_v15 }
 0x390   :  { %3313 = vpow2.f32 %v3182_v34 }
 0x391   :  { %v1040_v41 = vpop.f32.mrf.mxu3  ;;  %v1020_v3 = vpop.f32.mrf.mxu2 }
 0x392   :  { %v1046_v48 = vadd.f32 %v1040_v41, %v264_v30  ;;  %v1045_v5 = vadd.f32 %v1020_v3, %v223_v52 }
 0x394   :  { %v3183_v29 = vmul.f32 -1.442695, %v1046_v48 }
 0x395   :  { %v3312_v12 = vpop.eup %3311 }
 0x396   :  { %v3314_v51 = vpop.eup %3313  ;;  %v1050_v2 = vadd.f32 1.0, %v3312_v12  ;;  %3315 = vpow2.f32 %v3183_v29 }
 0x397   :  { %v1069_v40 = vadd.f32 1.0, %v3314_v51 }
 0x398   :  { %3317 = vrcp.f32 %v1050_v2  ;;  %v1062_v39 = vand.u32 2147483648, %v1050_v2  ;;  %v1060_v51 = vand.u32 2147483647, %v1050_v2  ;;  %vm1056_vm5 = vweird.f32 %v1050_v2 }
 0x399   :  { %3319 = vrcp.f32 %v1069_v40  ;;  %v1081_v29 = vand.u32 2147483648, %v1069_v40  ;;  %v1079_v56 = vand.u32 2147483647, %v1069_v40  ;;  %vm1075_vm7 = vweird.f32 %v1069_v40 }
 0x39a   :  { %v1063_v3 = vor.u32 1.1754944e-38, %v1062_v39  ;;  %vm1061_vm8 = vcmp.eq.f32.partialorder %v1060_v51, 8.507059e+37 }
 0x39b   :  { %vm1080_vm11 = vcmp.eq.f32.partialorder %v1079_v56, 8.507059e+37 }
 0x39c   :  { %v3316_v47 = vpop.eup %3315 }
 0x39d   :  { %v1089_v15 = vadd.f32 1.0, %v3316_v47 }
 0x39e   :  { %v3318_v36 = vpop.eup %3317 }
 0x39f   :  { %v3320_v46 = vpop.eup %3319  ;;  %v1052_v34 = vmul.f32 %v3318_v36, %v1050_v2  ;;  %3321 = vrcp.f32 %v1089_v15  ;;  %vm1057_vm3 = vweird.f32 %v3318_v36  ;;  %vm1095_vm1 = vweird.f32 %v1089_v15 }
 0x3a0   :  { %v1071_v30 = vmul.f32 %v3320_v46, %v1069_v40  ;;  %3323 = vtanh.f32 %v1045_v5  ;;  %vm1076_vm4 = vweird.f32 %v3320_v46  ;;  %vm1058_vm6 = vmor %vm1056_vm5, %vm1057_vm3 }
 0x3a1   :  { %v1053_v48 = vsub.f32 1.0, %v1052_v34  ;;  %vm1077_vm9 = vmor %vm1075_vm7, %vm1076_vm4  ;;  %v1082_v34 = vor.u32 1.1754944e-38, %v1081_v29 }
 0x3a2   :  { %v1072_v41 = vsub.f32 1.0, %v1071_v30 }
 0x3a3   :  { %v1054_v12 = vmul.f32 %v3318_v36, %v1053_v48 }
 0x3a4   :  { %v1073_v55 = vmul.f32 %v3320_v46, %v1072_v41 }
 0x3a5   :  { %v3322_v61 = vpop.eup %3321  ;;  %v1055_v1 = vadd.f32 %v3318_v36, %v1054_v12 }
 0x3a6   :  { %v1091_v47 = vmul.f32 %v3322_v61, %v1089_v15  ;;  %v1074_v52 = vadd.f32 %v3320_v46, %v1073_v55  ;;  %v3324_v5 = vpop.eup %3323  ;;  %vm1096_vm15 = vweird.f32 %v3322_v61  ;;  %v1101_v55 = vand.u32 2147483648, %v1089_v15 }
 0x3a7   :  { %v1059_v60 = vsel %vm1058_vm6, %v3318_v36, %v1055_v1  ;;  %v1099_v36 = vand.u32 2147483647, %v1089_v15  ;;  %vm1097_vm2 = vmor %vm1095_vm1, %vm1096_vm15  ;;  %v7589_v15 = vld [vmem:[#allocation56_spill] sm:$0xff]  ;;  %v7590_v1 = vld [vmem:[#allocation46_spill] sm:$0xff] }
 0x3a8   :  { %v1064_v30 = vsel %vm1061_vm8, %v1063_v3, %v1059_v60  ;;  %v1092_v48 = vsub.f32 1.0, %v1091_v47  ;;  %v1078_v41 = vsel %vm1077_vm9, %v3320_v46, %v1074_v52  ;;  %v1102_v46 = vor.u32 1.1754944e-38, %v1101_v55 }
 0x3a9   :  { %v1106_v59 = vmul.f32 %v3324_v5, %v1064_v30  ;;  %v1083_v9 = vsel %vm1080_vm11, %v1082_v34, %v1078_v41  ;;  %vm1100_vm3 = vcmp.eq.f32.partialorder %v1099_v36, 8.507059e+37  ;;  %v267_v3 = vadd.f32 %v7590_v1, %v7589_v15  ;;  %v1657_v1 = vld [vmem:[%s7070_s5 + $0x1f8] sm:$0xff] }
 0x3aa   :  { %v1093_v12 = vmul.f32 %v3322_v61, %v1092_v48  ;;  %v1105_v2 = vmul.f32 %v1083_v9, %v5103_v44 }
 0x3ac   :  { %v1107_v39 = vadd.f32 %v1106_v59, %v1105_v2  ;;  %v1094_v40 = vadd.f32 %v3322_v61, %v1093_v12 }
 0x3ae   :  { %3325 = vtanh.f32 %v1107_v39  ;;  %v5193_v60 = vsel %vm1115_vm14, %v1107_v39, %v5103_v44  ;;  %v1098_v56 = vsel %vm1097_vm2, %v3322_v61, %v1094_v40  ;;  %v7591_v39 = vld [vmem:[#allocation61_spill] sm:$0xff]  ;;  %v7592_v40 = vld [vmem:[#allocation55_spill] sm:$0xff] }
 0x3af   :  { %v1103_v9 = vsel %vm1100_vm3, %v1102_v46, %v1098_v56  ;;  %v226_v55 = vadd.f32 %v7592_v40, %v7591_v39  ;;  %v1644_v40 = vld [vmem:[%s7070_s5 + $0x190] sm:$0xff] }
 0x3b4   :  { %v3326_v51 = vpop.eup %3325 }
 0x3b5   :  { %v1109_v29 = vmul.f32 %v3326_v51, %v1103_v9 }
 0x3b7   :  { %v5198_v59 = vsel %vm1115_vm14, %v1109_v29, %v5108_v32 }
 0x3b8   :  { %1135 = vmatmul.f32.vlgmr.msra.gmra.mxu0 %v5198_v59  ;;  %1155 = vmatmul.f32.vlgmr.msrb.gmra.mxu1 %v5198_v59 }
 0x3b9   :  { %1175 = vmatmul.f32.vlgmr.msrb.gmra.mxu2 %v5198_v59  ;;  %1195 = vmatmul.f32.vlgmr.msra.gmra.mxu3 %v5198_v59 }
 0x3ba   :  { %1431 = vmatpush.msra.mxu0 %v4612_v27  ;;  %1451 = vmatpush.msrb.mxu1 %v4618_v8  ;;  %v7558_v27 = vld [vmem:[#allocation6_spill] sm:$0xff]  ;;  %v7559_v8 = vld [vmem:[#allocation25_spill] sm:$0xff] }
 0x3bb   :  { %1471 = vmatpush.msrb.mxu2 %v4624_v62  ;;  %1491 = vmatpush.msra.mxu3 %v4630_v24  ;;  %v7560_v62 = vld [vmem:[#allocation16_spill] sm:$0xff] }
 0x3bc   :  { %1432 = vmatpush.msra.mxu0 %v4636_v28  ;;  %1452 = vmatpush.msrb.mxu1 %v4642_v38  ;;  %v7561_v24 = vld [vmem:[#allocation20_spill] sm:$0xff]  ;;  %v7562_v28 = vld [vmem:[#allocation13_spill] sm:$0xff]  ;;  %v7563_v38 = vld [vmem:[#allocation30_spill] sm:$0xff] }
 0x3bd   :  { %1472 = vmatpush.msrb.mxu2 %v4648_v42  ;;  %1492 = vmatpush.msra.mxu3 %v4654_v43  ;;  %v7564_v42 = vld [vmem:[#allocation7_spill] sm:$0xff]  ;;  %v7565_v43 = vld [vmem:[#allocation18_spill] sm:$0xff] }
 0x3be   :  { %1433 = vmatpush.msra.mxu0 %v4660_v49  ;;  %1453 = vmatpush.msrb.mxu1 %v4666_v50  ;;  %v7566_v49 = vld [vmem:[#allocation19_spill] sm:$0xff] }
 0x3bf   :  { %1473 = vmatpush.msrb.mxu2 %v4672_v53  ;;  %1493 = vmatpush.msra.mxu3 %v4678_v54  ;;  %v7567_v50 = vld [vmem:[#allocation11_spill] sm:$0xff]  ;;  %v7568_v53 = vld [vmem:[#allocation24_spill] sm:$0xff]  ;;  %v7569_v54 = vld [vmem:[#allocation14_spill] sm:$0xff] }
 0x3c0   :  { %1434 = vmatpush.msra.mxu0 %v4684_v57  ;;  %1454 = vmatpush.msrb.mxu1 %v4690_v58  ;;  %v7570_v57 = vld [vmem:[#allocation28_spill] sm:$0xff]  ;;  %v7571_v58 = vld [vmem:[#allocation31_spill] sm:$0xff] }
 0x3c1   :  { %1474 = vmatpush.msrb.mxu2 %v4696_v63  ;;  %1494 = vmatpush.msra.mxu3 %v4702_v0  ;;  %v7572_v63 = vld [vmem:[#allocation8_spill] sm:$0xff]  ;;  %v7573_v0 = vld [vmem:[#allocation21_spill] sm:$0xff] }
 0x3c2   :  { %1435 = vmatpush.msra.mxu0 %v4708_v4  ;;  %1455 = vmatpush.msrb.mxu1 %v4714_v7  ;;  %v7574_v4 = vld [vmem:[#allocation22_spill] sm:$0xff] }
 0x3c3   :  { %1475 = vmatpush.msrb.mxu2 %v4720_v10  ;;  %1495 = vmatpush.msra.mxu3 %v4726_v13  ;;  %v7575_v7 = vld [vmem:[#allocation34_spill] sm:$0xff]  ;;  %v7576_v10 = vld [vmem:[#allocation27_spill] sm:$0xff] }
 0x3c4   :  { %1436 = vmatpush.msra.mxu0 %v4732_v14  ;;  %1456 = vmatpush.msrb.mxu1 %v4738_v16  ;;  %v7577_v13 = vld [vmem:[#allocation15_spill] sm:$0xff]  ;;  %v7578_v14 = vld [vmem:[#allocation36_spill] sm:$0xff]  ;;  %v7579_v16 = vld [vmem:[#allocation33_spill] sm:$0xff] }
 0x3c5   :  { %1476 = vmatpush.msrb.mxu2 %v4744_v18  ;;  %1496 = vmatpush.msra.mxu3 %v4750_v19  ;;  %v7580_v18 = vld [vmem:[#allocation9_spill] sm:$0xff]  ;;  %v7581_v19 = vld [vmem:[#allocation23_spill] sm:$0xff] }
 0x3c6   :  { %1437 = vmatpush.msra.mxu0 %v4756_v25  ;;  %1457 = vmatpush.msrb.mxu1 %v4762_v31  ;;  %v7582_v25 = vld [vmem:[#allocation26_spill] sm:$0xff] }
 0x3c7   :  { %1477 = vmatpush.msrb.mxu2 %v4768_v17  ;;  %1497 = vmatpush.msra.mxu3 %v4774_v22  ;;  %v7583_v31 = vld [vmem:[#allocation38_spill] sm:$0xff]  ;;  %v7584_v17 = vld [vmem:[#allocation29_spill] sm:$0xff] }
 0x3c8   :  { %1438 = vmatpush.msra.mxu0 %v4780_v20  ;;  %1458 = vmatpush.msrb.mxu1 %v4786_v11  ;;  %v7585_v22 = vld [vmem:[#allocation50_spill] sm:$0xff]  ;;  %v7586_v20 = vld [vmem:[#allocation4_spill] sm:$0xff] }
 0x3c9   :  { %1478 = vmatpush.msrb.mxu2 %v4792_v33  ;;  %1498 = vmatpush.msra.mxu3 %v4798_v6  ;;  %v144_v11 = vadd.f32 %v7586_v20, %v7585_v22  ;;  %v7587_v33 = vld [vmem:[#allocation58_spill] sm:$0xff]  ;;  %v7588_v6 = vld [vmem:[#allocation52_spill] sm:$0xff] }
 0x3ca   :  { %1439 = vmatpush.msra.mxu0 %v4804_v23  ;;  %1459 = vmatpush.msrb.mxu1 %v4810_v35  ;;  %v185_v23 = vadd.f32 %v7588_v6, %v7587_v33 }
 0x3cb   :  { %1479 = vmatpush.msrb.mxu2 %v4991_v37  ;;  %1499 = vmatpush.msra.mxu3 %v4817_v45 }
 0x3cc   :  { %1440 = vmatpush.msra.mxu0 %v4823_v26  ;;  %1460 = vmatpush.msrb.mxu1 %v7558_v27 }
 0x3cd   :  { %1480 = vmatpush.msrb.mxu2 %v7559_v8  ;;  %1500 = vmatpush.msra.mxu3 %v7560_v62 }
 0x3ce   :  { %1441 = vmatpush.msra.mxu0 %v7561_v24  ;;  %1461 = vmatpush.msrb.mxu1 %v7562_v28 }
 0x3cf   :  { %1481 = vmatpush.msrb.mxu2 %v7563_v38  ;;  %1501 = vmatpush.msra.mxu3 %v7564_v42 }
 0x3d0   :  { %1442 = vmatpush.msra.mxu0 %v7565_v43  ;;  %1462 = vmatpush.msrb.mxu1 %v7566_v49 }
 0x3d1   :  { %1482 = vmatpush.msrb.mxu2 %v7567_v50  ;;  %1502 = vmatpush.msra.mxu3 %v7568_v53 }
 0x3d2   :  { %1443 = vmatpush.msra.mxu0 %v7569_v54  ;;  %1463 = vmatpush.msrb.mxu1 %v7570_v57 }
 0x3d3   :  { %1483 = vmatpush.msrb.mxu2 %v7571_v58  ;;  %1503 = vmatpush.msra.mxu3 %v7572_v63 }
 0x3d4   :  { %1444 = vmatpush.msra.mxu0 %v7573_v0  ;;  %1464 = vmatpush.msrb.mxu1 %v7574_v4 }
 0x3d5   :  { %1484 = vmatpush.msrb.mxu2 %v7575_v7  ;;  %1504 = vmatpush.msra.mxu3 %v7576_v10 }
 0x3d6   :  { %1445 = vmatpush.msra.mxu0 %v7577_v13  ;;  %1465 = vmatpush.msrb.mxu1 %v7578_v14 }
 0x3d7   :  { %1485 = vmatpush.msrb.mxu2 %v7579_v16  ;;  %1505 = vmatpush.msra.mxu3 %v7580_v18  ;;  %v5276_v16 = vpop.permute.xlu2 %1269 }
 0x3d8   :  { %1446 = vmatpush.msra.mxu0 %v7581_v19  ;;  %1466 = vmatpush.msrb.mxu1 %v7582_v25  ;;  %7593 = vst [vmem:[#allocation35_spill] sm:$0xff] %v5276_v16  ;;  %vm1271_vm1 = vcmp.eq.s32.totalorder %v5276_v16, 1  ;;  %v5915_v16 = vld [vmem:[%s7071_s6 + $0x58] sm:$0xff] }
 0x3d9   :  { %1486 = vmatpush.msrb.mxu2 %v7583_v31  ;;  %1506 = vmatpush.msra.mxu3 %v7584_v17  ;;  %7629 = vst [vmem:[#allocation21_spill] sm:$0xff] %v5915_v16 }
 0x435   :  { %v1136_v35 = vpop.f32.mrf.mxu0  ;;  %v1156_v45 = vpop.f32.mrf.mxu1 }
 0x436   :  { %v1199_v26 = vadd.f32 %v1136_v35, %v144_v11  ;;  %v1200_v37 = vadd.f32 %v1156_v45, %v185_v23 }
 0x438   :  { %v3184_v44 = vmul.f32 -1.442695, %v1199_v26  ;;  %v3185_v61 = vmul.f32 -1.442695, %v1200_v37 }
 0x43a   :  { %3327 = vpow2.f32 %v3184_v44  ;;  %v1655_v44 = vld [vmem:[%s7070_s5 + $0x1e8] sm:$0xff] }
 0x43b   :  { %3329 = vpow2.f32 %v3185_v61  ;;  %v1656_v61 = vld [vmem:[%s7070_s5 + $0x1f0] sm:$0xff] }
 0x43c   :  { %v1196_v47 = vpop.f32.mrf.mxu3  ;;  %v1176_v12 = vpop.f32.mrf.mxu2 }
 0x43d   :  { %v1202_v52 = vadd.f32 %v1196_v47, %v267_v3  ;;  %v1201_v46 = vadd.f32 %v1176_v12, %v226_v55  ;;  %v1650_v3 = vld [vmem:[%s7070_s5 + $0x1c0] sm:$0xff]  ;;  %v1651_v47 = vld [vmem:[%s7070_s5 + $0x1c8] sm:$0xff]  ;;  %v1645_v55 = vld [vmem:[%s7070_s5 + $0x198] sm:$0xff] }
 0x43e   :  { %v1642_v12 = vld [vmem:[%s7070_s5 + $0x180] sm:$0xff] }
 0x43f   :  { %v3186_v34 = vmul.f32 -1.442695, %v1202_v52  ;;  %v1652_v52 = vld [vmem:[%s7070_s5 + $0x1d0] sm:$0xff] }
 0x440   :  { %v3328_v5 = vpop.eup %3327 }
 0x441   :  { %v3330_v30 = vpop.eup %3329  ;;  %v1206_v48 = vadd.f32 1.0, %v3328_v5  ;;  %3331 = vpow2.f32 %v3186_v34  ;;  %v1653_v34 = vld [vmem:[%s7070_s5 + $0x1d8] sm:$0xff]  ;;  %v1646_v5 = vld [vmem:[%s7070_s5 + $0x1a0] sm:$0xff] }
 0x442   :  { %v1225_v41 = vadd.f32 1.0, %v3330_v30  ;;  %v1647_v30 = vld [vmem:[%s7070_s5 + $0x1a8] sm:$0xff] }
 0x443   :  { %3333 = vrcp.f32 %v1206_v48  ;;  %v1218_v62 = vand.u32 2147483648, %v1206_v48  ;;  %v1216_v38 = vand.u32 2147483647, %v1206_v48  ;;  %vm1212_vm6 = vweird.f32 %v1206_v48 }
 0x444   :  { %3335 = vrcp.f32 %v1225_v41  ;;  %v1237_v24 = vand.u32 2147483648, %v1225_v41  ;;  %v1235_v43 = vand.u32 2147483647, %v1225_v41  ;;  %vm1231_vm7 = vweird.f32 %v1225_v41 }
 0x445   :  { %v1219_v53 = vor.u32 1.1754944e-38, %v1218_v62  ;;  %vm1217_vm11 = vcmp.eq.f32.partialorder %v1216_v38, 8.507059e+37 }
 0x446   :  { %v1238_v58 = vor.u32 1.1754944e-38, %v1237_v24  ;;  %vm1236_vm15 = vcmp.eq.f32.partialorder %v1235_v43, 8.507059e+37  ;;  %v1641_v24 = vld [vmem:[%s7070_s5 + $0x178] sm:$0xff]  ;;  %v1635_v43 = vld [vmem:[%s7070_s5 + $0x148] sm:$0xff] }
 0x447   :  { %v3332_v2 = vpop.eup %3331 }
 0x448   :  { %v1245_v36 = vadd.f32 1.0, %v3332_v2  ;;  %v1643_v2 = vld [vmem:[%s7070_s5 + $0x188] sm:$0xff] }
 0x449   :  { %v3334_v56 = vpop.eup %3333 }
 0x44a   :  { %v3336_v51 = vpop.eup %3335  ;;  %v1208_v9 = vmul.f32 %v3334_v56, %v1206_v48  ;;  %3337 = vrcp.f32 %v1245_v36  ;;  %vm1213_vm4 = vweird.f32 %v3334_v56  ;;  %v1257_v17 = vand.u32 2147483648, %v1245_v36  ;;  %v1648_v48 = vld [vmem:[%s7070_s5 + $0x1b0] sm:$0xff] }
 0x44b   :  { %v1227_v29 = vmul.f32 %v3336_v51, %v1225_v41  ;;  %3339 = vtanh.f32 %v1201_v46  ;;  %vm1232_vm5 = vweird.f32 %v3336_v51  ;;  %vm1214_vm8 = vmor %vm1212_vm6, %vm1213_vm4  ;;  %vm1251_vm3 = vweird.f32 %v1245_v36  ;;  %v1649_v41 = vld [vmem:[%s7070_s5 + $0x1b8] sm:$0xff] }
 0x44c   :  { %v1209_v27 = vsub.f32 1.0, %v1208_v9  ;;  %vm1233_vm9 = vmor %vm1231_vm7, %vm1232_vm5  ;;  %v1255_v11 = vand.u32 2147483647, %v1245_v36  ;;  %v1258_v23 = vor.u32 1.1754944e-38, %v1257_v17  ;;  %v7595_v46 = vld [vmem:[#allocation54_spill] sm:$0xff]  ;;  %v1638_v9 = vld [vmem:[%s7070_s5 + $0x160] sm:$0xff] }
 0x44d   :  { %v1228_v8 = vsub.f32 1.0, %v1227_v29  ;;  %v1639_v29 = vld [vmem:[%s7070_s5 + $0x168] sm:$0xff]  ;;  %v1624_v17 = vld [vmem:[%s7070_s5 + $0xf0] sm:$0xff] }
 0x44e   :  { %v1210_v28 = vmul.f32 %v3334_v56, %v1209_v27  ;;  %vm1256_vm5 = vcmp.eq.f32.partialorder %v1255_v11, 8.507059e+37  ;;  %v1640_v27 = vld [vmem:[%s7070_s5 + $0x170] sm:$0xff] }
 0x44f   :  { %v1229_v42 = vmul.f32 %v3336_v51, %v1228_v8 }
 0x450   :  { %v3338_v49 = vpop.eup %3337  ;;  %v1211_v50 = vadd.f32 %v3334_v56, %v1210_v28 }
 0x451   :  { %v1230_v54 = vadd.f32 %v3336_v51, %v1229_v42  ;;  %v1247_v57 = vmul.f32 %v3338_v49, %v1245_v36  ;;  %v3340_v0 = vpop.eup %3339  ;;  %vm1252_vm2 = vweird.f32 %v3338_v49  ;;  %v7594_v36 = vld [vmem:[#allocation5_spill] sm:$0xff]  ;;  %v1634_v42 = vld [vmem:[%s7070_s5 + $0x140] sm:$0xff] }
 0x452   :  { %v1215_v63 = vsel %vm1214_vm8, %v3334_v56, %v1211_v50  ;;  %vm1253_vm4 = vmor %vm1251_vm3, %vm1252_vm2  ;;  %v147_v56 = vadd.f32 %v7594_v36, %v7585_v22  ;;  %v1637_v50 = vld [vmem:[%s7070_s5 + $0x158] sm:$0xff] }
 0x453   :  { %v1220_v4 = vsel %vm1217_vm11, %v1219_v53, %v1215_v63  ;;  %v1234_v7 = vsel %vm1233_vm9, %v3336_v51, %v1230_v54  ;;  %v1248_v10 = vsub.f32 1.0, %v1247_v57  ;;  %v188_v51 = vadd.f32 %v7595_v46, %v7587_v33  ;;  %v1630_v57 = vld [vmem:[%s7070_s5 + $0x120] sm:$0xff]  ;;  %v1632_v63 = vld [vmem:[%s7070_s5 + $0x130] sm:$0xff]  ;;  %v1609_v36 = vld [vmem:[%s7070_s5 + $0x78] sm:$0xff] }
 0x454   :  { %v1239_v13 = vsel %vm1236_vm15, %v1238_v58, %v1234_v7  ;;  %v1262_v14 = vmul.f32 %v3340_v0, %v1220_v4  ;;  %v1631_v58 = vld [vmem:[%s7070_s5 + $0x128] sm:$0xff]  ;;  %v1633_v0 = vld [vmem:[%s7070_s5 + $0x138] sm:$0xff]  ;;  %v1626_v4 = vld [vmem:[%s7070_s5 + $0x100] sm:$0xff] }
 0x455   :  { %v1261_v18 = vmul.f32 %v1239_v13, %v5193_v60  ;;  %v1249_v19 = vmul.f32 %v3338_v49, %v1248_v10  ;;  %v1627_v7 = vld [vmem:[%s7070_s5 + $0x108] sm:$0xff]  ;;  %v1628_v10 = vld [vmem:[%s7070_s5 + $0x110] sm:$0xff] }
 0x456   :  { %v7596_v13 = vld [vmem:[#allocation49_spill] sm:$0xff]  ;;  %v1603_v46 = vld [vmem:[%s7070_s5 + $0x48] sm:$0xff] }
 0x457   :  { %v1263_v25 = vadd.f32 %v1262_v14, %v1261_v18  ;;  %v1250_v31 = vadd.f32 %v3338_v49, %v1249_v19  ;;  %v270_v14 = vadd.f32 %v7596_v13, %v7589_v15  ;;  %v1629_v18 = vld [vmem:[%s7070_s5 + $0x118] sm:$0xff] }
 0x459   :  { %3341 = vtanh.f32 %v1263_v25  ;;  %v5283_v20 = vsel %vm1271_vm1, %v1263_v25, %v5193_v60  ;;  %v1254_v6 = vsel %vm1253_vm4, %v3338_v49, %v1250_v31  ;;  %v1654_v60 = vld [vmem:[%s7070_s5 + $0x1e0] sm:$0xff]  ;;  %v1636_v49 = vld [vmem:[%s7070_s5 + $0x150] sm:$0xff]  ;;  %v1623_v31 = vld [vmem:[%s7070_s5 + $0xe8] sm:$0xff] }
 0x45a   :  { %v1259_v45 = vsel %vm1256_vm5, %v1258_v23, %v1254_v6  ;;  %v1622_v25 = vld [vmem:[%s7070_s5 + $0xe0] sm:$0xff]  ;;  %v1625_v6 = vld [vmem:[%s7070_s5 + $0xf8] sm:$0xff] }
 0x45b   :  { %v1618_v23 = vld [vmem:[%s7070_s5 + $0xc0] sm:$0xff] }
 0x45f   :  { %v3342_v35 = vpop.eup %3341 }
 0x460   :  { %v1265_v26 = vmul.f32 %v3342_v35, %v1259_v45  ;;  %v1619_v35 = vld [vmem:[%s7070_s5 + $0xc8] sm:$0xff]  ;;  %v1620_v45 = vld [vmem:[%s7070_s5 + $0xd0] sm:$0xff] }
 0x462   :  { %v5288_v37 = vsel %vm1271_vm1, %v1265_v26, %v5198_v59 }
 0x463   :  { %1291 = vmatmul.f32.vlgmr.msrb.gmra.mxu0 %v5288_v37  ;;  %1311 = vmatmul.f32.vlgmr.msra.gmra.mxu1 %v5288_v37 }
 0x464   :  { %1331 = vmatmul.f32.vlgmr.msra.gmra.mxu2 %v5288_v37  ;;  %1351 = vmatmul.f32.vlgmr.msrb.gmra.mxu3 %v5288_v37 }
 0x465   :  { %1668 = vmatpush.msrb.mxu0 %v1654_v60  ;;  %1709 = vmatpush.msra.mxu1 %v1655_v44  ;;  %v1621_v60 = vld [vmem:[%s7070_s5 + $0xd8] sm:$0xff] }
 0x466   :  { %1750 = vmatpush.msra.mxu2 %v1656_v61  ;;  %1791 = vmatpush.msrb.mxu3 %v1657_v1  ;;  %v1614_v61 = vld [vmem:[%s7070_s5 + $0xa0] sm:$0xff]  ;;  %v1615_v1 = vld [vmem:[%s7070_s5 + $0xa8] sm:$0xff] }
 0x467   :  { %1669 = vmatpush.msrb.mxu0 %v1650_v3  ;;  %1710 = vmatpush.msra.mxu1 %v1651_v47  ;;  %v1616_v3 = vld [vmem:[%s7070_s5 + $0xb0] sm:$0xff] }
 0x468   :  { %1751 = vmatpush.msra.mxu2 %v1652_v52  ;;  %1792 = vmatpush.msrb.mxu3 %v1653_v34  ;;  %v1617_v34 = vld [vmem:[%s7070_s5 + $0xb8] sm:$0xff] }
 0x469   :  { %1670 = vmatpush.msrb.mxu0 %v1646_v5  ;;  %1711 = vmatpush.msra.mxu1 %v1647_v30  ;;  %v1610_v5 = vld [vmem:[%s7070_s5 + $0x80] sm:$0xff]  ;;  %v1611_v30 = vld [vmem:[%s7070_s5 + $0x88] sm:$0xff] }
 0x46a   :  { %1752 = vmatpush.msra.mxu2 %v1648_v48  ;;  %1793 = vmatpush.msrb.mxu3 %v1649_v41  ;;  %v1612_v41 = vld [vmem:[%s7070_s5 + $0x90] sm:$0xff] }
 0x46b   :  { %1671 = vmatpush.msrb.mxu0 %v1642_v12  ;;  %1712 = vmatpush.msra.mxu1 %v1643_v2  ;;  %v1613_v12 = vld [vmem:[%s7070_s5 + $0x98] sm:$0xff]  ;;  %v1606_v2 = vld [vmem:[%s7070_s5 + $0x60] sm:$0xff] }
 0x46c   :  { %1753 = vmatpush.msra.mxu2 %v1644_v40  ;;  %1794 = vmatpush.msrb.mxu3 %v1645_v55  ;;  %v1607_v40 = vld [vmem:[%s7070_s5 + $0x68] sm:$0xff]  ;;  %v1608_v55 = vld [vmem:[%s7070_s5 + $0x70] sm:$0xff] }
 0x46d   :  { %1672 = vmatpush.msrb.mxu0 %v1638_v9  ;;  %1713 = vmatpush.msra.mxu1 %v1639_v29  ;;  %v1604_v9 = vld [vmem:[%s7070_s5 + $0x50] sm:$0xff]  ;;  %v1605_v29 = vld [vmem:[%s7070_s5 + $0x58] sm:$0xff] }
 0x46e   :  { %1754 = vmatpush.msra.mxu2 %v1640_v27  ;;  %1795 = vmatpush.msrb.mxu3 %v1641_v24  ;;  %v1598_v27 = vld [vmem:[%s7070_s5 + $0x20] sm:$0xff] }
 0x46f   :  { %1673 = vmatpush.msrb.mxu0 %v1634_v42  ;;  %1714 = vmatpush.msra.mxu1 %v1635_v43  ;;  %v1601_v42 = vld [vmem:[%s7070_s5 + $0x38] sm:$0xff] }
 0x470   :  { %1755 = vmatpush.msra.mxu2 %v1636_v49  ;;  %1796 = vmatpush.msrb.mxu3 %v1637_v50  ;;  %v1594_v49 = vld [vmem:[%s7070_s5] sm:$0xff]  ;;  %v1595_v50 = vld [vmem:[%s7070_s5 + $0x8] sm:$0xff] }
 0x471   :  { %1674 = vmatpush.msrb.mxu0 %v1630_v57  ;;  %1715 = vmatpush.msra.mxu1 %v1631_v58  ;;  %v1596_v57 = vld [vmem:[%s7070_s5 + $0x10] sm:$0xff]  ;;  %v1597_v58 = vld [vmem:[%s7070_s5 + $0x18] sm:$0xff] }
 0x472   :  { %1756 = vmatpush.msra.mxu2 %v1632_v63  ;;  %1797 = vmatpush.msrb.mxu3 %v1633_v0 }
 0x473   :  { %1675 = vmatpush.msrb.mxu0 %v1626_v4  ;;  %1716 = vmatpush.msra.mxu1 %v1627_v7 }
 0x474   :  { %1757 = vmatpush.msra.mxu2 %v1628_v10  ;;  %1798 = vmatpush.msrb.mxu3 %v1629_v18 }
 0x475   :  { %1676 = vmatpush.msrb.mxu0 %v1622_v25  ;;  %1717 = vmatpush.msra.mxu1 %v1623_v31 }
 0x476   :  { %1758 = vmatpush.msra.mxu2 %v1624_v17  ;;  %1799 = vmatpush.msrb.mxu3 %v1625_v6 }
 0x477   :  { %1677 = vmatpush.msrb.mxu0 %v1618_v23  ;;  %1718 = vmatpush.msra.mxu1 %v1619_v35 }
 0x478   :  { %1759 = vmatpush.msra.mxu2 %v1620_v45  ;;  %1800 = vmatpush.msrb.mxu3 %v1621_v60 }
 0x479   :  { %1678 = vmatpush.msrb.mxu0 %v1614_v61  ;;  %1719 = vmatpush.msra.mxu1 %v1615_v1 }
 0x47a   :  { %1760 = vmatpush.msra.mxu2 %v1616_v3  ;;  %1801 = vmatpush.msrb.mxu3 %v1617_v34  ;;  %v5512_v34 = vpop.permute.xlu0 %1425 }
 0x47b   :  { %1679 = vmatpush.msrb.mxu0 %v1610_v5  ;;  %1720 = vmatpush.msra.mxu1 %v1611_v30  ;;  %7598 = vst [vmem:[#allocation41_spill] sm:$0xff] %v5512_v34  ;;  %vm1427_vm4 = vcmp.eq.s32.totalorder %v5512_v34, 1  ;;  %v5910_v34 = vld [vmem:[%s7071_s6 + $0x70] sm:$0xff] }
 0x47c   :  { %1761 = vmatpush.msra.mxu2 %v1612_v41  ;;  %1802 = vmatpush.msrb.mxu3 %v1613_v12  ;;  %7628 = vst [vmem:[#allocation8_spill] sm:$0xff] %v5910_v34 }
 0x47d   :  { %1680 = vmatpush.msrb.mxu0 %v1606_v2  ;;  %1721 = vmatpush.msra.mxu1 %v1607_v40 }
 0x47e   :  { %1762 = vmatpush.msra.mxu2 %v1608_v55  ;;  %1803 = vmatpush.msrb.mxu3 %v1609_v36 }
 0x47f   :  { %1722 = vmatpush.msra.mxu1 %v1603_v46 }
 0x480   :  { %1763 = vmatpush.msra.mxu2 %v1604_v9  ;;  %1804 = vmatpush.msrb.mxu3 %v1605_v29  ;;  %v7601_v29 = vld [vmem:[#allocation12_spill] sm:$0xff]  ;;  %v5922_v9 = vld [vmem:[%s7071_s6 + $0x50] sm:$0xff] }
 0x481   :  { %7630 = vst [vmem:[#allocation22_spill] sm:$0xff] %v5922_v9 }
 0x482   :  { %1805 = vmatpush.msrb.mxu3 %v1601_v42  ;;  %v5584_v42 = vld [vmem:[%s7071_s6 + $0x1a0] sm:$0xff] }
 0x483   :  { %7605 = vst [vmem:[#allocation39_spill] sm:$0xff] %v5584_v42 }
 0x484   :  { %1806 = vmatpush.msrb.mxu3 %v1597_v58  ;;  %v5659_v58 = vld [vmem:[%s7071_s6 + $0x1b0] sm:$0xff] }
 0x4e0   :  { %v1292_v8 = vpop.f32.mrf.mxu0  ;;  %v1312_v62 = vpop.f32.mrf.mxu1 }
 0x4e1   :  { %v1355_v28 = vadd.f32 %v1292_v8, %v147_v56  ;;  %v1356_v38 = vadd.f32 %v1312_v62, %v188_v51  ;;  %v1602_v56 = vld [vmem:[%s7070_s5 + $0x40] sm:$0xff] }
 0x4e2   :  { %v7597_v62 = vld [vmem:[#allocation59_spill] sm:$0xff]  ;;  %1681 = vmatpush.msrb.mxu0 %v1602_v56 }
 0x4e3   :  { %v3187_v53 = vmul.f32 -1.442695, %v1355_v28  ;;  %v3188_v54 = vmul.f32 -1.442695, %v1356_v38  ;;  %v229_v24 = vadd.f32 %v7597_v62, %v7591_v39  ;;  %v1599_v28 = vld [vmem:[%s7070_s5 + $0x28] sm:$0xff]  ;;  %v1600_v38 = vld [vmem:[%s7070_s5 + $0x30] sm:$0xff] }
 0x4e4   :  { %1682 = vmatpush.msrb.mxu0 %v1598_v27  ;;  %1723 = vmatpush.msra.mxu1 %v1599_v28  ;;  %v7602_v27 = vld [vmem:[#allocation10_spill] sm:$0xff]  ;;  %v5561_v62 = vld [vmem:[%s7071_s6 + $0x1e8] sm:$0xff] }
 0x4e5   :  { %3343 = vpow2.f32 %v3187_v53  ;;  %1764 = vmatpush.msra.mxu2 %v1600_v38  ;;  %v5573_v28 = vld [vmem:[%s7071_s6 + $0x1c8] sm:$0xff]  ;;  %v5578_v38 = vld [vmem:[%s7071_s6 + $0x1f8] sm:$0xff] }
 0x4e6   :  { %3345 = vpow2.f32 %v3188_v54  ;;  %1683 = vmatpush.msrb.mxu0 %v1594_v49  ;;  %1724 = vmatpush.msra.mxu1 %v1595_v50  ;;  %7603 = vst [vmem:[#allocation42_spill] sm:$0xff] %v5573_v28  ;;  %v5594_v49 = vld [vmem:[%s7071_s6 + $0x1d8] sm:$0xff]  ;;  %v5637_v50 = vld [vmem:[%s7071_s6 + $0x188] sm:$0xff] }
 0x4e7   :  { %v1352_v19 = vpop.f32.mrf.mxu3  ;;  %v1332_v51 = vpop.f32.mrf.mxu2  ;;  %1765 = vmatpush.msra.mxu2 %v1596_v57  ;;  %7604 = vst [vmem:[#allocation44_spill] sm:$0xff] %v5578_v38  ;;  %v5654_v57 = vld [vmem:[%s7071_s6 + $0x168] sm:$0xff] }
 0x4e8   :  { %v1358_v11 = vadd.f32 %v1352_v19, %v270_v14  ;;  %v1357_v54 = vadd.f32 %v1332_v51, %v229_v24  ;;  %v5566_v24 = vld [vmem:[%s7071_s6 + $0x1c0] sm:$0xff] }
 0x4ea   :  { %v3189_v26 = vmul.f32 -1.442695, %v1358_v11 }
 0x4eb   :  { %v3344_v44 = vpop.eup %3343 }
 0x4ec   :  { %v3346_v47 = vpop.eup %3345  ;;  %v5429_v52 = vadd.f32 1.0, %v3344_v44  ;;  %3347 = vpow2.f32 %v3189_v26 }
 0x4ed   :  { %v5440_v48 = vadd.f32 1.0, %v3346_v47 }
 0x4ee   :  { %3349 = vrcp.f32 %v5429_v52  ;;  %v1374_v13 = vand.u32 2147483648, %v5429_v52  ;;  %v1372_v19 = vand.u32 2147483647, %v5429_v52  ;;  %vm1368_vm8 = vweird.f32 %v5429_v52 }
 0x4ef   :  { %3351 = vrcp.f32 %v5440_v48  ;;  %v1393_v14 = vand.u32 2147483648, %v5440_v48  ;;  %v1391_v31 = vand.u32 2147483647, %v5440_v48  ;;  %vm1387_vm9 = vweird.f32 %v5440_v48 }
 0x4f0   :  { %v1375_v6 = vor.u32 1.1754944e-38, %v1374_v13  ;;  %vm1373_vm2 = vcmp.eq.f32.partialorder %v1372_v19, 8.507059e+37 }
 0x4f1   :  { %v1394_v45 = vor.u32 1.1754944e-38, %v1393_v14  ;;  %vm1392_vm3 = vcmp.eq.f32.partialorder %v1391_v31, 8.507059e+37  ;;  %v7609_v14 = vld [vmem:[#allocation57_spill] sm:$0xff]  ;;  %v5694_v31 = vld [vmem:[%s7071_s6 + $0x140] sm:$0xff] }
 0x4f2   :  { %v3348_v8 = vpop.eup %3347 }
 0x4f3   :  { %v5488_v43 = vadd.f32 1.0, %v3348_v8  ;;  %v5556_v8 = vld [vmem:[%s7071_s6 + $0x1e0] sm:$0xff] }
 0x4f4   :  { %v3350_v53 = vpop.eup %3349 }
 0x4f5   :  { %v3352_v63 = vpop.eup %3351  ;;  %v1364_v0 = vmul.f32 %v3350_v53, %v5429_v52  ;;  %3353 = vrcp.f32 %v5488_v43  ;;  %vm1369_vm6 = vweird.f32 %v3350_v53  ;;  %v1413_v41 = vand.u32 2147483648, %v5488_v43 }
 0x4f6   :  { %v1383_v4 = vmul.f32 %v3352_v63, %v5440_v48  ;;  %3355 = vtanh.f32 %v1357_v54  ;;  %vm1388_vm7 = vweird.f32 %v3352_v63  ;;  %vm1370_vm11 = vmor %vm1368_vm8, %vm1369_vm6  ;;  %vm1407_vm6 = vweird.f32 %v5488_v43  ;;  %v5649_v54 = vld [vmem:[%s7071_s6 + $0x160] sm:$0xff] }
 0x4f7   :  { %v1365_v7 = vsub.f32 1.0, %v1364_v0  ;;  %vm1389_vm15 = vmor %vm1387_vm9, %vm1388_vm7  ;;  %v1411_v2 = vand.u32 2147483647, %v5488_v43  ;;  %v1414_v55 = vor.u32 1.1754944e-38, %v1413_v41  ;;  %v5671_v0 = vld [vmem:[%s7071_s6 + $0x190] sm:$0xff]  ;;  %v5779_v41 = vld [vmem:[%s7071_s6 + $0xc8] sm:$0xff] }
 0x4f8   :  { %v1384_v10 = vsub.f32 1.0, %v1383_v4  ;;  %v5679_v4 = vld [vmem:[%s7071_s6 + $0x178] sm:$0xff] }
 0x4f9   :  { %v1366_v18 = vmul.f32 %v3350_v53, %v1365_v7  ;;  %vm1412_vm8 = vcmp.eq.f32.partialorder %v1411_v2, 8.507059e+37  ;;  %v5685_v7 = vld [vmem:[%s7071_s6 + $0x170] sm:$0xff]  ;;  %v5784_v2 = vld [vmem:[%s7071_s6 + $0xf8] sm:$0xff] }
 0x4fa   :  { %v1385_v25 = vmul.f32 %v3352_v63, %v1384_v10  ;;  %v7608_v10 = vld [vmem:[#allocation32_spill] sm:$0xff] }
 0x4fb   :  { %v3354_v17 = vpop.eup %3353  ;;  %v1367_v11 = vadd.f32 %v3350_v53, %v1366_v18  ;;  %v150_v13 = vadd.f32 %v7608_v10, %v7585_v22  ;;  %v191_v18 = vadd.f32 %v7609_v14, %v7587_v33  ;;  %v5705_v22 = vld [vmem:[%s7071_s6 + $0x158] sm:$0xff]  ;;  %v5826_v10 = vld [vmem:[%s7071_s6 + $0x80] sm:$0xff]  ;;  %v5837_v14 = vld [vmem:[%s7071_s6 + $0xd0] sm:$0xff] }
 0x4fc   :  { %v1386_v23 = vadd.f32 %v3352_v63, %v1385_v25  ;;  %v1403_v35 = vmul.f32 %v3354_v17, %v5488_v43  ;;  %v3356_v60 = vpop.eup %3355  ;;  %vm1408_vm5 = vweird.f32 %v3354_v17  ;;  %v5589_v43 = vld [vmem:[%s7071_s6 + $0x1a8] sm:$0xff]  ;;  %7615 = vst [vmem:[#allocation25_spill] sm:$0xff] %v5826_v10 }
 0x4fd   :  { %v1371_v26 = vsel %vm1370_vm11, %v3350_v53, %v1367_v11  ;;  %vm1409_vm7 = vmor %vm1407_vm6, %vm1408_vm5  ;;  %7606 = vst [vmem:[#allocation45_spill] sm:$0xff] %v5589_v43  ;;  %v5642_v53 = vld [vmem:[%s7071_s6 + $0x1b8] sm:$0xff] }
 0x4fe   :  { %v1376_v44 = vsel %vm1373_vm2, %v1375_v6, %v1371_v26  ;;  %v1390_v61 = vsel %vm1389_vm15, %v3352_v63, %v1386_v23  ;;  %v1404_v1 = vsub.f32 1.0, %v1403_v35  ;;  %7607 = vst [vmem:[#allocation48_spill] sm:$0xff] %v5642_v53  ;;  %v5665_v63 = vld [vmem:[%s7071_s6 + $0x198] sm:$0xff]  ;;  %v5713_v6 = vld [vmem:[%s7071_s6 + $0x150] sm:$0xff]  ;;  %v5718_v23 = vld [vmem:[%s7071_s6 + $0x120] sm:$0xff] }
 0x4ff   :  { %v1395_v3 = vsel %vm1392_vm3, %v1394_v45, %v1390_v61  ;;  %v1418_v47 = vmul.f32 %v3356_v60, %v1376_v44  ;;  %v5723_v35 = vld [vmem:[%s7071_s6 + $0x128] sm:$0xff]  ;;  %v5729_v45 = vld [vmem:[%s7071_s6 + $0x138] sm:$0xff]  ;;  %v5737_v44 = vld [vmem:[%s7071_s6 + $0x130] sm:$0xff]  ;;  %7617 = vst [vmem:[#allocation20_spill] sm:$0xff] %v5837_v14 }
 0x500   :  { %v1417_v52 = vmul.f32 %v1395_v3, %v5283_v20  ;;  %v1405_v5 = vmul.f32 %v3354_v17, %v1404_v1  ;;  %v5742_v61 = vld [vmem:[%s7071_s6 + $0x100] sm:$0xff]  ;;  %v5747_v1 = vld [vmem:[%s7071_s6 + $0x108] sm:$0xff] }
 0x501   :  { %v5753_v3 = vld [vmem:[%s7071_s6 + $0xe0] sm:$0xff] }
 0x502   :  { %v1419_v30 = vadd.f32 %v1418_v47, %v1417_v52  ;;  %v1406_v48 = vadd.f32 %v3354_v17, %v1405_v5  ;;  %v5761_v47 = vld [vmem:[%s7071_s6 + $0xe8] sm:$0xff]  ;;  %v5766_v52 = vld [vmem:[%s7071_s6 + $0x118] sm:$0xff]  ;;  %v7610_v5 = vld [vmem:[#allocation53_spill] sm:$0xff] }
 0x504   :  { %3357 = vtanh.f32 %v1419_v30  ;;  %v5520_v12 = vsel %vm1427_vm4, %v1419_v30, %v5283_v20  ;;  %v1410_v40 = vsel %vm1409_vm7, %v3354_v17, %v1406_v48  ;;  %v7599_v20 = vld [vmem:[#allocation62_spill] sm:$0xff]  ;;  %v5699_v17 = vld [vmem:[%s7071_s6 + $0x148] sm:$0xff]  ;;  %v273_v30 = vadd.f32 %v7610_v5, %v7589_v15  ;;  %v5774_v48 = vld [vmem:[%s7071_s6 + $0xc0] sm:$0xff] }
 0x505   :  { %v1415_v56 = vsel %vm1412_vm8, %v1414_v55, %v1410_v40  ;;  %v5791_v15 = vld [vmem:[%s7071_s6 + $0xd8] sm:$0xff]  ;;  %v5796_v55 = vld [vmem:[%s7071_s6 + $0x110] sm:$0xff] }
 0x506   :  { %7611 = vst [vmem:[#allocation47_spill] sm:$0xff] %v5791_v15 }
 0x50a   :  { %v3358_v36 = vpop.eup %3357 }
 0x50b   :  { %v1421_v46 = vmul.f32 %v3358_v36, %v1415_v56  ;;  %v5802_v56 = vld [vmem:[%s7071_s6 + $0xa0] sm:$0xff] }
 0x50c   :  { %7612 = vst [vmem:[#allocation43_spill] sm:$0xff] %v5802_v56 }
 0x50d   :  { %v5527_v51 = vsel %vm1427_vm4, %v1421_v46, %v5288_v37  ;;  %v5807_v46 = vld [vmem:[%s7071_s6 + $0xa8] sm:$0xff] }
 0x50e   :  { %1447 = vmatmul.f32.vlgmr.msra.gmra.mxu0 %v5527_v51  ;;  %1467 = vmatmul.f32.vlgmr.msrb.gmra.mxu1 %v5527_v51  ;;  %7613 = vst [vmem:[#allocation51_spill] sm:$0xff] %v5807_v46 }
 0x50f   :  { %1487 = vmatmul.f32.vlgmr.msrb.gmra.mxu2 %v5527_v51  ;;  %1507 = vmatmul.f32.vlgmr.msra.gmra.mxu3 %v5527_v51 }
 0x510   :  { %1896 = vmatpush.msra.mxu0 %v5556_v8  ;;  %1916 = vmatpush.msrb.mxu1 %v5561_v62 }
 0x511   :  { %1956 = vmatpush.msra.mxu3 %v5578_v38 }
 0x512   :  { %1897 = vmatpush.msra.mxu0 %v5566_v24  ;;  %1917 = vmatpush.msrb.mxu1 %v5573_v28 }
 0x513   :  { %1957 = vmatpush.msra.mxu3 %v5594_v49 }
 0x514   :  { %1898 = vmatpush.msra.mxu0 %v5584_v42  ;;  %1918 = vmatpush.msrb.mxu1 %v5589_v43 }
 0x515   :  { %1958 = vmatpush.msra.mxu3 %v5642_v53 }
 0x516   :  { %3221 = vmatmul.msk.f32.vlgmr.msrb.gmra.mxu0 %vm491_vm0, %v7599_v20  ;;  %3222 = vmatmul.msk.f32.vlgmr.msra.gmra.mxu1 %vm491_vm0, %v7599_v20 }
 0x517   :  { %3223 = vmatmul.msk.f32.vlgmr.msra.gmra.mxu2 %vm491_vm0, %v7599_v20  ;;  %3224 = vmatmul.msk.f32.vlgmr.msrb.gmra.mxu3 %vm491_vm0, %v7599_v20  ;;  %v5815_v20 = vld [vmem:[%s7071_s6 + $0xb8] sm:$0xff] }
 0x518   :  { %1919 = vmatpush.msrb.mxu1 %v5637_v50  ;;  %1959 = vmatpush.msra.mxu3 %v5665_v63  ;;  %7614 = vst [vmem:[#allocation6_spill] sm:$0xff] %v5815_v20 }
 0x51a   :  { %1920 = vmatpush.msrb.mxu1 %v5654_v57  ;;  %1960 = vmatpush.msra.mxu3 %v5679_v4 }
 0x51c   :  { %1921 = vmatpush.msrb.mxu1 %v5699_v17  ;;  %1961 = vmatpush.msra.mxu3 %v5705_v22 }
 0x51e   :  { %1687 = vmatmul.f32.gmra.mxu0 %v7601_v29  ;;  %1728 = vmatmul.f32.gmra.mxu1 %v7601_v29 }
 0x51f   :  { %1769 = vmatmul.f32.gmra.mxu2 %v7601_v29  ;;  %1810 = vmatmul.f32.gmra.mxu3 %v7601_v29  ;;  %v5820_v29 = vld [vmem:[%s7071_s6 + $0xf0] sm:$0xff] }
 0x520   :  { %1922 = vmatpush.msrb.mxu1 %v5723_v35  ;;  %1962 = vmatpush.msra.mxu3 %v5729_v45 }
 0x522   :  { %1923 = vmatpush.msrb.mxu1 %v5747_v1  ;;  %1963 = vmatpush.msra.mxu3 %v5766_v52 }
 0x524   :  { %1924 = vmatpush.msrb.mxu1 %v5761_v47  ;;  %1964 = vmatpush.msra.mxu3 %v5784_v2 }
 0x526   :  { %1690 = vmatmul.f32.gmra.mxu0 %v7602_v27  ;;  %1731 = vmatmul.f32.gmra.mxu1 %v7602_v27 }
 0x527   :  { %1772 = vmatmul.f32.gmra.mxu2 %v7602_v27  ;;  %1813 = vmatmul.f32.gmra.mxu3 %v7602_v27 }
 0x528   :  { %1925 = vmatpush.msrb.mxu1 %v5779_v41  ;;  %1965 = vmatpush.msra.mxu3 %v5791_v15 }
 0x52a   :  { %1926 = vmatpush.msrb.mxu1 %v5807_v46  ;;  %1966 = vmatpush.msra.mxu3 %v5815_v20 }
 0x52e   :  { %1693 = vmatmul.f32.gmra.mxu0 %v5108_v32  ;;  %1734 = vmatmul.f32.gmra.mxu1 %v5108_v32 }
 0x52f   :  { %1775 = vmatmul.f32.gmra.mxu2 %v5108_v32  ;;  %1816 = vmatmul.f32.gmra.mxu3 %v5108_v32  ;;  %v5620_v32 = vld [vmem:[%s7071_s6 + $0x1f0] sm:$0xff] }
 0x530   :  { %1936 = vmatpush.msrb.mxu2 %v5620_v32 }
 0x536   :  { %1696 = vmatmul.f32.gmra.mxu0 %v5198_v59  ;;  %1737 = vmatmul.f32.gmra.mxu1 %v5198_v59 }
 0x537   :  { %1778 = vmatmul.f32.gmra.mxu2 %v5198_v59  ;;  %1819 = vmatmul.f32.gmra.mxu3 %v5198_v59  ;;  %v5626_v59 = vld [vmem:[%s7071_s6 + $0x1d0] sm:$0xff] }
 0x538   :  { %1937 = vmatpush.msrb.mxu2 %v5626_v59 }
 0x53a   :  { %1938 = vmatpush.msrb.mxu2 %v5659_v58 }
 0x53c   :  { %1939 = vmatpush.msrb.mxu2 %v5671_v0 }
 0x53e   :  { %1699 = vmatmul.f32.gmra.mxu0 %v5288_v37  ;;  %1740 = vmatmul.f32.gmra.mxu1 %v5288_v37 }
 0x53f   :  { %1781 = vmatmul.f32.gmra.mxu2 %v5288_v37  ;;  %1822 = vmatmul.f32.gmra.mxu3 %v5288_v37  ;;  %v5632_v37 = vld [vmem:[%s7071_s6 + $0x180] sm:$0xff] }
 0x540   :  { %1899 = vmatpush.msra.mxu0 %v5632_v37  ;;  %1940 = vmatpush.msrb.mxu2 %v5685_v7 }
 0x542   :  { %1900 = vmatpush.msra.mxu0 %v5649_v54  ;;  %1941 = vmatpush.msrb.mxu2 %v5713_v6 }
 0x544   :  { %1901 = vmatpush.msra.mxu0 %v5694_v31  ;;  %1942 = vmatpush.msrb.mxu2 %v5737_v44 }
 0x546   :  { %1702 = vmatmul.f32.gmra.mxu0 %v5527_v51  ;;  %1743 = vmatmul.f32.gmra.mxu1 %v5527_v51 }
 0x547   :  { %1784 = vmatmul.f32.gmra.mxu2 %v5527_v51  ;;  %1825 = vmatmul.f32.gmra.mxu3 %v5527_v51 }
 0x548   :  { %1902 = vmatpush.msra.mxu0 %v5718_v23  ;;  %1943 = vmatpush.msrb.mxu2 %v5796_v55 }
 0x54a   :  { %1903 = vmatpush.msra.mxu0 %v5742_v61  ;;  %1944 = vmatpush.msrb.mxu2 %v5820_v29 }
 0x54c   :  { %1904 = vmatpush.msra.mxu0 %v5753_v3  ;;  %1945 = vmatpush.msrb.mxu2 %v5837_v14 }
 0x54e   :  { %1905 = vmatpush.msra.mxu0 %v5774_v48 }
 0x550   :  { %1906 = vmatpush.msra.mxu0 %v5802_v56 }
 0x552   :  { %1907 = vmatpush.msra.mxu0 %v5826_v10 }
 0x58b   :  { %v1448_v19 = vpop.f32.mrf.mxu0  ;;  %v1468_v25 = vpop.f32.mrf.mxu1 }
 0x58c   :  { %v1511_v33 = vadd.f32 %v1448_v19, %v150_v13  ;;  %v1512_v11 = vadd.f32 %v1468_v25, %v191_v18  ;;  %v5831_v13 = vld [vmem:[%s7071_s6 + $0x88] sm:$0xff]  ;;  %v5844_v19 = vld [vmem:[%s7071_s6 + $0x98] sm:$0xff]  ;;  %v5849_v25 = vld [vmem:[%s7071_s6 + $0xb0] sm:$0xff] }
 0x58d   :  { %7616 = vst [vmem:[#allocation16_spill] sm:$0xff] %v5831_v13  ;;  %1927 = vmatpush.msrb.mxu1 %v5831_v13  ;;  %1967 = vmatpush.msra.mxu3 %v5844_v19 }
 0x58e   :  { %v3190_v26 = vmul.f32 -1.442695, %v1511_v33  ;;  %v3191_v60 = vmul.f32 -1.442695, %v1512_v11  ;;  %7618 = vst [vmem:[#allocation13_spill] sm:$0xff] %v5844_v19  ;;  %1946 = vmatpush.msrb.mxu2 %v5849_v25  ;;  %v5931_v19 = vld [vmem:[%s7071_s6] sm:$0xff] }
 0x58f   :  { %7619 = vst [vmem:[#allocation30_spill] sm:$0xff] %v5849_v25 }
 0x590   :  { %3359 = vpow2.f32 %v3190_v26  ;;  %v5857_v26 = vld [vmem:[%s7071_s6 + $0x60] sm:$0xff]  ;;  %7632 = vst [vmem:[#allocation34_spill] sm:$0xff] %v5931_v19 }
 0x591   :  { %3361 = vpow2.f32 %v3191_v60  ;;  %7620 = vst [vmem:[#allocation7_spill] sm:$0xff] %v5857_v26  ;;  %v5862_v60 = vld [vmem:[%s7071_s6 + $0x68] sm:$0xff]  ;;  %1908 = vmatpush.msra.mxu0 %v5857_v26 }
 0x592   :  { %v1508_v40 = vpop.f32.mrf.mxu3  ;;  %7621 = vst [vmem:[#allocation18_spill] sm:$0xff] %v5862_v60  ;;  %1928 = vmatpush.msrb.mxu1 %v5862_v60  ;;  %v1488_v21 = vpop.f32.mrf.mxu2  ;;  %v7631_v60 = vld [vmem:[#allocation60_spill] sm:$0xff] }
 0x593   :  { %v1514_v36 = vadd.f32 %v1508_v40, %v273_v30  ;;  %v5872_v30 = vld [vmem:[%s7071_s6 + $0x78] sm:$0xff]  ;;  %v5877_v40 = vld [vmem:[%s7071_s6 + $0x90] sm:$0xff]  ;;  %v232_v26 = vadd.f32 %v7631_v60, %v7591_v39 }
 0x594   :  { %7622 = vst [vmem:[#allocation19_spill] sm:$0xff] %v5872_v30  ;;  %1968 = vmatpush.msra.mxu3 %v5872_v30  ;;  %1947 = vmatpush.msrb.mxu2 %v5877_v40  ;;  %v5950_v60 = vld [vmem:[%s7071_s6 + $0x30] sm:$0xff] }
 0x595   :  { %v3192_v27 = vmul.f32 -1.442695, %v1514_v36  ;;  %7623 = vst [vmem:[#allocation11_spill] sm:$0xff] %v5877_v40  ;;  %v5884_v36 = vld [vmem:[%s7071_s6 + $0x40] sm:$0xff]  ;;  %v1513_v40 = vadd.f32 %v1488_v21, %v232_v26 }
 0x596   :  { %v3360_v18 = vpop.eup %3359  ;;  %7624 = vst [vmem:[#allocation24_spill] sm:$0xff] %v5884_v36  ;;  %1909 = vmatpush.msra.mxu0 %v5884_v36  ;;  %1948 = vmatpush.msrb.mxu2 %v5910_v34  ;;  %v5941_v36 = vld [vmem:[%s7071_s6 + $0x38] sm:$0xff] }
 0x597   :  { %v3362_v33 = vpop.eup %3361  ;;  %v5851_v11 = vadd.f32 1.0, %v3360_v18  ;;  %3363 = vpow2.f32 %v3192_v27  ;;  %v5889_v27 = vld [vmem:[%s7071_s6 + $0x48] sm:$0xff]  ;;  %v5898_v18 = vld [vmem:[%s7071_s6 + $0x20] sm:$0xff]  ;;  %1969 = vmatpush.msra.mxu3 %v5915_v16  ;;  %7634 = vst [vmem:[#allocation15_spill] sm:$0xff] %v5941_v36  ;;  %v5955_v16 = vld [vmem:[%s7071_s6 + $0x18] sm:$0xff] }
 0x598   :  { %v5865_v5 = vadd.f32 1.0, %v3362_v33  ;;  %7625 = vst [vmem:[#allocation14_spill] sm:$0xff] %v5889_v27  ;;  %v5905_v33 = vld [vmem:[%s7071_s6 + $0x28] sm:$0xff]  ;;  %1929 = vmatpush.msrb.mxu1 %v5889_v27  ;;  %1910 = vmatpush.msra.mxu0 %v5898_v18 }
 0x599   :  { %3365 = vrcp.f32 %v5851_v11  ;;  %7626 = vst [vmem:[#allocation28_spill] sm:$0xff] %v5898_v18  ;;  %v5936_v27 = vld [vmem:[%s7071_s6 + $0x8] sm:$0xff]  ;;  %1949 = vmatpush.msrb.mxu2 %v5922_v9  ;;  %1970 = vmatpush.msra.mxu3 %v5941_v36  ;;  %vm1524_vm15 = vweird.f32 %v5851_v11 }
 0x59a   :  { %3367 = vrcp.f32 %v5865_v5  ;;  %7627 = vst [vmem:[#allocation31_spill] sm:$0xff] %v5905_v33  ;;  %1930 = vmatpush.msrb.mxu1 %v5905_v33  ;;  %1911 = vmatpush.msra.mxu0 %v5931_v19  ;;  %v5966_v33 = vld [vmem:[%s7071_s6 + $0x10] sm:$0xff]  ;;  %v1530_v19 = vand.u32 2147483648, %v5851_v11  ;;  %vm1543_vm2 = vweird.f32 %v5865_v5 }
 0x59b   :  { %7633 = vst [vmem:[#allocation27_spill] sm:$0xff] %v5936_v27  ;;  %1950 = vmatpush.msrb.mxu2 %v5950_v60  ;;  %1971 = vmatpush.msra.mxu3 %v5955_v16 }
 0x59c   :  { %7635 = vst [vmem:[#allocation36_spill] sm:$0xff] %v5950_v60  ;;  %1931 = vmatpush.msrb.mxu1 %v5936_v27  ;;  %2045 = vmatpush.msrb.mxu0 %v5556_v8  ;;  %v1549_v27 = vand.u32 2147483648, %v5865_v5  ;;  %v1528_v60 = vand.u32 2147483647, %v5851_v11 }
 0x59d   :  { %v3364_v30 = vpop.eup %3363  ;;  %7636 = vst [vmem:[#allocation33_spill] sm:$0xff] %v5955_v16  ;;  %1951 = vmatpush.msrb.mxu2 %v5966_v33  ;;  %2105 = vmatpush.msrb.mxu3 %v5578_v38 }
 0x59e   :  { %v5943_v39 = vadd.f32 1.0, %v3364_v30  ;;  %7637 = vst [vmem:[#allocation9_spill] sm:$0xff] %v5966_v33  ;;  %2065 = vmatpush.msra.mxu1 %v5561_v62  ;;  %2046 = vmatpush.msrb.mxu0 %v5566_v24  ;;  %vm1529_vm6 = vcmp.eq.f32.partialorder %v1528_v60, 8.507059e+37 }
 0x59f   :  { %v3366_v34 = vpop.eup %3365  ;;  %2085 = vmatpush.msra.mxu2 %v5620_v32  ;;  %2106 = vmatpush.msrb.mxu3 %v5594_v49 }
 0x5a0   :  { %v3368_v30 = vpop.eup %3367  ;;  %v1520_v18 = vmul.f32 %v3366_v34, %v5851_v11  ;;  %3369 = vrcp.f32 %v5943_v39  ;;  %vm1525_vm9 = vweird.f32 %v3366_v34  ;;  %2066 = vmatpush.msra.mxu1 %v5573_v28  ;;  %2047 = vmatpush.msrb.mxu0 %v5584_v42 }
 0x5a1   :  { %v1539_v21 = vmul.f32 %v3368_v30, %v5865_v5  ;;  %3371 = vtanh.f32 %v1513_v40  ;;  %vm1544_vm11 = vweird.f32 %v3368_v30  ;;  %2086 = vmatpush.msra.mxu2 %v5626_v59  ;;  %vm1526_vm3 = vmor %vm1524_vm15, %vm1525_vm9  ;;  %2107 = vmatpush.msrb.mxu3 %v5642_v53  ;;  %vm1563_vm9 = vweird.f32 %v5943_v39 }
 0x5a2   :  { %v1521_v26 = vsub.f32 1.0, %v1520_v18  ;;  %2067 = vmatpush.msra.mxu1 %v5589_v43  ;;  %vm1545_vm5 = vmor %vm1543_vm2, %vm1544_vm11  ;;  %2048 = vmatpush.msrb.mxu0 %v5632_v37 }
 0x5a3   :  { %v1540_v36 = vsub.f32 1.0, %v1539_v21  ;;  %v1547_v21 = vand.u32 2147483647, %v5865_v5  ;;  %2087 = vmatpush.msra.mxu2 %v5659_v58  ;;  %2108 = vmatpush.msrb.mxu3 %v5665_v63 }
 0x5a4   :  { %v1522_v9 = vmul.f32 %v3366_v34, %v1521_v26  ;;  %2068 = vmatpush.msra.mxu1 %v5637_v50  ;;  %2049 = vmatpush.msrb.mxu0 %v5649_v54 }
 0x5a5   :  { %v1541_v18 = vmul.f32 %v3368_v30, %v1540_v36  ;;  %v1531_v36 = vor.u32 1.1754944e-38, %v1530_v19  ;;  %vm1548_vm7 = vcmp.eq.f32.partialorder %v1547_v21, 8.507059e+37  ;;  %2088 = vmatpush.msra.mxu2 %v5671_v0  ;;  %2109 = vmatpush.msrb.mxu3 %v5679_v4 }
 0x5a6   :  { %v5983_v40 = vpop.eup %3369  ;;  %v1523_v38 = vadd.f32 %v3366_v34, %v1522_v9  ;;  %v1550_v9 = vor.u32 1.1754944e-38, %v1549_v27  ;;  %2069 = vmatpush.msra.mxu1 %v5654_v57  ;;  %2050 = vmatpush.msrb.mxu0 %v5694_v31 }
 0x5a7   :  { %v1542_v26 = vadd.f32 %v3368_v30, %v1541_v18  ;;  %v1559_v28 = vmul.f32 %v5983_v40, %v5943_v39  ;;  %v3372_v5 = vpop.eup %3371  ;;  %2089 = vmatpush.msra.mxu2 %v5685_v7  ;;  %vm1564_vm8 = vweird.f32 %v5983_v40  ;;  %2110 = vmatpush.msrb.mxu3 %v5705_v22 }
 0x5a8   :  { %v1527_v11 = vsel %vm1526_vm3, %v3366_v34, %v1523_v38  ;;  %2070 = vmatpush.msra.mxu1 %v5699_v17  ;;  %2051 = vmatpush.msrb.mxu0 %v5718_v23  ;;  %vm1565_vm11 = vmor %vm1563_vm9, %vm1564_vm8 }
 0x5a9   :  { %v1532_v42 = vsel %vm1529_vm6, %v1531_v36, %v1527_v11  ;;  %v1546_v19 = vsel %vm1545_vm5, %v3368_v30, %v1542_v26  ;;  %v1560_v18 = vsub.f32 1.0, %v1559_v28  ;;  %2090 = vmatpush.msra.mxu2 %v5713_v6  ;;  %2111 = vmatpush.msrb.mxu3 %v5729_v45  ;;  %v7639_v36 = vld [vmem:[#allocation11_spill] sm:$0xff]  ;;  %v7640_v26 = vld [vmem:[#allocation13_spill] sm:$0xff]  ;;  %v7642_v11 = vld [vmem:[#allocation18_spill] sm:$0xff] }
 0x5aa   :  { %v1551_v43 = vsel %vm1548_vm7, %v1550_v9, %v1546_v19  ;;  %v1574_v53 = vmul.f32 %v3372_v5, %v1532_v42  ;;  %2071 = vmatpush.msra.mxu1 %v5723_v35  ;;  %2052 = vmatpush.msrb.mxu0 %v5742_v61  ;;  %v7641_v9 = vld [vmem:[#allocation7_spill] sm:$0xff]  ;;  %v7645_v19 = vld [vmem:[#allocation24_spill] sm:$0xff] }
 0x5ab   :  { %v1573_v34 = vmul.f32 %v1551_v43, %v5520_v12  ;;  %v1561_v38 = vmul.f32 %v5983_v40, %v1560_v18  ;;  %v1569_v12 = vand.u32 2147483648, %v5943_v39  ;;  %v1567_v43 = vand.u32 2147483647, %v5943_v39  ;;  %2091 = vmatpush.msra.mxu2 %v5737_v44  ;;  %2112 = vmatpush.msrb.mxu3 %v5766_v52  ;;  %v6026_v39 = vpop.permute.xlu1 %1581  ;;  %v7644_v5 = vld [vmem:[#allocation19_spill] sm:$0xff]  ;;  %v7646_v18 = vld [vmem:[#allocation14_spill] sm:$0xff] }
 0x5ac   :  { %2072 = vmatpush.msra.mxu1 %v5747_v1  ;;  %2053 = vmatpush.msrb.mxu0 %v5753_v3  ;;  %7638 = vst [vmem:[#allocation23_spill] sm:$0xff] %v6026_v39  ;;  %vm7295_vm2 = vcmp.eq.s32.totalorder %v6026_v39, 1  ;;  %v7660_v39 = vld [vmem:[#allocation48_spill] sm:$0xff] }
 0x5ad   :  { %v1575_v28 = vadd.f32 %v1574_v53, %v1573_v34  ;;  %v1562_v42 = vadd.f32 %v5983_v40, %v1561_v38  ;;  %2092 = vmatpush.msra.mxu2 %v5796_v55  ;;  %v1570_v27 = vor.u32 1.1754944e-38, %v1569_v12  ;;  %vm1568_vm15 = vcmp.eq.f32.partialorder %v1567_v43, 8.507059e+37  ;;  %2113 = vmatpush.msrb.mxu3 %v5784_v2  ;;  %v7647_v34 = vld [vmem:[#allocation22_spill] sm:$0xff]  ;;  %v7648_v38 = vld [vmem:[#allocation21_spill] sm:$0xff]  ;;  %v7651_v12 = vld [vmem:[#allocation31_spill] sm:$0xff] }
 0x5ae   :  { %2073 = vmatpush.msra.mxu1 %v5761_v47  ;;  %2054 = vmatpush.msrb.mxu0 %v5774_v48  ;;  %v7652_v43 = vld [vmem:[#allocation36_spill] sm:$0xff] }
 0x5af   :  { %3373 = vtanh.f32 %v1575_v28  ;;  %v1566_v53 = vsel %vm1565_vm11, %v5983_v40, %v1562_v42  ;;  %2093 = vmatpush.msra.mxu2 %v5820_v29  ;;  %2114 = vmatpush.msrb.mxu3 %v5791_v15  ;;  %v7649_v28 = vmov 0.0   ;;  %v7650_v42 = vld [vmem:[#allocation28_spill] sm:$0xff] }
 0x5b0   :  { %v1571_v30 = vsel %vm1568_vm15, %v1570_v27, %v1566_v53  ;;  %2074 = vmatpush.msra.mxu1 %v5779_v41  ;;  %2055 = vmatpush.msrb.mxu0 %v5802_v56  ;;  %v7653_v53 = vld [vmem:[#allocation15_spill] sm:$0xff]  ;;  %v7654_v27 = vld [vmem:[#allocation34_spill] sm:$0xff] }
 0x5b1   :  { %2094 = vmatpush.msra.mxu2 %v5837_v14  ;;  %2115 = vmatpush.msrb.mxu3 %v5815_v20 }
 0x5b2   :  { %2075 = vmatpush.msra.mxu1 %v5807_v46  ;;  %2056 = vmatpush.msrb.mxu0 %v5826_v10 }
 0x5b3   :  { %2095 = vmatpush.msra.mxu2 %v5849_v25  ;;  %2116 = vmatpush.msrb.mxu3 %v7640_v26 }
 0x5b4   :  { %2076 = vmatpush.msra.mxu1 %v5831_v13  ;;  %2057 = vmatpush.msrb.mxu0 %v7641_v9 }
 0x5b5   :  { %v3374_v60 = vpop.eup %3373  ;;  %2096 = vmatpush.msra.mxu2 %v7639_v36  ;;  %2117 = vmatpush.msrb.mxu3 %v7644_v5 }
 0x5b6   :  { %v1577_v21 = vmul.f32 %v3374_v60, %v1571_v30  ;;  %2077 = vmatpush.msra.mxu1 %v7642_v11  ;;  %2058 = vmatpush.msrb.mxu0 %v7645_v19  ;;  %v7655_v60 = vld [vmem:[#allocation27_spill] sm:$0xff]  ;;  %v7656_v30 = vld [vmem:[#allocation44_spill] sm:$0xff] }
 0x5b7   :  { %2118 = vmatpush.msrb.mxu3 %v7648_v38 }
 0x5b8   :  { %v1584_v40 = vsel %vm7295_vm2, %v1577_v21, %v5527_v51  ;;  %v7643_v51 = vld [vmem:[#allocation8_spill] sm:$0xff]  ;;  %2078 = vmatpush.msra.mxu1 %v7646_v18  ;;  %2059 = vmatpush.msrb.mxu0 %v7650_v42  ;;  %v7657_v21 = vld [vmem:[#allocation42_spill] sm:$0xff] }
 0x5b9   :  { %1705 = vmatmul.f32.gmra.mxu0 %v1584_v40  ;;  %1746 = vmatmul.f32.gmra.mxu1 %v1584_v40 }
 0x5ba   :  { %1787 = vmatmul.f32.gmra.mxu2 %v1584_v40  ;;  %1828 = vmatmul.f32.gmra.mxu3 %v1584_v40  ;;  %v7658_v40 = vld [vmem:[#allocation39_spill] sm:$0xff] }
 0x5bb   :  { %2097 = vmatpush.msra.mxu2 %v7643_v51  ;;  %2079 = vmatpush.msra.mxu1 %v7651_v12 }
 0x5bc   :  { %2119 = vmatpush.msrb.mxu3 %v7653_v53  ;;  %2060 = vmatpush.msrb.mxu0 %v7654_v27 }
 0x5bd   :  { %2098 = vmatpush.msra.mxu2 %v7647_v34  ;;  %2080 = vmatpush.msra.mxu1 %v7655_v60 }
 0x5be   :  { %2120 = vmatpush.msrb.mxu3 %v5955_v16 }
 0x5bf   :  { %2099 = vmatpush.msra.mxu2 %v7652_v43 }
 0x5c1   :  { %1912 = vmatmul.f32.vlgmr.msra.gmra.mxu0 %v7649_v28  ;;  %1932 = vmatmul.f32.vlgmr.msrb.gmra.mxu1 %v7649_v28 }
 0x5c2   :  { %1952 = vmatmul.f32.vlgmr.msrb.gmra.mxu2 %v7649_v28  ;;  %1972 = vmatmul.f32.vlgmr.msra.gmra.mxu3 %v7649_v28  ;;  %v7659_v28 = vld [vmem:[#allocation45_spill] sm:$0xff] }
 0x5c3   :  { %2100 = vmatpush.msra.mxu2 %v5966_v33  ;;  %2194 = vmatpush.msra.mxu0 %v5556_v8 }
 0x5c4   :  { %2214 = vmatpush.msrb.mxu1 %v5561_v62  ;;  %2254 = vmatpush.msra.mxu3 %v7656_v30 }
 0x5c5   :  { %2234 = vmatpush.msrb.mxu2 %v5620_v32  ;;  %2195 = vmatpush.msra.mxu0 %v5566_v24 }
 0x5c6   :  { %2215 = vmatpush.msrb.mxu1 %v7657_v21  ;;  %2255 = vmatpush.msra.mxu3 %v5594_v49 }
 0x5c7   :  { %2235 = vmatpush.msrb.mxu2 %v5626_v59  ;;  %2196 = vmatpush.msra.mxu0 %v7658_v40 }
 0x5c8   :  { %2216 = vmatpush.msrb.mxu1 %v7659_v28  ;;  %2256 = vmatpush.msra.mxu3 %v7660_v39 }
 0x5c9   :  { %2236 = vmatpush.msrb.mxu2 %v5659_v58  ;;  %2197 = vmatpush.msra.mxu0 %v5632_v37 }
 0x5ca   :  { %2217 = vmatpush.msrb.mxu1 %v5637_v50  ;;  %2257 = vmatpush.msra.mxu3 %v5665_v63 }
 0x5cb   :  { %2237 = vmatpush.msrb.mxu2 %v5671_v0  ;;  %2198 = vmatpush.msra.mxu0 %v5649_v54 }
 0x5cc   :  { %2218 = vmatpush.msrb.mxu1 %v5654_v57  ;;  %2258 = vmatpush.msra.mxu3 %v5679_v4 }
 0x5cd   :  { %2238 = vmatpush.msrb.mxu2 %v5685_v7  ;;  %2199 = vmatpush.msra.mxu0 %v5694_v31 }
 0x5ce   :  { %2219 = vmatpush.msrb.mxu1 %v5699_v17  ;;  %2259 = vmatpush.msra.mxu3 %v5705_v22 }
 0x5cf   :  { %2239 = vmatpush.msrb.mxu2 %v5713_v6  ;;  %2200 = vmatpush.msra.mxu0 %v5718_v23 }
 0x5d0   :  { %2220 = vmatpush.msrb.mxu1 %v5723_v35  ;;  %2260 = vmatpush.msra.mxu3 %v5729_v45 }
 0x5d1   :  { %2240 = vmatpush.msrb.mxu2 %v5737_v44  ;;  %2201 = vmatpush.msra.mxu0 %v5742_v61 }
 0x5d2   :  { %2221 = vmatpush.msrb.mxu1 %v5747_v1  ;;  %2261 = vmatpush.msra.mxu3 %v5766_v52 }
 0x5d3   :  { %2241 = vmatpush.msrb.mxu2 %v5796_v55  ;;  %2202 = vmatpush.msra.mxu0 %v5753_v3 }
 0x5d4   :  { %2222 = vmatpush.msrb.mxu1 %v5761_v47  ;;  %2262 = vmatpush.msra.mxu3 %v5784_v2 }
 0x5d5   :  { %2242 = vmatpush.msrb.mxu2 %v5820_v29  ;;  %2203 = vmatpush.msra.mxu0 %v5774_v48 }
 0x5d6   :  { %2223 = vmatpush.msrb.mxu1 %v5779_v41  ;;  %2263 = vmatpush.msra.mxu3 %v5791_v15 }
 0x5d7   :  { %2243 = vmatpush.msrb.mxu2 %v5837_v14  ;;  %2204 = vmatpush.msra.mxu0 %v5802_v56 }
 0x5d8   :  { %2224 = vmatpush.msrb.mxu1 %v5807_v46  ;;  %2264 = vmatpush.msra.mxu3 %v5815_v20 }
 0x5d9   :  { %2244 = vmatpush.msrb.mxu2 %v5849_v25  ;;  %2205 = vmatpush.msra.mxu0 %v5826_v10 }
 0x5da   :  { %2225 = vmatpush.msrb.mxu1 %v5831_v13  ;;  %2265 = vmatpush.msra.mxu3 %v7640_v26 }
 0x5db   :  { %2245 = vmatpush.msrb.mxu2 %v7639_v36  ;;  %2206 = vmatpush.msra.mxu0 %v7641_v9 }
 0x5dc   :  { %2226 = vmatpush.msrb.mxu1 %v7642_v11  ;;  %2266 = vmatpush.msra.mxu3 %v7644_v5 }
 0x5dd   :  { %2246 = vmatpush.msrb.mxu2 %v7643_v51  ;;  %2207 = vmatpush.msra.mxu0 %v7645_v19  ;;  %v1808_v19 = vpop.f32.mrf.mxu3 }
 0x5de   :  { %2227 = vmatpush.msrb.mxu1 %v7646_v18  ;;  %2267 = vmatpush.msra.mxu3 %v7648_v38  ;;  %v1685_v18 = vpop.f32.mrf.mxu0 }
 0x5df   :  { %2247 = vmatpush.msrb.mxu2 %v7647_v34  ;;  %2208 = vmatpush.msra.mxu0 %v7650_v42  ;;  %v1726_v34 = vpop.f32.mrf.mxu1 }
 0x5e0   :  { %2228 = vmatpush.msrb.mxu1 %v7651_v12  ;;  %2268 = vmatpush.msra.mxu3 %v7653_v53  ;;  %v1767_v12 = vpop.f32.mrf.mxu2 }
 0x5e1   :  { %2248 = vmatpush.msrb.mxu2 %v7652_v43  ;;  %2209 = vmatpush.msra.mxu0 %v7654_v27 }
 0x5e2   :  { %2229 = vmatpush.msrb.mxu1 %v7655_v60  ;;  %2269 = vmatpush.msra.mxu3 %v5955_v16 }
 0x5e3   :  { %2249 = vmatpush.msrb.mxu2 %v5966_v33 }
 0x5e5   :  { %v6134_v5 = vpop.f32.mrf.mxu3 }
 0x5e6   :  { %v6130_v38 = vpop.f32.mrf.mxu0  ;;  %7663 = vst [vmem:[#allocation29_spill] sm:$0xff] %v6134_v5 }
 0x5e7   :  { %7661 = vst [vmem:[#allocation26_spill] sm:$0xff] %v6130_v38  ;;  %v6132_v42 = vpop.f32.mrf.mxu1 }
 0x5e8   :  { %7662 = vst [vmem:[#allocation38_spill] sm:$0xff] %v6132_v42  ;;  %v6140_v27 = vpop.f32.mrf.mxu2 }
 0x5e9   :  { %7666 = vst [vmem:[#allocation58_spill] sm:$0xff] %v6140_v27 }
 0x5ed   :  { %v6142_v60 = vpop.f32.mrf.mxu3 }
 0x5ee   :  { %v6136_v43 = vpop.f32.mrf.mxu0  ;;  %7667 = vst [vmem:[#allocation52_spill] sm:$0xff] %v6142_v60 }
 0x5ef   :  { %7664 = vst [vmem:[#allocation50_spill] sm:$0xff] %v6136_v43  ;;  %v6138_v53 = vpop.f32.mrf.mxu1 }
 0x5f0   :  { %7665 = vst [vmem:[#allocation4_spill] sm:$0xff] %v6138_v53  ;;  %v6148_v51 = vpop.f32.mrf.mxu2 }
 0x5f1   :  { %7670 = vst [vmem:[#allocation61_spill] sm:$0xff] %v6148_v51 }
 0x5f5   :  { %v6150_v38 = vpop.f32.mrf.mxu3 }
 0x5f6   :  { %v6144_v33 = vpop.f32.mrf.mxu0  ;;  %7671 = vst [vmem:[#allocation55_spill] sm:$0xff] %v6150_v38 }
 0x5f7   :  { %7668 = vst [vmem:[#allocation56_spill] sm:$0xff] %v6144_v33  ;;  %v6146_v16 = vpop.f32.mrf.mxu1 }
 0x5f8   :  { %7669 = vst [vmem:[#allocation46_spill] sm:$0xff] %v6146_v16  ;;  %v6156_v5 = vpop.f32.mrf.mxu2 }
 0x5f9   :  { %7674 = vst [vmem:[#allocation49_spill] sm:$0xff] %v6156_v5 }
 0x5fd   :  { %v6158_v43 = vpop.f32.mrf.mxu3 }
 0x5fe   :  { %v6152_v42 = vpop.f32.mrf.mxu0  ;;  %7675 = vst [vmem:[#allocation59_spill] sm:$0xff] %v6158_v43  ;;  %v1658_v43 = vld [vmem:[%s7072_s7] sm:$0xf] }
 0x5ff   :  { %7672 = vst [vmem:[#allocation5_spill] sm:$0xff] %v6152_v42  ;;  %v6154_v11 = vpop.f32.mrf.mxu1  ;;  %v6193_v36 = vperm.slane %v1658_v43, 3 }
 0x600   :  { %7673 = vst [vmem:[#allocation54_spill] sm:$0xff] %v6154_v11  ;;  %v6164_v60 = vpop.f32.mrf.mxu2 }
 0x601   :  { %7678 = vst [vmem:[#allocation10_spill] sm:$0xff] %v6164_v60  ;;  %v6185_v60 = vperm.slane %v1658_v43, 1  ;;  %v1809_v13 = vadd.f32 %v1808_v19, %v6193_v36 }
 0x602   :  { %7690 = vst [vmem:[#allocation66_spill] sm:$0xff] %v6193_v36 }
 0x603   :  { %7687 = vst [vmem:[#allocation48_spill] sm:$0xff] %v6185_v60 }
 0x605   :  { %v6166_v33 = vpop.f32.mrf.mxu3 }
 0x606   :  { %v6160_v53 = vpop.f32.mrf.mxu0  ;;  %7679 = vst [vmem:[#allocation32_spill] sm:$0xff] %v6166_v33 }
 0x607   :  { %7676 = vst [vmem:[#allocation62_spill] sm:$0xff] %v6160_v53  ;;  %v6162_v27 = vpop.f32.mrf.mxu1 }
 0x608   :  { %7677 = vst [vmem:[#allocation12_spill] sm:$0xff] %v6162_v27  ;;  %v6172_v38 = vpop.f32.mrf.mxu2  ;;  %v6183_v27 = vperm.slane %v1658_v43, 0 }
 0x609   :  { %7682 = vst [vmem:[#allocation60_spill] sm:$0xff] %v6172_v38 }
 0x60a   :  { %7686 = vst [vmem:[#allocation45_spill] sm:$0xff] %v6183_v27 }
 0x60d   :  { %v6174_v42 = vpop.f32.mrf.mxu3 }
 0x60e   :  { %v6168_v16 = vpop.f32.mrf.mxu0  ;;  %7683 = vst [vmem:[#allocation44_spill] sm:$0xff] %v6174_v42 }
 0x60f   :  { %7680 = vst [vmem:[#allocation57_spill] sm:$0xff] %v6168_v16  ;;  %v6170_v51 = vpop.f32.mrf.mxu1  ;;  %v1686_v16 = vadd.f32 %v1685_v18, %v6183_v27 }
 0x610   :  { %7681 = vst [vmem:[#allocation53_spill] sm:$0xff] %v6170_v51  ;;  %v1727_v51 = vadd.f32 %v1726_v34, %v6185_v60  ;;  %v6189_v33 = vpop.f32.mrf.mxu2 }
 0x611   :  { %7688 = vst [vmem:[#allocation64_spill] sm:$0xff] %v6189_v33 }
 0x636   :  { %v6179_v11 = vpop.f32.mrf.mxu0  ;;  %v6181_v53 = vpop.f32.mrf.mxu1 }
 0x637   :  { %7684 = vst [vmem:[#allocation42_spill] sm:$0xff] %v6179_v11 }
 0x638   :  { %7685 = vst [vmem:[#allocation39_spill] sm:$0xff] %v6181_v53 }
 0x63d   :  { %v6191_v38 = vpop.f32.mrf.mxu3  ;;  %v6196_v10 = vpop.f32.mrf.mxu2 }
 0x63e   :  { %7689 = vst [vmem:[#allocation65_spill] sm:$0xff] %v6191_v38  ;;  %v1913_v42 = vpop.f32.mrf.mxu0  ;;  %v1933_v5 = vpop.f32.mrf.mxu1 }
 0x63f   :  { %v1976_v9 = vadd.f32 %v1913_v42, %v1686_v16  ;;  %v1977_v26 = vadd.f32 %v1933_v5, %v1727_v51  ;;  %7691 = vst [vmem:[#allocation67_spill] sm:$0xff] %v6196_v10  ;;  %v6198_v16 = vperm.slane %v1658_v43, 2 }
 0x641   :  { %v3193_v11 = vmul.f32 -1.442695, %v1976_v9  ;;  %v3194_v53 = vmul.f32 -1.442695, %v1977_v26  ;;  %7692 = vst [vmem:[#allocation68_spill] sm:$0xff] %v6198_v16 }
 0x643   :  { %3375 = vpow2.f32 %v3193_v11  ;;  %v1768_v11 = vadd.f32 %v1767_v12, %v6198_v16 }
 0x644   :  { %3377 = vpow2.f32 %v3194_v53 }
 0x645   :  { %v1973_v18 = vpop.f32.mrf.mxu3  ;;  %v1953_v9 = vpop.f32.mrf.mxu2 }
 0x646   :  { %v1979_v34 = vadd.f32 %v1973_v18, %v1809_v13  ;;  %v1978_v19 = vadd.f32 %v1953_v9, %v1768_v11 }
 0x648   :  { %v3195_v60 = vmul.f32 -1.442695, %v1979_v34 }
 0x649   :  { %v3376_v33 = vpop.eup %3375 }
 0x64a   :  { %v3378_v27 = vpop.eup %3377  ;;  %v1983_v38 = vadd.f32 1.0, %v3376_v33  ;;  %3379 = vpow2.f32 %v3195_v60 }
 0x64b   :  { %v2002_v20 = vadd.f32 1.0, %v3378_v27 }
 0x64c   :  { %3381 = vrcp.f32 %v1983_v38  ;;  %v1995_v33 = vand.u32 2147483648, %v1983_v38  ;;  %v1993_v60 = vand.u32 2147483647, %v1983_v38  ;;  %vm1989_vm6 = vweird.f32 %v1983_v38 }
 0x64d   :  { %3383 = vrcp.f32 %v2002_v20  ;;  %v2014_v27 = vand.u32 2147483648, %v2002_v20  ;;  %v2012_v36 = vand.u32 2147483647, %v2002_v20  ;;  %vm2008_vm7 = vweird.f32 %v2002_v20 }
 0x64e   :  { %v1996_v9 = vor.u32 1.1754944e-38, %v1995_v33  ;;  %vm1994_vm9 = vcmp.eq.f32.partialorder %v1993_v60, 8.507059e+37 }
 0x64f   :  { %v2015_v16 = vor.u32 1.1754944e-38, %v2014_v27  ;;  %vm2013_vm15 = vcmp.eq.f32.partialorder %v2012_v36, 8.507059e+37 }
 0x650   :  { %v3380_v26 = vpop.eup %3379 }
 0x651   :  { %v2022_v51 = vadd.f32 1.0, %v3380_v26 }
 0x652   :  { %v3382_v5 = vpop.eup %3381 }
 0x653   :  { %v3384_v42 = vpop.eup %3383  ;;  %v1985_v53 = vmul.f32 %v3382_v5, %v1983_v38  ;;  %3385 = vrcp.f32 %v2022_v51  ;;  %vm1990_vm3 = vweird.f32 %v3382_v5  ;;  %v2032_v38 = vand.u32 2147483647, %v2022_v51 }
 0x654   :  { %v2004_v13 = vmul.f32 %v3384_v42, %v2002_v20  ;;  %3387 = vtanh.f32 %v1978_v19  ;;  %vm2009_vm5 = vweird.f32 %v3384_v42  ;;  %vm1991_vm8 = vmor %vm1989_vm6, %vm1990_vm3  ;;  %vm2028_vm3 = vweird.f32 %v2022_v51 }
 0x655   :  { %v1986_v18 = vsub.f32 1.0, %v1985_v53  ;;  %vm2010_vm11 = vmor %vm2008_vm7, %vm2009_vm5  ;;  %vm2033_vm5 = vcmp.eq.f32.partialorder %v2032_v38, 8.507059e+37 }
 0x656   :  { %v2005_v34 = vsub.f32 1.0, %v2004_v13 }
 0x657   :  { %v1987_v43 = vmul.f32 %v3382_v5, %v1986_v18 }
 0x658   :  { %v2006_v10 = vmul.f32 %v3384_v42, %v2005_v34 }
 0x659   :  { %v3386_v25 = vpop.eup %3385  ;;  %v1988_v12 = vadd.f32 %v3382_v5, %v1987_v43 }
 0x65a   :  { %v2007_v26 = vadd.f32 %v3384_v42, %v2006_v10  ;;  %v2024_v11 = vmul.f32 %v3386_v25, %v2022_v51  ;;  %v3388_v19 = vpop.eup %3387  ;;  %vm2029_vm2 = vweird.f32 %v3386_v25  ;;  %v2034_v10 = vand.u32 2147483648, %v2022_v51 }
 0x65b   :  { %v1992_v53 = vsel %vm1991_vm8, %v3382_v5, %v1988_v12  ;;  %vm2030_vm6 = vmor %vm2028_vm3, %vm2029_vm2 }
 0x65c   :  { %v1997_v13 = vsel %vm1994_vm9, %v1996_v9, %v1992_v53  ;;  %v2011_v18 = vsel %vm2010_vm11, %v3384_v42, %v2007_v26  ;;  %v2025_v46 = vsub.f32 1.0, %v2024_v11  ;;  %v2035_v33 = vor.u32 1.1754944e-38, %v2034_v10 }
 0x65d   :  { %v2016_v34 = vsel %vm2013_vm15, %v2015_v16, %v2011_v18  ;;  %v2039_v56 = vmul.f32 %v3388_v19, %v1997_v13  ;;  %v7726_v19 = vld [vmem:[#allocation68_spill] sm:$0xff]  ;;  %v7727_v13 = vld [vmem:[#allocation58_spill] sm:$0xff]  ;;  %v6323_v16 = vld [vmem:[%s7071_s6 + $0x1f0] sm:$0xff] }
 0x65e   :  { %v2038_v15 = vmul.f32 0.0, %v2016_v34  ;;  %v2026_v14 = vmul.f32 %v3386_v25, %v2025_v46  ;;  %v1771_v18 = vadd.f32 %v7727_v13, %v7726_v19  ;;  %v6401_v13 = vld [vmem:[%s7071_s6 + $0x198] sm:$0xff] }
 0x660   :  { %v6201_v43 = vadd.f32 %v2039_v56, %v2038_v15  ;;  %v2027_v20 = vadd.f32 %v3386_v25, %v2026_v14 }
 0x662   :  { %3389 = vtanh.f32 %v6201_v43  ;;  %v2031_v5 = vsel %vm2030_vm6, %v3386_v25, %v2027_v20 }
 0x663   :  { %v2036_v36 = vsel %vm2033_vm5, %v2035_v33, %v2031_v5 }
 0x668   :  { %v3390_v42 = vpop.eup %3389 }
 0x669   :  { %v6204_v27 = vmul.f32 %v3390_v42, %v2036_v36 }
 0x66b   :  { %3196 = vmatmul.msk.f32.vlgmr.msrb.gmra.mxu0 %vm491_vm0, %v6204_v27  ;;  %3197 = vmatmul.msk.f32.vlgmr.msra.gmra.mxu1 %vm491_vm0, %v6204_v27 }
 0x66c   :  { %3198 = vmatmul.msk.f32.vlgmr.msra.gmra.mxu2 %vm491_vm0, %v6204_v27  ;;  %3199 = vmatmul.msk.f32.vlgmr.msrb.gmra.mxu3 %vm491_vm0, %v6204_v27 }
 0x66d   :  { %2343 = vmatpush.msrb.mxu0 %v5556_v8  ;;  %2363 = vmatpush.msra.mxu1 %v5561_v62  ;;  %v7694_v8 = vld [vmem:[#allocation20_spill] sm:$0xff]  ;;  %v7695_v62 = vld [vmem:[#allocation47_spill] sm:$0xff] }
 0x66e   :  { %2383 = vmatpush.msra.mxu2 %v5620_v32  ;;  %2403 = vmatpush.msrb.mxu3 %v7656_v30  ;;  %v7698_v32 = vld [vmem:[#allocation30_spill] sm:$0xff]  ;;  %v7725_v30 = vld [vmem:[#allocation29_spill] sm:$0xff] }
 0x66f   :  { %2344 = vmatpush.msrb.mxu0 %v5566_v24  ;;  %2364 = vmatpush.msra.mxu1 %v7657_v21  ;;  %v7696_v24 = vld [vmem:[#allocation43_spill] sm:$0xff] }
 0x670   :  { %2384 = vmatpush.msra.mxu2 %v5626_v59  ;;  %2404 = vmatpush.msrb.mxu3 %v5594_v49  ;;  %v7697_v49 = vld [vmem:[#allocation51_spill] sm:$0xff]  ;;  %v7699_v59 = vld [vmem:[#allocation6_spill] sm:$0xff] }
 0x671   :  { %2345 = vmatpush.msrb.mxu0 %v7658_v40  ;;  %2365 = vmatpush.msra.mxu1 %v7659_v28 }
 0x672   :  { %2385 = vmatpush.msra.mxu2 %v5659_v58  ;;  %2405 = vmatpush.msrb.mxu3 %v7660_v39  ;;  %v7704_v58 = vld [vmem:[#allocation7_spill] sm:$0xff]  ;;  %v7724_v39 = vld [vmem:[#allocation66_spill] sm:$0xff] }
 0x673   :  { %2346 = vmatpush.msrb.mxu0 %v5632_v37  ;;  %2366 = vmatpush.msra.mxu1 %v5637_v50  ;;  %v7700_v37 = vld [vmem:[#allocation25_spill] sm:$0xff]  ;;  %v7701_v50 = vld [vmem:[#allocation16_spill] sm:$0xff]  ;;  %v1812_v21 = vadd.f32 %v7725_v30, %v7724_v39  ;;  %v6335_v30 = vld [vmem:[%s7071_s6 + $0x1c0] sm:$0xff] }
 0x674   :  { %2386 = vmatpush.msra.mxu2 %v5671_v0  ;;  %2406 = vmatpush.msrb.mxu3 %v5665_v63  ;;  %v7705_v63 = vld [vmem:[#allocation18_spill] sm:$0xff]  ;;  %v7706_v0 = vld [vmem:[#allocation8_spill] sm:$0xff] }
 0x675   :  { %2347 = vmatpush.msrb.mxu0 %v5649_v54  ;;  %2367 = vmatpush.msra.mxu1 %v5654_v57  ;;  %v7702_v54 = vld [vmem:[#allocation11_spill] sm:$0xff]  ;;  %v7703_v57 = vld [vmem:[#allocation13_spill] sm:$0xff] }
 0x676   :  { %2387 = vmatpush.msra.mxu2 %v5685_v7  ;;  %2407 = vmatpush.msrb.mxu3 %v5679_v4  ;;  %v7707_v4 = vld [vmem:[#allocation19_spill] sm:$0xff]  ;;  %v7708_v7 = vld [vmem:[#allocation24_spill] sm:$0xff] }
 0x677   :  { %2348 = vmatpush.msrb.mxu0 %v5694_v31  ;;  %2368 = vmatpush.msra.mxu1 %v5699_v17  ;;  %v7709_v31 = vld [vmem:[#allocation14_spill] sm:$0xff] }
 0x678   :  { %2388 = vmatpush.msra.mxu2 %v5713_v6  ;;  %2408 = vmatpush.msrb.mxu3 %v5705_v22  ;;  %v7710_v17 = vld [vmem:[#allocation22_spill] sm:$0xff]  ;;  %v7711_v22 = vld [vmem:[#allocation21_spill] sm:$0xff]  ;;  %v7712_v6 = vld [vmem:[#allocation28_spill] sm:$0xff] }
 0x679   :  { %2349 = vmatpush.msrb.mxu0 %v5718_v23  ;;  %2369 = vmatpush.msra.mxu1 %v5723_v35  ;;  %v7713_v23 = vld [vmem:[#allocation31_spill] sm:$0xff]  ;;  %v7714_v35 = vld [vmem:[#allocation36_spill] sm:$0xff] }
 0x67a   :  { %2389 = vmatpush.msra.mxu2 %v5737_v44  ;;  %2409 = vmatpush.msrb.mxu3 %v5729_v45  ;;  %v7715_v45 = vld [vmem:[#allocation15_spill] sm:$0xff]  ;;  %v7716_v44 = vld [vmem:[#allocation34_spill] sm:$0xff] }
 0x67b   :  { %2350 = vmatpush.msrb.mxu0 %v5742_v61  ;;  %2370 = vmatpush.msra.mxu1 %v5747_v1  ;;  %v7717_v61 = vld [vmem:[#allocation27_spill] sm:$0xff]  ;;  %v7718_v1 = vld [vmem:[#allocation9_spill] sm:$0xff] }
 0x67c   :  { %2390 = vmatpush.msra.mxu2 %v5796_v55  ;;  %2410 = vmatpush.msrb.mxu3 %v5766_v52  ;;  %v7721_v52 = vld [vmem:[#allocation26_spill] sm:$0xff] }
 0x67d   :  { %2351 = vmatpush.msrb.mxu0 %v5753_v3  ;;  %2371 = vmatpush.msra.mxu1 %v5761_v47  ;;  %v7719_v3 = vld [vmem:[#allocation33_spill] sm:$0xff] }
 0x67e   :  { %2391 = vmatpush.msra.mxu2 %v5820_v29  ;;  %2411 = vmatpush.msrb.mxu3 %v5784_v2  ;;  %v7720_v47 = vld [vmem:[#allocation45_spill] sm:$0xff]  ;;  %v7723_v2 = vld [vmem:[#allocation38_spill] sm:$0xff] }
 0x67f   :  { %2352 = vmatpush.msrb.mxu0 %v5774_v48  ;;  %2372 = vmatpush.msra.mxu1 %v5779_v41  ;;  %v1689_v48 = vadd.f32 %v7721_v52, %v7720_v47  ;;  %v7722_v41 = vld [vmem:[#allocation48_spill] sm:$0xff] }
 0x680   :  { %2392 = vmatpush.msra.mxu2 %v7694_v8  ;;  %2412 = vmatpush.msrb.mxu3 %v7695_v62  ;;  %v1730_v15 = vadd.f32 %v7723_v2, %v7722_v41 }
 0x681   :  { %2353 = vmatpush.msrb.mxu0 %v7696_v24  ;;  %2373 = vmatpush.msra.mxu1 %v7697_v49 }
 0x682   :  { %2393 = vmatpush.msra.mxu2 %v7698_v32  ;;  %2413 = vmatpush.msrb.mxu3 %v7699_v59 }
 0x683   :  { %2354 = vmatpush.msrb.mxu0 %v7700_v37  ;;  %2374 = vmatpush.msra.mxu1 %v7701_v50 }
 0x684   :  { %2394 = vmatpush.msra.mxu2 %v7702_v54  ;;  %2414 = vmatpush.msrb.mxu3 %v7703_v57 }
 0x685   :  { %2355 = vmatpush.msrb.mxu0 %v7704_v58  ;;  %2375 = vmatpush.msra.mxu1 %v7705_v63 }
 0x686   :  { %2395 = vmatpush.msra.mxu2 %v7706_v0  ;;  %2415 = vmatpush.msrb.mxu3 %v7707_v4 }
 0x687   :  { %2356 = vmatpush.msrb.mxu0 %v7708_v7  ;;  %2376 = vmatpush.msra.mxu1 %v7709_v31 }
 0x688   :  { %2396 = vmatpush.msra.mxu2 %v7710_v17  ;;  %2416 = vmatpush.msrb.mxu3 %v7711_v22  ;;  %v2044_v22 = vsel %vm491_vm0, %v6201_v43, 0.0 }
 0x689   :  { %2357 = vmatpush.msrb.mxu0 %v7712_v6  ;;  %2377 = vmatpush.msra.mxu1 %v7713_v23 }
 0x68a   :  { %2397 = vmatpush.msra.mxu2 %v7714_v35  ;;  %2417 = vmatpush.msrb.mxu3 %v7715_v45 }
 0x68b   :  { %2358 = vmatpush.msrb.mxu0 %v7716_v44  ;;  %2378 = vmatpush.msra.mxu1 %v7717_v61 }
 0x68c   :  { %2398 = vmatpush.msra.mxu2 %v7718_v1  ;;  %2418 = vmatpush.msrb.mxu3 %v7719_v3  ;;  %v6611_v3 = vld [vmem:[%s7071_s6 + $0x70] sm:$0xff] }
 0x68d   :  { %7742 = vst [vmem:[#allocation8_spill] sm:$0xff] %v6611_v3 }
 0x6e8   :  { %v2062_v55 = vpop.f32.mrf.mxu0  ;;  %v2082_v56 = vpop.f32.mrf.mxu1 }
 0x6e9   :  { %v2125_v46 = vadd.f32 %v2062_v55, %v1689_v48  ;;  %v2126_v29 = vadd.f32 %v2082_v56, %v1730_v15 }
 0x6eb   :  { %v3200_v14 = vmul.f32 -1.442695, %v2125_v46  ;;  %v3201_v25 = vmul.f32 -1.442695, %v2126_v29  ;;  %v2043_v46 = vsel %vm491_vm0, %v6204_v27, 0.0  ;;  %v6317_v27 = vld [vmem:[%s7071_s6 + $0x1e8] sm:$0xff] }
 0x6ed   :  { %3391 = vpow2.f32 %v3200_v14  ;;  %v6311_v14 = vld [vmem:[%s7071_s6 + $0x1e0] sm:$0xff] }
 0x6ee   :  { %3393 = vpow2.f32 %v3201_v25  ;;  %v6329_v25 = vld [vmem:[%s7071_s6 + $0x1f8] sm:$0xff] }
 0x6ef   :  { %v2122_v40 = vpop.f32.mrf.mxu3  ;;  %v2102_v11 = vpop.f32.mrf.mxu2 }
 0x6f0   :  { %v2128_v28 = vadd.f32 %v2122_v40, %v1812_v21  ;;  %v2127_v10 = vadd.f32 %v2102_v11, %v1771_v18  ;;  %v6341_v21 = vld [vmem:[%s7071_s6 + $0x1c8] sm:$0xff]  ;;  %v6347_v40 = vld [vmem:[%s7071_s6 + $0x1d0] sm:$0xff]  ;;  %v6407_v18 = vld [vmem:[%s7071_s6 + $0x160] sm:$0xff] }
 0x6f1   :  { %v6389_v11 = vld [vmem:[%s7071_s6 + $0x188] sm:$0xff] }
 0x6f2   :  { %v3202_v51 = vmul.f32 -1.442695, %v2128_v28  ;;  %v6353_v28 = vld [vmem:[%s7071_s6 + $0x1d8] sm:$0xff] }
 0x6f3   :  { %v3392_v60 = vpop.eup %3391 }
 0x6f4   :  { %v3394_v12 = vpop.eup %3393  ;;  %v2132_v9 = vadd.f32 1.0, %v3392_v60  ;;  %3395 = vpow2.f32 %v3202_v51  ;;  %v6359_v51 = vld [vmem:[%s7071_s6 + $0x1a0] sm:$0xff]  ;;  %v6365_v60 = vld [vmem:[%s7071_s6 + $0x1a8] sm:$0xff] }
 0x6f5   :  { %v2151_v26 = vadd.f32 1.0, %v3394_v12  ;;  %v6371_v12 = vld [vmem:[%s7071_s6 + $0x1b0] sm:$0xff] }
 0x6f6   :  { %3397 = vrcp.f32 %v2132_v9  ;;  %v2144_v8 = vand.u32 2147483648, %v2132_v9  ;;  %v2142_v49 = vand.u32 2147483647, %v2132_v9  ;;  %vm2138_vm8 = vweird.f32 %v2132_v9 }
 0x6f7   :  { %3399 = vrcp.f32 %v2151_v26  ;;  %v2163_v62 = vand.u32 2147483648, %v2151_v26  ;;  %v2161_v59 = vand.u32 2147483647, %v2151_v26  ;;  %vm2157_vm9 = vweird.f32 %v2151_v26 }
 0x6f8   :  { %v2145_v54 = vor.u32 1.1754944e-38, %v2144_v8  ;;  %vm2143_vm3 = vcmp.eq.f32.partialorder %v2142_v49, 8.507059e+37  ;;  %v6461_v8 = vld [vmem:[%s7071_s6 + $0x128] sm:$0xff]  ;;  %v6479_v49 = vld [vmem:[%s7071_s6 + $0x100] sm:$0xff] }
 0x6f9   :  { %v2164_v63 = vor.u32 1.1754944e-38, %v2163_v62  ;;  %vm2162_vm6 = vcmp.eq.f32.partialorder %v2161_v59, 8.507059e+37  ;;  %v6467_v62 = vld [vmem:[%s7071_s6 + $0x130] sm:$0xff] }
 0x6fa   :  { %v3396_v53 = vpop.eup %3395  ;;  %v6491_v59 = vld [vmem:[%s7071_s6 + $0x110] sm:$0xff] }
 0x6fb   :  { %v2171_v34 = vadd.f32 1.0, %v3396_v53  ;;  %v6395_v53 = vld [vmem:[%s7071_s6 + $0x190] sm:$0xff] }
 0x6fc   :  { %v3398_v20 = vpop.eup %3397 }
 0x6fd   :  { %v3400_v38 = vpop.eup %3399  ;;  %v2134_v5 = vmul.f32 %v3398_v20, %v2132_v9  ;;  %3401 = vrcp.f32 %v2171_v34  ;;  %vm2139_vm2 = vweird.f32 %v3398_v20  ;;  %v2183_v1 = vand.u32 2147483648, %v2171_v34  ;;  %v6377_v9 = vld [vmem:[%s7071_s6 + $0x1b8] sm:$0xff] }
 0x6fe   :  { %v2153_v33 = vmul.f32 %v3400_v38, %v2151_v26  ;;  %3403 = vtanh.f32 %v2127_v10  ;;  %vm2158_vm7 = vweird.f32 %v3400_v38  ;;  %vm2140_vm11 = vmor %vm2138_vm8, %vm2139_vm2  ;;  %vm2177_vm2 = vweird.f32 %v2171_v34  ;;  %v6383_v26 = vld [vmem:[%s7071_s6 + $0x180] sm:$0xff]  ;;  %v6425_v10 = vld [vmem:[%s7071_s6 + $0x178] sm:$0xff] }
 0x6ff   :  { %v2135_v42 = vsub.f32 1.0, %v2134_v5  ;;  %vm2159_vm15 = vmor %vm2157_vm9, %vm2158_vm7  ;;  %v2181_v48 = vand.u32 2147483647, %v2171_v34  ;;  %v2184_v15 = vor.u32 1.1754944e-38, %v2183_v1  ;;  %v6437_v5 = vld [vmem:[%s7071_s6 + $0x148] sm:$0xff] }
 0x700   :  { %v2154_v36 = vsub.f32 1.0, %v2153_v33  ;;  %v6443_v33 = vld [vmem:[%s7071_s6 + $0x150] sm:$0xff]  ;;  %v6605_v1 = vld [vmem:[%s7071_s6 + $0x68] sm:$0xff] }
 0x701   :  { %v2136_v24 = vmul.f32 %v3398_v20, %v2135_v42  ;;  %vm2182_vm8 = vcmp.eq.f32.partialorder %v2181_v48, 8.507059e+37  ;;  %v6449_v42 = vld [vmem:[%s7071_s6 + $0x158] sm:$0xff]  ;;  %7741 = vst [vmem:[#allocation18_spill] sm:$0xff] %v6605_v1 }
 0x702   :  { %v2155_v32 = vmul.f32 %v3400_v38, %v2154_v36  ;;  %v6455_v36 = vld [vmem:[%s7071_s6 + $0x120] sm:$0xff]  ;;  %v6617_v48 = vld [vmem:[%s7071_s6 + $0x78] sm:$0xff] }
 0x703   :  { %v3402_v37 = vpop.eup %3401  ;;  %v2137_v50 = vadd.f32 %v3398_v20, %v2136_v24  ;;  %v6473_v24 = vld [vmem:[%s7071_s6 + $0x138] sm:$0xff]  ;;  %7743 = vst [vmem:[#allocation19_spill] sm:$0xff] %v6617_v48 }
 0x704   :  { %v2156_v57 = vadd.f32 %v3400_v38, %v2155_v32  ;;  %v2173_v58 = vmul.f32 %v3402_v37, %v2171_v34  ;;  %v3404_v4 = vpop.eup %3403  ;;  %vm2178_vm5 = vweird.f32 %v3402_v37  ;;  %v6413_v34 = vld [vmem:[%s7071_s6 + $0x168] sm:$0xff] }
 0x705   :  { %v2141_v0 = vsel %vm2140_vm11, %v3398_v20, %v2137_v50  ;;  %vm2179_vm7 = vmor %vm2177_vm2, %vm2178_vm5  ;;  %v6419_v20 = vld [vmem:[%s7071_s6 + $0x170] sm:$0xff]  ;;  %v6485_v32 = vld [vmem:[%s7071_s6 + $0x108] sm:$0xff] }
 0x706   :  { %v2146_v7 = vsel %vm2143_vm3, %v2145_v54, %v2141_v0  ;;  %v2160_v31 = vsel %vm2159_vm15, %v3400_v38, %v2156_v57  ;;  %v2174_v17 = vsub.f32 1.0, %v2173_v58  ;;  %v6431_v38 = vld [vmem:[%s7071_s6 + $0x140] sm:$0xff]  ;;  %v6509_v54 = vld [vmem:[%s7071_s6 + $0xe8] sm:$0xff]  ;;  %v6515_v57 = vld [vmem:[%s7071_s6 + $0xf0] sm:$0xff] }
 0x707   :  { %v2165_v6 = vsel %vm2162_vm6, %v2164_v63, %v2160_v31  ;;  %v2188_v23 = vmul.f32 %v3404_v4, %v2146_v7  ;;  %v6503_v50 = vld [vmem:[%s7071_s6 + $0xe0] sm:$0xff]  ;;  %v6521_v58 = vld [vmem:[%s7071_s6 + $0xf8] sm:$0xff]  ;;  %v6533_v0 = vld [vmem:[%s7071_s6 + $0xc8] sm:$0xff] }
 0x708   :  { %v2187_v35 = vmul.f32 %v2165_v6, %v2044_v22  ;;  %v2175_v45 = vmul.f32 %v3402_v37, %v2174_v17  ;;  %v6527_v63 = vld [vmem:[%s7071_s6 + $0xc0] sm:$0xff]  ;;  %7729 = vst [vmem:[#allocation63_spill] sm:$0xff] %v6533_v0  ;;  %v6539_v4 = vld [vmem:[%s7071_s6 + $0xd0] sm:$0xff]  ;;  %v6545_v7 = vld [vmem:[%s7071_s6 + $0xd8] sm:$0xff] }
 0x709   :  { %7730 = vst [vmem:[#allocation20_spill] sm:$0xff] %v6539_v4  ;;  %v6551_v31 = vld [vmem:[%s7071_s6 + $0xa0] sm:$0xff]  ;;  %v6557_v17 = vld [vmem:[%s7071_s6 + $0xa8] sm:$0xff]  ;;  %v6569_v6 = vld [vmem:[%s7071_s6 + $0xb8] sm:$0xff] }
 0x70a   :  { %v2189_v44 = vadd.f32 %v2188_v23, %v2187_v35  ;;  %v2176_v61 = vadd.f32 %v3402_v37, %v2175_v45  ;;  %7731 = vst [vmem:[#allocation47_spill] sm:$0xff] %v6545_v7  ;;  %v6575_v23 = vld [vmem:[%s7071_s6 + $0x80] sm:$0xff]  ;;  %v6581_v35 = vld [vmem:[%s7071_s6 + $0x88] sm:$0xff]  ;;  %v6587_v45 = vld [vmem:[%s7071_s6 + $0x90] sm:$0xff] }
 0x70b   :  { %7732 = vst [vmem:[#allocation43_spill] sm:$0xff] %v6551_v31 }
 0x70c   :  { %3405 = vtanh.f32 %v2189_v44  ;;  %v6295_v52 = vsel %vm647_vm12, %v2189_v44, %v2044_v22  ;;  %v2180_v2 = vsel %vm2179_vm7, %v3402_v37, %v2176_v61  ;;  %v6497_v37 = vld [vmem:[%s7071_s6 + $0x118] sm:$0xff]  ;;  %7733 = vst [vmem:[#allocation51_spill] sm:$0xff] %v6557_v17  ;;  %v6563_v22 = vld [vmem:[%s7071_s6 + $0xb0] sm:$0xff]  ;;  %v6599_v61 = vld [vmem:[%s7071_s6 + $0x60] sm:$0xff] }
 0x70d   :  { %v2185_v55 = vsel %vm2182_vm8, %v2184_v15, %v2180_v2  ;;  %7734 = vst [vmem:[#allocation30_spill] sm:$0xff] %v6563_v22  ;;  %v6593_v44 = vld [vmem:[%s7071_s6 + $0x98] sm:$0xff]  ;;  %v6623_v2 = vld [vmem:[%s7071_s6 + $0x40] sm:$0xff]  ;;  %v6629_v15 = vld [vmem:[%s7071_s6 + $0x48] sm:$0xff] }
 0x70e   :  { %7735 = vst [vmem:[#allocation6_spill] sm:$0xff] %v6569_v6 }
 0x70f   :  { %7736 = vst [vmem:[#allocation25_spill] sm:$0xff] %v6575_v23 }
 0x710   :  { %7737 = vst [vmem:[#allocation16_spill] sm:$0xff] %v6581_v35 }
 0x711   :  { %7738 = vst [vmem:[#allocation11_spill] sm:$0xff] %v6587_v45 }
 0x712   :  { %v3406_v43 = vpop.eup %3405  ;;  %7739 = vst [vmem:[#allocation13_spill] sm:$0xff] %v6593_v44 }
 0x713   :  { %v2191_v56 = vmul.f32 %v3406_v43, %v2185_v55  ;;  %7740 = vst [vmem:[#allocation7_spill] sm:$0xff] %v6599_v61  ;;  %v6635_v43 = vld [vmem:[%s7071_s6 + $0x50] sm:$0xff]  ;;  %v6641_v55 = vld [vmem:[%s7071_s6 + $0x58] sm:$0xff] }
 0x714   :  { %7744 = vst [vmem:[#allocation24_spill] sm:$0xff] %v6623_v2 }
 0x715   :  { %v6302_v29 = vsel %vm647_vm12, %v2191_v56, %v2043_v46  ;;  %7745 = vst [vmem:[#allocation14_spill] sm:$0xff] %v6629_v15  ;;  %v6647_v56 = vld [vmem:[%s7071_s6 + $0x20] sm:$0xff]  ;;  %v6653_v46 = vld [vmem:[%s7071_s6 + $0x28] sm:$0xff] }
 0x716   :  { %2210 = vmatmul.f32.vlgmr.msra.gmra.mxu0 %v6302_v29  ;;  %2230 = vmatmul.f32.vlgmr.msrb.gmra.mxu1 %v6302_v29  ;;  %7746 = vst [vmem:[#allocation22_spill] sm:$0xff] %v6635_v43 }
 0x717   :  { %2250 = vmatmul.f32.vlgmr.msrb.gmra.mxu2 %v6302_v29  ;;  %2270 = vmatmul.f32.vlgmr.msra.gmra.mxu3 %v6302_v29  ;;  %7747 = vst [vmem:[#allocation21_spill] sm:$0xff] %v6641_v55 }
 0x718   :  { %2492 = vmatpush.msra.mxu0 %v6311_v14  ;;  %2512 = vmatpush.msrb.mxu1 %v6317_v27  ;;  %7748 = vst [vmem:[#allocation28_spill] sm:$0xff] %v6647_v56 }
 0x719   :  { %2532 = vmatpush.msrb.mxu2 %v6323_v16  ;;  %2552 = vmatpush.msra.mxu3 %v6329_v25  ;;  %7749 = vst [vmem:[#allocation31_spill] sm:$0xff] %v6653_v46 }
 0x71a   :  { %2493 = vmatpush.msra.mxu0 %v6335_v30  ;;  %2513 = vmatpush.msrb.mxu1 %v6341_v21 }
 0x71b   :  { %2533 = vmatpush.msrb.mxu2 %v6347_v40  ;;  %2553 = vmatpush.msra.mxu3 %v6353_v28 }
 0x71c   :  { %2494 = vmatpush.msra.mxu0 %v6359_v51  ;;  %2514 = vmatpush.msrb.mxu1 %v6365_v60 }
 0x71d   :  { %2534 = vmatpush.msrb.mxu2 %v6371_v12  ;;  %2554 = vmatpush.msra.mxu3 %v6377_v9 }
 0x71e   :  { %2495 = vmatpush.msra.mxu0 %v6383_v26  ;;  %2515 = vmatpush.msrb.mxu1 %v6389_v11 }
 0x71f   :  { %2535 = vmatpush.msrb.mxu2 %v6395_v53  ;;  %2555 = vmatpush.msra.mxu3 %v6401_v13 }
 0x720   :  { %2496 = vmatpush.msra.mxu0 %v6407_v18  ;;  %2516 = vmatpush.msrb.mxu1 %v6413_v34 }
 0x721   :  { %2536 = vmatpush.msrb.mxu2 %v6419_v20  ;;  %2556 = vmatpush.msra.mxu3 %v6425_v10 }
 0x722   :  { %2497 = vmatpush.msra.mxu0 %v6431_v38  ;;  %2517 = vmatpush.msrb.mxu1 %v6437_v5 }
 0x723   :  { %2537 = vmatpush.msrb.mxu2 %v6443_v33  ;;  %2557 = vmatpush.msra.mxu3 %v6449_v42 }
 0x724   :  { %2498 = vmatpush.msra.mxu0 %v6455_v36  ;;  %2518 = vmatpush.msrb.mxu1 %v6461_v8 }
 0x725   :  { %2538 = vmatpush.msrb.mxu2 %v6467_v62  ;;  %2558 = vmatpush.msra.mxu3 %v6473_v24 }
 0x726   :  { %2499 = vmatpush.msra.mxu0 %v6479_v49  ;;  %2519 = vmatpush.msrb.mxu1 %v6485_v32 }
 0x727   :  { %2539 = vmatpush.msrb.mxu2 %v6491_v59  ;;  %2559 = vmatpush.msra.mxu3 %v6497_v37 }
 0x728   :  { %2500 = vmatpush.msra.mxu0 %v6503_v50  ;;  %2520 = vmatpush.msrb.mxu1 %v6509_v54 }
 0x729   :  { %2540 = vmatpush.msrb.mxu2 %v6515_v57  ;;  %2560 = vmatpush.msra.mxu3 %v6521_v58 }
 0x72a   :  { %2501 = vmatpush.msra.mxu0 %v6527_v63  ;;  %2521 = vmatpush.msrb.mxu1 %v6533_v0 }
 0x72b   :  { %2541 = vmatpush.msrb.mxu2 %v6539_v4  ;;  %2561 = vmatpush.msra.mxu3 %v6545_v7 }
 0x72c   :  { %2502 = vmatpush.msra.mxu0 %v6551_v31  ;;  %2522 = vmatpush.msrb.mxu1 %v6557_v17 }
 0x72d   :  { %2542 = vmatpush.msrb.mxu2 %v6563_v22  ;;  %2562 = vmatpush.msra.mxu3 %v6569_v6 }
 0x72e   :  { %2503 = vmatpush.msra.mxu0 %v6575_v23  ;;  %2523 = vmatpush.msrb.mxu1 %v6581_v35 }
 0x72f   :  { %2543 = vmatpush.msrb.mxu2 %v6587_v45  ;;  %2563 = vmatpush.msra.mxu3 %v6593_v44 }
 0x730   :  { %2504 = vmatpush.msra.mxu0 %v6599_v61  ;;  %2524 = vmatpush.msrb.mxu1 %v6605_v1 }
 0x731   :  { %2544 = vmatpush.msrb.mxu2 %v6611_v3  ;;  %2564 = vmatpush.msra.mxu3 %v6617_v48 }
 0x732   :  { %2505 = vmatpush.msra.mxu0 %v6623_v2  ;;  %2525 = vmatpush.msrb.mxu1 %v6629_v15  ;;  %v7757_v2 = vld [vmem:[#allocation4_spill] sm:$0xff] }
 0x733   :  { %2545 = vmatpush.msrb.mxu2 %v6635_v43  ;;  %2565 = vmatpush.msra.mxu3 %v6641_v55  ;;  %v6659_v43 = vld [vmem:[%s7071_s6 + $0x30] sm:$0xff]  ;;  %v6665_v55 = vld [vmem:[%s7071_s6 + $0x38] sm:$0xff] }
 0x734   :  { %2506 = vmatpush.msra.mxu0 %v6647_v56  ;;  %2526 = vmatpush.msrb.mxu1 %v6653_v46  ;;  %7750 = vst [vmem:[#allocation36_spill] sm:$0xff] %v6659_v43  ;;  %v6671_v56 = vld [vmem:[%s7071_s6] sm:$0xff]  ;;  %v6677_v46 = vld [vmem:[%s7071_s6 + $0x8] sm:$0xff] }
 0x735   :  { %2546 = vmatpush.msrb.mxu2 %v6659_v43  ;;  %7751 = vst [vmem:[#allocation15_spill] sm:$0xff] %v6665_v55  ;;  %2566 = vmatpush.msra.mxu3 %v6665_v55  ;;  %v6683_v43 = vld [vmem:[%s7071_s6 + $0x10] sm:$0xff]  ;;  %v6689_v55 = vld [vmem:[%s7071_s6 + $0x18] sm:$0xff] }
 0x736   :  { %7752 = vst [vmem:[#allocation34_spill] sm:$0xff] %v6671_v56  ;;  %2507 = vmatpush.msra.mxu0 %v6671_v56  ;;  %2527 = vmatpush.msrb.mxu1 %v6677_v46  ;;  %v7756_v56 = vld [vmem:[#allocation50_spill] sm:$0xff] }
 0x737   :  { %7753 = vst [vmem:[#allocation27_spill] sm:$0xff] %v6677_v46  ;;  %2547 = vmatpush.msrb.mxu2 %v6683_v43  ;;  %2567 = vmatpush.msra.mxu3 %v6689_v55  ;;  %v1692_v15 = vadd.f32 %v7756_v56, %v7720_v47  ;;  %v1733_v46 = vadd.f32 %v7757_v2, %v7722_v41 }
 0x738   :  { %7754 = vst [vmem:[#allocation9_spill] sm:$0xff] %v6683_v43  ;;  %v7758_v43 = vld [vmem:[#allocation52_spill] sm:$0xff] }
 0x739   :  { %7755 = vst [vmem:[#allocation33_spill] sm:$0xff] %v6689_v55  ;;  %v1815_v35 = vadd.f32 %v7758_v43, %v7724_v39 }
 0x793   :  { %v2211_v48 = vpop.f32.mrf.mxu0  ;;  %v2231_v3 = vpop.f32.mrf.mxu1 }
 0x794   :  { %v2274_v1 = vadd.f32 %v2211_v48, %v1692_v15  ;;  %v2275_v61 = vadd.f32 %v2231_v3, %v1733_v46 }
 0x796   :  { %v3203_v44 = vmul.f32 -1.442695, %v2274_v1  ;;  %v3204_v45 = vmul.f32 -1.442695, %v2275_v61  ;;  %v7759_v1 = vld [vmem:[#allocation61_spill] sm:$0xff] }
 0x797   :  { %v1774_v61 = vadd.f32 %v7759_v1, %v7726_v19 }
 0x798   :  { %3407 = vpow2.f32 %v3203_v44 }
 0x799   :  { %3409 = vpow2.f32 %v3204_v45 }
 0x79a   :  { %v2271_v23 = vpop.f32.mrf.mxu3  ;;  %v2251_v2 = vpop.f32.mrf.mxu2 }
 0x79b   :  { %v2277_v6 = vadd.f32 %v2271_v23, %v1815_v35  ;;  %v2276_v15 = vadd.f32 %v2251_v2, %v1774_v61 }
 0x79d   :  { %v3205_v55 = vmul.f32 -1.442695, %v2277_v6 }
 0x79e   :  { %v3408_v22 = vpop.eup %3407 }
 0x79f   :  { %v3410_v17 = vpop.eup %3409  ;;  %v2281_v56 = vadd.f32 1.0, %v3408_v22  ;;  %3411 = vpow2.f32 %v3205_v55 }
 0x7a0   :  { %v2300_v47 = vadd.f32 1.0, %v3410_v17 }
 0x7a1   :  { %3413 = vrcp.f32 %v2281_v56  ;;  %v2293_v46 = vand.u32 2147483648, %v2281_v56  ;;  %v2291_v55 = vand.u32 2147483647, %v2281_v56  ;;  %vm2287_vm9 = vweird.f32 %v2281_v56 }
 0x7a2   :  { %3415 = vrcp.f32 %v2300_v47  ;;  %v2312_v22 = vand.u32 2147483648, %v2300_v47  ;;  %v2310_v41 = vand.u32 2147483647, %v2300_v47  ;;  %vm2306_vm11 = vweird.f32 %v2300_v47 }
 0x7a3   :  { %v2294_v2 = vor.u32 1.1754944e-38, %v2293_v46  ;;  %vm2292_vm6 = vcmp.eq.f32.partialorder %v2291_v55, 8.507059e+37  ;;  %v7779_v46 = vld [vmem:[#allocation21_spill] sm:$0xff] }
 0x7a4   :  { %vm2311_vm5 = vcmp.eq.f32.partialorder %v2310_v41, 8.507059e+37 }
 0x7a5   :  { %v3412_v48 = vpop.eup %3411 }
 0x7a6   :  { %v2320_v44 = vadd.f32 1.0, %v3412_v48 }
 0x7a7   :  { %v3414_v3 = vpop.eup %3413 }
 0x7a8   :  { %v3416_v43 = vpop.eup %3415  ;;  %v2283_v45 = vmul.f32 %v3414_v3, %v2281_v56  ;;  %3417 = vrcp.f32 %v2320_v44  ;;  %vm2288_vm0 = vweird.f32 %v3414_v3  ;;  %vm2326_vm7 = vweird.f32 %v2320_v44 }
 0x7a9   :  { %v2302_v23 = vmul.f32 %v3416_v43, %v2300_v47  ;;  %3419 = vtanh.f32 %v2276_v15  ;;  %vm2307_vm12 = vweird.f32 %v3416_v43  ;;  %vm2289_vm15 = vmor %vm2287_vm9, %vm2288_vm0 }
 0x7aa   :  { %v2284_v6 = vsub.f32 1.0, %v2283_v45  ;;  %vm2308_vm3 = vmor %vm2306_vm11, %vm2307_vm12  ;;  %v2313_v45 = vor.u32 1.1754944e-38, %v2312_v22  ;;  %v2330_v22 = vand.u32 2147483647, %v2320_v44 }
 0x7ab   :  { %v2303_v35 = vsub.f32 1.0, %v2302_v23 }
 0x7ac   :  { %v2285_v17 = vmul.f32 %v3414_v3, %v2284_v6  ;;  %vm2331_vm0 = vcmp.eq.f32.partialorder %v2330_v22, 8.507059e+37  ;;  %v7780_v22 = vld [vmem:[#allocation28_spill] sm:$0xff] }
 0x7ad   :  { %v2304_v39 = vmul.f32 %v3416_v43, %v2303_v35 }
 0x7ae   :  { %v3418_v31 = vpop.eup %3417  ;;  %v2286_v1 = vadd.f32 %v3414_v3, %v2285_v17 }
 0x7af   :  { %v2305_v48 = vadd.f32 %v3416_v43, %v2304_v39  ;;  %v2322_v61 = vmul.f32 %v3418_v31, %v2320_v44  ;;  %v3420_v15 = vpop.eup %3419  ;;  %vm2327_vm2 = vweird.f32 %v3418_v31  ;;  %v2332_v39 = vand.u32 2147483648, %v2320_v44  ;;  %v7766_v44 = vld [vmem:[#allocation30_spill] sm:$0xff] }
 0x7b0   :  { %v2290_v23 = vsel %vm2289_vm15, %v3414_v3, %v2286_v1  ;;  %vm2328_vm8 = vmor %vm2326_vm7, %vm2327_vm2 }
 0x7b1   :  { %v2295_v19 = vsel %vm2292_vm6, %v2294_v2, %v2290_v23  ;;  %v2309_v6 = vsel %vm2308_vm3, %v3416_v43, %v2305_v48  ;;  %v2323_v7 = vsub.f32 1.0, %v2322_v61  ;;  %v2333_v43 = vor.u32 1.1754944e-38, %v2332_v39  ;;  %v7767_v2 = vld [vmem:[#allocation6_spill] sm:$0xff]  ;;  %v7768_v48 = vld [vmem:[#allocation25_spill] sm:$0xff]  ;;  %v7769_v61 = vld [vmem:[#allocation16_spill] sm:$0xff] }
 0x7b2   :  { %v2314_v35 = vsel %vm2311_vm5, %v2313_v45, %v2309_v6  ;;  %v2337_v4 = vmul.f32 %v3420_v15, %v2295_v19  ;;  %v7770_v45 = vld [vmem:[#allocation11_spill] sm:$0xff]  ;;  %v7771_v23 = vld [vmem:[#allocation13_spill] sm:$0xff]  ;;  %v7773_v6 = vld [vmem:[#allocation18_spill] sm:$0xff] }
 0x7b3   :  { %v2336_v0 = vmul.f32 %v2314_v35, %v6295_v52  ;;  %v2324_v17 = vmul.f32 %v3418_v31, %v2323_v7  ;;  %v7764_v7 = vld [vmem:[#allocation43_spill] sm:$0xff]  ;;  %v7774_v35 = vld [vmem:[#allocation8_spill] sm:$0xff]  ;;  %v7778_v39 = vld [vmem:[#allocation22_spill] sm:$0xff] }
 0x7b4   :  { %v7772_v15 = vld [vmem:[#allocation7_spill] sm:$0xff] }
 0x7b5   :  { %v2338_v56 = vadd.f32 %v2337_v4, %v2336_v0  ;;  %v2325_v47 = vadd.f32 %v3418_v31, %v2324_v17  ;;  %v7763_v4 = vld [vmem:[#allocation47_spill] sm:$0xff] }
 0x7b6   :  { %v7775_v17 = vld [vmem:[#allocation19_spill] sm:$0xff] }
 0x7b7   :  { %3421 = vtanh.f32 %v2338_v56  ;;  %v6704_v3 = vsel %vm803_vm10, %v2338_v56, %v6295_v52  ;;  %v2329_v41 = vsel %vm2328_vm8, %v3418_v31, %v2325_v47  ;;  %v7761_v52 = vld [vmem:[#allocation63_spill] sm:$0xff]  ;;  %v7776_v56 = vld [vmem:[#allocation24_spill] sm:$0xff]  ;;  %v7777_v47 = vld [vmem:[#allocation14_spill] sm:$0xff] }
 0x7b8   :  { %v2334_v55 = vsel %vm2331_vm0, %v2333_v43, %v2329_v41  ;;  %v7765_v31 = vld [vmem:[#allocation51_spill] sm:$0xff]  ;;  %v7782_v43 = vld [vmem:[#allocation36_spill] sm:$0xff] }
 0x7b9   :  { %v7781_v41 = vld [vmem:[#allocation31_spill] sm:$0xff] }
 0x7bd   :  { %v3422_v19 = vpop.eup %3421 }
 0x7be   :  { %v2340_v1 = vmul.f32 %v3422_v19, %v2334_v55  ;;  %v7783_v19 = vld [vmem:[#allocation15_spill] sm:$0xff]  ;;  %v7784_v55 = vld [vmem:[#allocation34_spill] sm:$0xff] }
 0x7c0   :  { %v6709_v0 = vsel %vm803_vm10, %v2340_v1, %v6302_v29  ;;  %v7762_v29 = vld [vmem:[#allocation20_spill] sm:$0xff]  ;;  %v7785_v1 = vld [vmem:[#allocation27_spill] sm:$0xff] }
 0x7c1   :  { %2359 = vmatmul.f32.vlgmr.msrb.gmra.mxu0 %v6709_v0  ;;  %2379 = vmatmul.f32.vlgmr.msra.gmra.mxu1 %v6709_v0 }
 0x7c2   :  { %2399 = vmatmul.f32.vlgmr.msra.gmra.mxu2 %v6709_v0  ;;  %2419 = vmatmul.f32.vlgmr.msrb.gmra.mxu3 %v6709_v0 }
 0x7c3   :  { %2641 = vmatpush.msrb.mxu0 %v6311_v14  ;;  %2661 = vmatpush.msra.mxu1 %v6317_v27 }
 0x7c4   :  { %2681 = vmatpush.msra.mxu2 %v6323_v16  ;;  %2701 = vmatpush.msrb.mxu3 %v6329_v25 }
 0x7c5   :  { %2642 = vmatpush.msrb.mxu0 %v6335_v30  ;;  %2662 = vmatpush.msra.mxu1 %v6341_v21 }
 0x7c6   :  { %2682 = vmatpush.msra.mxu2 %v6347_v40  ;;  %2702 = vmatpush.msrb.mxu3 %v6353_v28 }
 0x7c7   :  { %2643 = vmatpush.msrb.mxu0 %v6359_v51  ;;  %2663 = vmatpush.msra.mxu1 %v6365_v60 }
 0x7c8   :  { %2683 = vmatpush.msra.mxu2 %v6371_v12  ;;  %2703 = vmatpush.msrb.mxu3 %v6377_v9 }
 0x7c9   :  { %2644 = vmatpush.msrb.mxu0 %v6383_v26  ;;  %2664 = vmatpush.msra.mxu1 %v6389_v11 }
 0x7ca   :  { %2684 = vmatpush.msra.mxu2 %v6395_v53  ;;  %2704 = vmatpush.msrb.mxu3 %v6401_v13 }
 0x7cb   :  { %2645 = vmatpush.msrb.mxu0 %v6407_v18  ;;  %2665 = vmatpush.msra.mxu1 %v6413_v34 }
 0x7cc   :  { %2685 = vmatpush.msra.mxu2 %v6419_v20  ;;  %2705 = vmatpush.msrb.mxu3 %v6425_v10 }
 0x7cd   :  { %2646 = vmatpush.msrb.mxu0 %v6431_v38  ;;  %2666 = vmatpush.msra.mxu1 %v6437_v5 }
 0x7ce   :  { %2686 = vmatpush.msra.mxu2 %v6443_v33  ;;  %2706 = vmatpush.msrb.mxu3 %v6449_v42 }
 0x7cf   :  { %2647 = vmatpush.msrb.mxu0 %v6455_v36  ;;  %2667 = vmatpush.msra.mxu1 %v6461_v8 }
 0x7d0   :  { %2687 = vmatpush.msra.mxu2 %v6467_v62  ;;  %2707 = vmatpush.msrb.mxu3 %v6473_v24 }
 0x7d1   :  { %2648 = vmatpush.msrb.mxu0 %v6479_v49  ;;  %2668 = vmatpush.msra.mxu1 %v6485_v32 }
 0x7d2   :  { %2688 = vmatpush.msra.mxu2 %v6491_v59  ;;  %2708 = vmatpush.msrb.mxu3 %v6497_v37 }
 0x7d3   :  { %2649 = vmatpush.msrb.mxu0 %v6503_v50  ;;  %2669 = vmatpush.msra.mxu1 %v6509_v54 }
 0x7d4   :  { %2689 = vmatpush.msra.mxu2 %v6515_v57  ;;  %2709 = vmatpush.msrb.mxu3 %v6521_v58 }
 0x7d5   :  { %2650 = vmatpush.msrb.mxu0 %v6527_v63  ;;  %2670 = vmatpush.msra.mxu1 %v7761_v52 }
 0x7d6   :  { %2690 = vmatpush.msra.mxu2 %v7762_v29  ;;  %2710 = vmatpush.msrb.mxu3 %v7763_v4 }
 0x7d7   :  { %2651 = vmatpush.msrb.mxu0 %v7764_v7  ;;  %2671 = vmatpush.msra.mxu1 %v7765_v31 }
 0x7d8   :  { %2691 = vmatpush.msra.mxu2 %v7766_v44  ;;  %2711 = vmatpush.msrb.mxu3 %v7767_v2 }
 0x7d9   :  { %2652 = vmatpush.msrb.mxu0 %v7768_v48  ;;  %2672 = vmatpush.msra.mxu1 %v7769_v61  ;;  %v7793_v61 = vld [vmem:[#allocation55_spill] sm:$0xff] }
 0x7da   :  { %2692 = vmatpush.msra.mxu2 %v7770_v45  ;;  %2712 = vmatpush.msrb.mxu3 %v7771_v23 }
 0x7db   :  { %2653 = vmatpush.msrb.mxu0 %v7772_v15  ;;  %2673 = vmatpush.msra.mxu1 %v7773_v6  ;;  %v7791_v6 = vld [vmem:[#allocation46_spill] sm:$0xff] }
 0x7dc   :  { %2693 = vmatpush.msra.mxu2 %v7774_v35  ;;  %2713 = vmatpush.msrb.mxu3 %v7775_v17  ;;  %v7786_v17 = vld [vmem:[#allocation9_spill] sm:$0xff] }
 0x7dd   :  { %2654 = vmatpush.msrb.mxu0 %v7776_v56  ;;  %2674 = vmatpush.msra.mxu1 %v7777_v47  ;;  %v7787_v56 = vld [vmem:[#allocation33_spill] sm:$0xff] }
 0x7de   :  { %2694 = vmatpush.msra.mxu2 %v7778_v39  ;;  %2714 = vmatpush.msrb.mxu3 %v7779_v46  ;;  %v7788_v47 = vld [vmem:[#allocation45_spill] sm:$0xff]  ;;  %v7789_v39 = vld [vmem:[#allocation56_spill] sm:$0xff] }
 0x7df   :  { %2655 = vmatpush.msrb.mxu0 %v7780_v22  ;;  %2675 = vmatpush.msra.mxu1 %v7781_v41  ;;  %v1695_v35 = vadd.f32 %v7789_v39, %v7788_v47  ;;  %v7790_v46 = vld [vmem:[#allocation48_spill] sm:$0xff] }
 0x7e0   :  { %2695 = vmatpush.msra.mxu2 %v7782_v43  ;;  %2715 = vmatpush.msrb.mxu3 %v7783_v19  ;;  %v1736_v22 = vadd.f32 %v7791_v6, %v7790_v46 }
 0x7e1   :  { %2656 = vmatpush.msrb.mxu0 %v7784_v55  ;;  %2676 = vmatpush.msra.mxu1 %v7785_v1  ;;  %v7792_v55 = vld [vmem:[#allocation66_spill] sm:$0xff] }
 0x7e2   :  { %2696 = vmatpush.msra.mxu2 %v7786_v17  ;;  %2716 = vmatpush.msrb.mxu3 %v7787_v56  ;;  %v1818_v1 = vadd.f32 %v7793_v61, %v7792_v55 }
 0x83e   :  { %v2360_v15 = vpop.f32.mrf.mxu0  ;;  %v2380_v41 = vpop.f32.mrf.mxu1 }
 0x83f   :  { %v2423_v23 = vadd.f32 %v2360_v15, %v1695_v35  ;;  %v2424_v43 = vadd.f32 %v2380_v41, %v1736_v22  ;;  %v7794_v35 = vld [vmem:[#allocation68_spill] sm:$0xff] }
 0x841   :  { %v3206_v45 = vmul.f32 -1.442695, %v2423_v23  ;;  %v3207_v19 = vmul.f32 -1.442695, %v2424_v43  ;;  %v7795_v23 = vld [vmem:[#allocation49_spill] sm:$0xff] }
 0x842   :  { %v1777_v22 = vadd.f32 %v7795_v23, %v7794_v35 }
 0x843   :  { %3423 = vpow2.f32 %v3206_v45 }
 0x844   :  { %3425 = vpow2.f32 %v3207_v19 }
 0x845   :  { %v2420_v17 = vpop.f32.mrf.mxu3  ;;  %v2400_v6 = vpop.f32.mrf.mxu2 }
 0x846   :  { %v2426_v48 = vadd.f32 %v2420_v17, %v1818_v1  ;;  %v2425_v43 = vadd.f32 %v2400_v6, %v1777_v22 }
 0x848   :  { %v3208_v56 = vmul.f32 -1.442695, %v2426_v48 }
 0x849   :  { %v3424_v2 = vpop.eup %3423 }
 0x84a   :  { %v3426_v44 = vpop.eup %3425  ;;  %v2430_v39 = vadd.f32 1.0, %v3424_v2  ;;  %3427 = vpow2.f32 %v3208_v56 }
 0x84b   :  { %v2449_v47 = vadd.f32 1.0, %v3426_v44 }
 0x84c   :  { %3429 = vrcp.f32 %v2430_v39  ;;  %v2442_v55 = vand.u32 2147483648, %v2430_v39  ;;  %v2440_v56 = vand.u32 2147483647, %v2430_v39  ;;  %vm2436_vm9 = vweird.f32 %v2430_v39 }
 0x84d   :  { %3431 = vrcp.f32 %v2449_v47  ;;  %v2461_v2 = vand.u32 2147483648, %v2449_v47  ;;  %v2459_v31 = vand.u32 2147483647, %v2449_v47  ;;  %vm2455_vm11 = vweird.f32 %v2449_v47 }
 0x84e   :  { %v2443_v6 = vor.u32 1.1754944e-38, %v2442_v55  ;;  %vm2441_vm6 = vcmp.eq.f32.partialorder %v2440_v56, 8.507059e+37  ;;  %v7815_v55 = vld [vmem:[#allocation21_spill] sm:$0xff] }
 0x84f   :  { %vm2460_vm5 = vcmp.eq.f32.partialorder %v2459_v31, 8.507059e+37 }
 0x850   :  { %v3428_v15 = vpop.eup %3427 }
 0x851   :  { %v2469_v45 = vadd.f32 1.0, %v3428_v15 }
 0x852   :  { %v3430_v41 = vpop.eup %3429 }
 0x853   :  { %v3432_v61 = vpop.eup %3431  ;;  %v2432_v19 = vmul.f32 %v3430_v41, %v2430_v39  ;;  %3433 = vrcp.f32 %v2469_v45  ;;  %vm2437_vm10 = vweird.f32 %v3430_v41  ;;  %vm2475_vm7 = vweird.f32 %v2469_v45 }
 0x854   :  { %v2451_v17 = vmul.f32 %v3432_v61, %v2449_v47  ;;  %3435 = vtanh.f32 %v2425_v43  ;;  %vm2456_vm12 = vweird.f32 %v3432_v61  ;;  %vm2438_vm15 = vmor %vm2436_vm9, %vm2437_vm10 }
 0x855   :  { %v2433_v48 = vsub.f32 1.0, %v2432_v19  ;;  %vm2457_vm3 = vmor %vm2455_vm11, %vm2456_vm12  ;;  %v2462_v19 = vor.u32 1.1754944e-38, %v2461_v2  ;;  %v2479_v2 = vand.u32 2147483647, %v2469_v45 }
 0x856   :  { %v2452_v1 = vsub.f32 1.0, %v2451_v17 }
 0x857   :  { %v2434_v44 = vmul.f32 %v3430_v41, %v2433_v48  ;;  %vm2480_vm0 = vcmp.eq.f32.partialorder %v2479_v2, 8.507059e+37  ;;  %v7816_v2 = vld [vmem:[#allocation28_spill] sm:$0xff] }
 0x858   :  { %v2453_v46 = vmul.f32 %v3432_v61, %v2452_v1 }
 0x859   :  { %v3434_v7 = vpop.eup %3433  ;;  %v2435_v23 = vadd.f32 %v3430_v41, %v2434_v44 }
 0x85a   :  { %v2454_v15 = vadd.f32 %v3432_v61, %v2453_v46  ;;  %v2471_v22 = vmul.f32 %v3434_v7, %v2469_v45  ;;  %v3436_v43 = vpop.eup %3435  ;;  %vm2476_vm2 = vweird.f32 %v3434_v7  ;;  %v2481_v46 = vand.u32 2147483648, %v2469_v45  ;;  %v7802_v45 = vld [vmem:[#allocation30_spill] sm:$0xff] }
 0x85b   :  { %v2439_v17 = vsel %vm2438_vm15, %v3430_v41, %v2435_v23  ;;  %vm2477_vm8 = vmor %vm2475_vm7, %vm2476_vm2 }
 0x85c   :  { %v2444_v35 = vsel %vm2441_vm6, %v2443_v6, %v2439_v17  ;;  %v2458_v48 = vsel %vm2457_vm3, %v3432_v61, %v2454_v15  ;;  %v2472_v4 = vsub.f32 1.0, %v2471_v22  ;;  %v2482_v61 = vor.u32 1.1754944e-38, %v2481_v46  ;;  %v7803_v6 = vld [vmem:[#allocation6_spill] sm:$0xff]  ;;  %v7804_v15 = vld [vmem:[#allocation25_spill] sm:$0xff]  ;;  %v7805_v22 = vld [vmem:[#allocation16_spill] sm:$0xff] }
 0x85d   :  { %v2463_v1 = vsel %vm2460_vm5, %v2462_v19, %v2458_v48  ;;  %v2486_v29 = vmul.f32 %v3436_v43, %v2444_v35  ;;  %v7806_v19 = vld [vmem:[#allocation11_spill] sm:$0xff]  ;;  %v7807_v17 = vld [vmem:[#allocation13_spill] sm:$0xff]  ;;  %v7809_v48 = vld [vmem:[#allocation18_spill] sm:$0xff] }
 0x85e   :  { %v2485_v52 = vmul.f32 %v2463_v1, %v6704_v3  ;;  %v2473_v44 = vmul.f32 %v3434_v7, %v2472_v4  ;;  %v7800_v4 = vld [vmem:[#allocation43_spill] sm:$0xff]  ;;  %v7810_v1 = vld [vmem:[#allocation8_spill] sm:$0xff]  ;;  %v7814_v46 = vld [vmem:[#allocation22_spill] sm:$0xff] }
 0x85f   :  { %v7808_v43 = vld [vmem:[#allocation7_spill] sm:$0xff] }
 0x860   :  { %v2487_v39 = vadd.f32 %v2486_v29, %v2485_v52  ;;  %v2474_v47 = vadd.f32 %v3434_v7, %v2473_v44  ;;  %v7799_v29 = vld [vmem:[#allocation47_spill] sm:$0xff] }
 0x861   :  { %v7811_v44 = vld [vmem:[#allocation19_spill] sm:$0xff] }
 0x862   :  { %3437 = vtanh.f32 %v2487_v39  ;;  %v6791_v41 = vsel %vm959_vm13, %v2487_v39, %v6704_v3  ;;  %v2478_v31 = vsel %vm2477_vm8, %v3434_v7, %v2474_v47  ;;  %v7797_v3 = vld [vmem:[#allocation63_spill] sm:$0xff]  ;;  %v7812_v39 = vld [vmem:[#allocation24_spill] sm:$0xff]  ;;  %v7813_v47 = vld [vmem:[#allocation14_spill] sm:$0xff] }
 0x863   :  { %v2483_v56 = vsel %vm2480_vm0, %v2482_v61, %v2478_v31  ;;  %v7801_v7 = vld [vmem:[#allocation51_spill] sm:$0xff]  ;;  %v7818_v61 = vld [vmem:[#allocation36_spill] sm:$0xff] }
 0x864   :  { %v7817_v31 = vld [vmem:[#allocation31_spill] sm:$0xff] }
 0x868   :  { %v3438_v35 = vpop.eup %3437 }
 0x869   :  { %v2489_v23 = vmul.f32 %v3438_v35, %v2483_v56  ;;  %v7819_v35 = vld [vmem:[#allocation15_spill] sm:$0xff]  ;;  %v7820_v56 = vld [vmem:[#allocation34_spill] sm:$0xff] }
 0x86b   :  { %v6796_v52 = vsel %vm959_vm13, %v2489_v23, %v6709_v0  ;;  %v7798_v0 = vld [vmem:[#allocation20_spill] sm:$0xff]  ;;  %v7821_v23 = vld [vmem:[#allocation27_spill] sm:$0xff] }
 0x86c   :  { %2508 = vmatmul.f32.vlgmr.msra.gmra.mxu0 %v6796_v52  ;;  %2528 = vmatmul.f32.vlgmr.msrb.gmra.mxu1 %v6796_v52 }
 0x86d   :  { %2548 = vmatmul.f32.vlgmr.msrb.gmra.mxu2 %v6796_v52  ;;  %2568 = vmatmul.f32.vlgmr.msra.gmra.mxu3 %v6796_v52 }
 0x86e   :  { %2790 = vmatpush.msra.mxu0 %v6311_v14  ;;  %2810 = vmatpush.msrb.mxu1 %v6317_v27 }
 0x86f   :  { %2830 = vmatpush.msrb.mxu2 %v6323_v16  ;;  %2850 = vmatpush.msra.mxu3 %v6329_v25 }
 0x870   :  { %2791 = vmatpush.msra.mxu0 %v6335_v30  ;;  %2811 = vmatpush.msrb.mxu1 %v6341_v21 }
 0x871   :  { %2831 = vmatpush.msrb.mxu2 %v6347_v40  ;;  %2851 = vmatpush.msra.mxu3 %v6353_v28 }
 0x872   :  { %2792 = vmatpush.msra.mxu0 %v6359_v51  ;;  %2812 = vmatpush.msrb.mxu1 %v6365_v60 }
 0x873   :  { %2832 = vmatpush.msrb.mxu2 %v6371_v12  ;;  %2852 = vmatpush.msra.mxu3 %v6377_v9 }
 0x874   :  { %2793 = vmatpush.msra.mxu0 %v6383_v26  ;;  %2813 = vmatpush.msrb.mxu1 %v6389_v11 }
 0x875   :  { %2833 = vmatpush.msrb.mxu2 %v6395_v53  ;;  %2853 = vmatpush.msra.mxu3 %v6401_v13 }
 0x876   :  { %2794 = vmatpush.msra.mxu0 %v6407_v18  ;;  %2814 = vmatpush.msrb.mxu1 %v6413_v34 }
 0x877   :  { %2834 = vmatpush.msrb.mxu2 %v6419_v20  ;;  %2854 = vmatpush.msra.mxu3 %v6425_v10 }
 0x878   :  { %2795 = vmatpush.msra.mxu0 %v6431_v38  ;;  %2815 = vmatpush.msrb.mxu1 %v6437_v5 }
 0x879   :  { %2835 = vmatpush.msrb.mxu2 %v6443_v33  ;;  %2855 = vmatpush.msra.mxu3 %v6449_v42 }
 0x87a   :  { %2796 = vmatpush.msra.mxu0 %v6455_v36  ;;  %2816 = vmatpush.msrb.mxu1 %v6461_v8 }
 0x87b   :  { %2836 = vmatpush.msrb.mxu2 %v6467_v62  ;;  %2856 = vmatpush.msra.mxu3 %v6473_v24 }
 0x87c   :  { %2797 = vmatpush.msra.mxu0 %v6479_v49  ;;  %2817 = vmatpush.msrb.mxu1 %v6485_v32 }
 0x87d   :  { %2837 = vmatpush.msrb.mxu2 %v6491_v59  ;;  %2857 = vmatpush.msra.mxu3 %v6497_v37 }
 0x87e   :  { %2798 = vmatpush.msra.mxu0 %v6503_v50  ;;  %2818 = vmatpush.msrb.mxu1 %v6509_v54 }
 0x87f   :  { %2838 = vmatpush.msrb.mxu2 %v6515_v57  ;;  %2858 = vmatpush.msra.mxu3 %v6521_v58 }
 0x880   :  { %2799 = vmatpush.msra.mxu0 %v6527_v63  ;;  %2819 = vmatpush.msrb.mxu1 %v7797_v3 }
 0x881   :  { %2839 = vmatpush.msrb.mxu2 %v7798_v0  ;;  %2859 = vmatpush.msra.mxu3 %v7799_v29 }
 0x882   :  { %2800 = vmatpush.msra.mxu0 %v7800_v4  ;;  %2820 = vmatpush.msrb.mxu1 %v7801_v7 }
 0x883   :  { %2840 = vmatpush.msrb.mxu2 %v7802_v45  ;;  %2860 = vmatpush.msra.mxu3 %v7803_v6 }
 0x884   :  { %2801 = vmatpush.msra.mxu0 %v7804_v15  ;;  %2821 = vmatpush.msrb.mxu1 %v7805_v22  ;;  %v7829_v22 = vld [vmem:[#allocation59_spill] sm:$0xff] }
 0x885   :  { %2841 = vmatpush.msrb.mxu2 %v7806_v19  ;;  %2861 = vmatpush.msra.mxu3 %v7807_v17 }
 0x886   :  { %2802 = vmatpush.msra.mxu0 %v7808_v43  ;;  %2822 = vmatpush.msrb.mxu1 %v7809_v48  ;;  %v7827_v48 = vld [vmem:[#allocation54_spill] sm:$0xff] }
 0x887   :  { %2842 = vmatpush.msrb.mxu2 %v7810_v1  ;;  %2862 = vmatpush.msra.mxu3 %v7811_v44  ;;  %v7822_v44 = vld [vmem:[#allocation9_spill] sm:$0xff] }
 0x888   :  { %2803 = vmatpush.msra.mxu0 %v7812_v39  ;;  %2823 = vmatpush.msrb.mxu1 %v7813_v47  ;;  %v7823_v39 = vld [vmem:[#allocation33_spill] sm:$0xff] }
 0x889   :  { %2843 = vmatpush.msrb.mxu2 %v7814_v46  ;;  %2863 = vmatpush.msra.mxu3 %v7815_v55  ;;  %v7824_v47 = vld [vmem:[#allocation45_spill] sm:$0xff]  ;;  %v7826_v55 = vld [vmem:[#allocation48_spill] sm:$0xff] }
 0x88a   :  { %2804 = vmatpush.msra.mxu0 %v7816_v2  ;;  %2824 = vmatpush.msrb.mxu1 %v7817_v31  ;;  %v7825_v46 = vld [vmem:[#allocation5_spill] sm:$0xff]  ;;  %v1739_v2 = vadd.f32 %v7827_v48, %v7826_v55 }
 0x88b   :  { %2844 = vmatpush.msrb.mxu2 %v7818_v61  ;;  %2864 = vmatpush.msra.mxu3 %v7819_v35  ;;  %v1698_v1 = vadd.f32 %v7825_v46, %v7824_v47 }
 0x88c   :  { %2805 = vmatpush.msra.mxu0 %v7820_v56  ;;  %2825 = vmatpush.msrb.mxu1 %v7821_v23  ;;  %v7828_v56 = vld [vmem:[#allocation66_spill] sm:$0xff] }
 0x88d   :  { %2845 = vmatpush.msrb.mxu2 %v7822_v44  ;;  %2865 = vmatpush.msra.mxu3 %v7823_v39  ;;  %v1821_v23 = vadd.f32 %v7829_v22, %v7828_v56 }
 0x8e9   :  { %v2509_v43 = vpop.f32.mrf.mxu0  ;;  %v2529_v31 = vpop.f32.mrf.mxu1 }
 0x8ea   :  { %v2572_v17 = vadd.f32 %v2509_v43, %v1698_v1  ;;  %v2573_v61 = vadd.f32 %v2529_v31, %v1739_v2  ;;  %v7830_v1 = vld [vmem:[#allocation68_spill] sm:$0xff] }
 0x8ec   :  { %v3209_v19 = vmul.f32 -1.442695, %v2572_v17  ;;  %v3210_v35 = vmul.f32 -1.442695, %v2573_v61  ;;  %v7831_v17 = vld [vmem:[#allocation10_spill] sm:$0xff] }
 0x8ed   :  { %v1780_v2 = vadd.f32 %v7831_v17, %v7830_v1 }
 0x8ee   :  { %3439 = vpow2.f32 %v3209_v19 }
 0x8ef   :  { %3441 = vpow2.f32 %v3210_v35 }
 0x8f0   :  { %v2569_v44 = vpop.f32.mrf.mxu3  ;;  %v2549_v48 = vpop.f32.mrf.mxu2 }
 0x8f1   :  { %v2575_v15 = vadd.f32 %v2569_v44, %v1821_v23  ;;  %v2574_v61 = vadd.f32 %v2549_v48, %v1780_v2 }
 0x8f3   :  { %v3211_v39 = vmul.f32 -1.442695, %v2575_v15 }
 0x8f4   :  { %v3440_v6 = vpop.eup %3439 }
 0x8f5   :  { %v3442_v45 = vpop.eup %3441  ;;  %v2579_v46 = vadd.f32 1.0, %v3440_v6  ;;  %3443 = vpow2.f32 %v3211_v39 }
 0x8f6   :  { %v2598_v47 = vadd.f32 1.0, %v3442_v45 }
 0x8f7   :  { %3445 = vrcp.f32 %v2579_v46  ;;  %v2591_v56 = vand.u32 2147483648, %v2579_v46  ;;  %v2589_v39 = vand.u32 2147483647, %v2579_v46  ;;  %vm2585_vm12 = vweird.f32 %v2579_v46 }
 0x8f8   :  { %3447 = vrcp.f32 %v2598_v47  ;;  %v2610_v6 = vand.u32 2147483648, %v2598_v47  ;;  %v2608_v7 = vand.u32 2147483647, %v2598_v47  ;;  %vm2604_vm9 = vweird.f32 %v2598_v47 }
 0x8f9   :  { %v2592_v48 = vor.u32 1.1754944e-38, %v2591_v56  ;;  %vm2590_vm3 = vcmp.eq.f32.partialorder %v2589_v39, 8.507059e+37 }
 0x8fa   :  { %vm2609_vm6 = vcmp.eq.f32.partialorder %v2608_v7, 8.507059e+37 }
 0x8fb   :  { %v3444_v43 = vpop.eup %3443 }
 0x8fc   :  { %v2618_v19 = vadd.f32 1.0, %v3444_v43 }
 0x8fd   :  { %v3446_v31 = vpop.eup %3445 }
 0x8fe   :  { %v3448_v22 = vpop.eup %3447  ;;  %v2581_v35 = vmul.f32 %v3446_v31, %v2579_v46  ;;  %3449 = vrcp.f32 %v2618_v19  ;;  %vm2586_vm13 = vweird.f32 %v3446_v31  ;;  %vm2624_vm2 = vweird.f32 %v2618_v19 }
 0x8ff   :  { %v2600_v44 = vmul.f32 %v3448_v22, %v2598_v47  ;;  %3451 = vtanh.f32 %v2574_v61  ;;  %vm2605_vm10 = vweird.f32 %v3448_v22  ;;  %vm2587_vm11 = vmor %vm2585_vm12, %vm2586_vm13 }
 0x900   :  { %v2582_v15 = vsub.f32 1.0, %v2581_v35  ;;  %vm2606_vm15 = vmor %vm2604_vm9, %vm2605_vm10  ;;  %v2611_v35 = vor.u32 1.1754944e-38, %v2610_v6  ;;  %v2628_v6 = vand.u32 2147483647, %v2618_v19 }
 0x901   :  { %v2601_v23 = vsub.f32 1.0, %v2600_v44 }
 0x902   :  { %v2583_v45 = vmul.f32 %v3446_v31, %v2582_v15  ;;  %vm2629_vm8 = vcmp.eq.f32.partialorder %v2628_v6, 8.507059e+37 }
 0x903   :  { %v2602_v55 = vmul.f32 %v3448_v22, %v2601_v23 }
 0x904   :  { %v3450_v4 = vpop.eup %3449  ;;  %v2584_v17 = vadd.f32 %v3446_v31, %v2583_v45 }
 0x905   :  { %v2603_v43 = vadd.f32 %v3448_v22, %v2602_v55  ;;  %v2620_v2 = vmul.f32 %v3450_v4, %v2618_v19  ;;  %v3452_v61 = vpop.eup %3451  ;;  %vm2625_vm5 = vweird.f32 %v3450_v4  ;;  %v2630_v55 = vand.u32 2147483648, %v2618_v19 }
 0x906   :  { %v2588_v44 = vsel %vm2587_vm11, %v3446_v31, %v2584_v17  ;;  %vm2626_vm7 = vmor %vm2624_vm2, %vm2625_vm5 }
 0x907   :  { %v2593_v1 = vsel %vm2590_vm3, %v2592_v48, %v2588_v44  ;;  %v2607_v15 = vsel %vm2606_vm15, %v3448_v22, %v2603_v43  ;;  %v2621_v29 = vsub.f32 1.0, %v2620_v2  ;;  %v2631_v22 = vor.u32 1.1754944e-38, %v2630_v55 }
 0x908   :  { %v2612_v23 = vsel %vm2609_vm6, %v2611_v35, %v2607_v15  ;;  %v2635_v0 = vmul.f32 %v3452_v61, %v2593_v1 }
 0x909   :  { %v2634_v3 = vmul.f32 %v2612_v23, %v6791_v41  ;;  %v2622_v45 = vmul.f32 %v3450_v4, %v2621_v29  ;;  %v7865_v29 = vld [vmem:[#allocation32_spill] sm:$0xff] }
 0x90b   :  { %v2636_v46 = vadd.f32 %v2635_v0, %v2634_v3  ;;  %v2623_v47 = vadd.f32 %v3450_v4, %v2622_v45  ;;  %v7864_v0 = vld [vmem:[#allocation66_spill] sm:$0xff]  ;;  %v7866_v45 = vld [vmem:[#allocation68_spill] sm:$0xff] }
 0x90d   :  { %3453 = vtanh.f32 %v2636_v46  ;;  %v6878_v31 = vsel %vm1115_vm14, %v2636_v46, %v6791_v41  ;;  %v2627_v7 = vsel %vm2626_vm7, %v3450_v4, %v2623_v47  ;;  %v1824_v4 = vadd.f32 %v7865_v29, %v7864_v0  ;;  %v7867_v46 = vld [vmem:[#allocation60_spill] sm:$0xff] }
 0x90e   :  { %v2632_v39 = vsel %vm2629_vm8, %v2631_v22, %v2627_v7  ;;  %v1783_v47 = vadd.f32 %v7867_v46, %v7866_v45 }
 0x913   :  { %v3454_v1 = vpop.eup %3453 }
 0x914   :  { %v2638_v17 = vmul.f32 %v3454_v1, %v2632_v39 }
 0x916   :  { %v6883_v3 = vsel %vm1115_vm14, %v2638_v17, %v6796_v52 }
 0x917   :  { %2657 = vmatmul.f32.vlgmr.msrb.gmra.mxu0 %v6883_v3  ;;  %2677 = vmatmul.f32.vlgmr.msra.gmra.mxu1 %v6883_v3 }
 0x918   :  { %2697 = vmatmul.f32.vlgmr.msra.gmra.mxu2 %v6883_v3  ;;  %2717 = vmatmul.f32.vlgmr.msrb.gmra.mxu3 %v6883_v3 }
 0x919   :  { %2939 = vmatpush.msrb.mxu0 %v6311_v14  ;;  %2959 = vmatpush.msra.mxu1 %v6317_v27  ;;  %v7833_v14 = vld [vmem:[#allocation63_spill] sm:$0xff]  ;;  %v7834_v27 = vld [vmem:[#allocation20_spill] sm:$0xff] }
 0x91a   :  { %2979 = vmatpush.msra.mxu2 %v6323_v16  ;;  %2999 = vmatpush.msrb.mxu3 %v6329_v25  ;;  %v7835_v16 = vld [vmem:[#allocation47_spill] sm:$0xff] }
 0x91b   :  { %2940 = vmatpush.msrb.mxu0 %v6335_v30  ;;  %2960 = vmatpush.msra.mxu1 %v6341_v21  ;;  %v7836_v25 = vld [vmem:[#allocation43_spill] sm:$0xff]  ;;  %v7838_v21 = vld [vmem:[#allocation30_spill] sm:$0xff] }
 0x91c   :  { %2980 = vmatpush.msra.mxu2 %v6347_v40  ;;  %3000 = vmatpush.msrb.mxu3 %v6353_v28  ;;  %v7837_v30 = vld [vmem:[#allocation51_spill] sm:$0xff]  ;;  %v7839_v40 = vld [vmem:[#allocation6_spill] sm:$0xff]  ;;  %v7840_v28 = vld [vmem:[#allocation25_spill] sm:$0xff] }
 0x91d   :  { %2941 = vmatpush.msrb.mxu0 %v6359_v51  ;;  %2961 = vmatpush.msra.mxu1 %v6365_v60  ;;  %v7841_v51 = vld [vmem:[#allocation16_spill] sm:$0xff]  ;;  %v7842_v60 = vld [vmem:[#allocation11_spill] sm:$0xff] }
 0x91e   :  { %2981 = vmatpush.msra.mxu2 %v6371_v12  ;;  %3001 = vmatpush.msrb.mxu3 %v6377_v9  ;;  %v7843_v12 = vld [vmem:[#allocation13_spill] sm:$0xff]  ;;  %v7844_v9 = vld [vmem:[#allocation7_spill] sm:$0xff] }
 0x91f   :  { %2942 = vmatpush.msrb.mxu0 %v6383_v26  ;;  %2962 = vmatpush.msra.mxu1 %v6389_v11  ;;  %v7845_v26 = vld [vmem:[#allocation18_spill] sm:$0xff]  ;;  %v7846_v11 = vld [vmem:[#allocation8_spill] sm:$0xff] }
 0x920   :  { %2982 = vmatpush.msra.mxu2 %v6395_v53  ;;  %3002 = vmatpush.msrb.mxu3 %v6401_v13  ;;  %v7847_v53 = vld [vmem:[#allocation19_spill] sm:$0xff]  ;;  %v7848_v13 = vld [vmem:[#allocation24_spill] sm:$0xff] }
 0x921   :  { %2943 = vmatpush.msrb.mxu0 %v6407_v18  ;;  %2963 = vmatpush.msra.mxu1 %v6413_v34  ;;  %v7849_v18 = vld [vmem:[#allocation14_spill] sm:$0xff] }
 0x922   :  { %2983 = vmatpush.msra.mxu2 %v6419_v20  ;;  %3003 = vmatpush.msrb.mxu3 %v6425_v10  ;;  %v7850_v34 = vld [vmem:[#allocation22_spill] sm:$0xff]  ;;  %v7851_v20 = vld [vmem:[#allocation21_spill] sm:$0xff]  ;;  %v7852_v10 = vld [vmem:[#allocation28_spill] sm:$0xff] }
 0x923   :  { %2944 = vmatpush.msrb.mxu0 %v6431_v38  ;;  %2964 = vmatpush.msra.mxu1 %v6437_v5  ;;  %v7853_v38 = vld [vmem:[#allocation31_spill] sm:$0xff]  ;;  %v7854_v5 = vld [vmem:[#allocation36_spill] sm:$0xff] }
 0x924   :  { %2984 = vmatpush.msra.mxu2 %v6443_v33  ;;  %3004 = vmatpush.msrb.mxu3 %v6449_v42  ;;  %v7855_v33 = vld [vmem:[#allocation15_spill] sm:$0xff]  ;;  %v7856_v42 = vld [vmem:[#allocation34_spill] sm:$0xff] }
 0x925   :  { %2945 = vmatpush.msrb.mxu0 %v6455_v36  ;;  %2965 = vmatpush.msra.mxu1 %v6461_v8  ;;  %v7857_v36 = vld [vmem:[#allocation27_spill] sm:$0xff]  ;;  %v7858_v8 = vld [vmem:[#allocation9_spill] sm:$0xff] }
 0x926   :  { %2985 = vmatpush.msra.mxu2 %v6467_v62  ;;  %3005 = vmatpush.msrb.mxu3 %v6473_v24  ;;  %v7859_v62 = vld [vmem:[#allocation33_spill] sm:$0xff] }
 0x927   :  { %2946 = vmatpush.msrb.mxu0 %v6479_v49  ;;  %2966 = vmatpush.msra.mxu1 %v6485_v32  ;;  %v7860_v24 = vld [vmem:[#allocation45_spill] sm:$0xff]  ;;  %v7861_v49 = vld [vmem:[#allocation62_spill] sm:$0xff] }
 0x928   :  { %2986 = vmatpush.msra.mxu2 %v6491_v59  ;;  %3006 = vmatpush.msrb.mxu3 %v6497_v37  ;;  %v1701_v32 = vadd.f32 %v7861_v49, %v7860_v24  ;;  %v7862_v59 = vld [vmem:[#allocation48_spill] sm:$0xff] }
 0x929   :  { %2947 = vmatpush.msrb.mxu0 %v6503_v50  ;;  %2967 = vmatpush.msra.mxu1 %v6509_v54  ;;  %v7863_v37 = vld [vmem:[#allocation12_spill] sm:$0xff] }
 0x92a   :  { %2987 = vmatpush.msra.mxu2 %v6515_v57  ;;  %3007 = vmatpush.msrb.mxu3 %v6521_v58  ;;  %v1742_v50 = vadd.f32 %v7863_v37, %v7862_v59 }
 0x92b   :  { %2948 = vmatpush.msrb.mxu0 %v6527_v63  ;;  %2968 = vmatpush.msra.mxu1 %v7833_v14 }
 0x92c   :  { %2988 = vmatpush.msra.mxu2 %v7834_v27  ;;  %3008 = vmatpush.msrb.mxu3 %v7835_v16 }
 0x92d   :  { %2949 = vmatpush.msrb.mxu0 %v7836_v25  ;;  %2969 = vmatpush.msra.mxu1 %v7837_v30 }
 0x92e   :  { %2989 = vmatpush.msra.mxu2 %v7838_v21  ;;  %3009 = vmatpush.msrb.mxu3 %v7839_v40 }
 0x92f   :  { %2950 = vmatpush.msrb.mxu0 %v7840_v28  ;;  %2970 = vmatpush.msra.mxu1 %v7841_v51 }
 0x930   :  { %2990 = vmatpush.msra.mxu2 %v7842_v60  ;;  %3010 = vmatpush.msrb.mxu3 %v7843_v12 }
 0x931   :  { %2951 = vmatpush.msrb.mxu0 %v7844_v9  ;;  %2971 = vmatpush.msra.mxu1 %v7845_v26 }
 0x932   :  { %2991 = vmatpush.msra.mxu2 %v7846_v11  ;;  %3011 = vmatpush.msrb.mxu3 %v7847_v53 }
 0x933   :  { %2952 = vmatpush.msrb.mxu0 %v7848_v13  ;;  %2972 = vmatpush.msra.mxu1 %v7849_v18 }
 0x934   :  { %2992 = vmatpush.msra.mxu2 %v7850_v34  ;;  %3012 = vmatpush.msrb.mxu3 %v7851_v20 }
 0x935   :  { %2953 = vmatpush.msrb.mxu0 %v7852_v10  ;;  %2973 = vmatpush.msra.mxu1 %v7853_v38 }
 0x936   :  { %2993 = vmatpush.msra.mxu2 %v7854_v5  ;;  %3013 = vmatpush.msrb.mxu3 %v7855_v33 }
 0x937   :  { %2954 = vmatpush.msrb.mxu0 %v7856_v42  ;;  %2974 = vmatpush.msra.mxu1 %v7857_v36 }
 0x938   :  { %2994 = vmatpush.msra.mxu2 %v7858_v8  ;;  %3014 = vmatpush.msrb.mxu3 %v7859_v62 }
 0x994   :  { %v2658_v54 = vpop.f32.mrf.mxu0  ;;  %v2678_v57 = vpop.f32.mrf.mxu1 }
 0x995   :  { %v2721_v58 = vadd.f32 %v2658_v54, %v1701_v32  ;;  %v2722_v63 = vadd.f32 %v2678_v57, %v1742_v50 }
 0x997   :  { %v3212_v41 = vmul.f32 -1.442695, %v2721_v58  ;;  %v3213_v52 = vmul.f32 -1.442695, %v2722_v63  ;;  %v7870_v63 = vld [vmem:[#allocation53_spill] sm:$0xff] }
 0x999   :  { %3455 = vpow2.f32 %v3212_v41  ;;  %v1745_v41 = vadd.f32 %v7870_v63, %v7862_v59 }
 0x99a   :  { %3457 = vpow2.f32 %v3213_v52 }
 0x99b   :  { %v2718_v19 = vpop.f32.mrf.mxu3  ;;  %v2698_v15 = vpop.f32.mrf.mxu2 }
 0x99c   :  { %v2724_v48 = vadd.f32 %v2718_v19, %v1824_v4  ;;  %v2723_v6 = vadd.f32 %v2698_v15, %v1783_v47 }
 0x99e   :  { %v3214_v43 = vmul.f32 -1.442695, %v2724_v48 }
 0x99f   :  { %v3456_v2 = vpop.eup %3455 }
 0x9a0   :  { %v3458_v35 = vpop.eup %3457  ;;  %v2728_v44 = vadd.f32 1.0, %v3456_v2  ;;  %3459 = vpow2.f32 %v3214_v43  ;;  %v7871_v43 = vld [vmem:[#allocation44_spill] sm:$0xff] }
 0x9a1   :  { %v2747_v61 = vadd.f32 1.0, %v3458_v35  ;;  %v1827_v2 = vadd.f32 %v7871_v43, %v7864_v0  ;;  %v3096_v43 = vld [vmem:[%s7074_s8 + $0x48] sm:$0xff] }
 0x9a2   :  { %3461 = vrcp.f32 %v2728_v44  ;;  %v2740_v14 = vand.u32 2147483648, %v2728_v44  ;;  %v2738_v25 = vand.u32 2147483647, %v2728_v44  ;;  %vm2734_vm13 = vweird.f32 %v2728_v44 }
 0x9a3   :  { %3463 = vrcp.f32 %v2747_v61  ;;  %v2759_v27 = vand.u32 2147483648, %v2747_v61  ;;  %v2757_v21 = vand.u32 2147483647, %v2747_v61  ;;  %vm2753_vm10 = vweird.f32 %v2747_v61 }
 0x9a4   :  { %v2741_v51 = vor.u32 1.1754944e-38, %v2740_v14  ;;  %vm2739_vm11 = vcmp.eq.f32.partialorder %v2738_v25, 8.507059e+37 }
 0x9a5   :  { %v2760_v9 = vor.u32 1.1754944e-38, %v2759_v27  ;;  %vm2758_vm15 = vcmp.eq.f32.partialorder %v2757_v21, 8.507059e+37 }
 0x9a6   :  { %v3460_v23 = vpop.eup %3459 }
 0x9a7   :  { %v2767_v55 = vadd.f32 1.0, %v3460_v23 }
 0x9a8   :  { %v3462_v56 = vpop.eup %3461 }
 0x9a9   :  { %v3464_v7 = vpop.eup %3463  ;;  %v2730_v22 = vmul.f32 %v3462_v56, %v2728_v44  ;;  %3465 = vrcp.f32 %v2767_v55  ;;  %vm2735_vm14 = vweird.f32 %v3462_v56  ;;  %v2779_v42 = vand.u32 2147483648, %v2767_v55 }
 0x9aa   :  { %v2749_v1 = vmul.f32 %v3464_v7, %v2747_v61  ;;  %3467 = vtanh.f32 %v2723_v6  ;;  %vm2754_vm0 = vweird.f32 %v3464_v7  ;;  %vm2736_vm12 = vmor %vm2734_vm13, %vm2735_vm14  ;;  %vm2773_vm6 = vweird.f32 %v2767_v55  ;;  %v7872_v6 = vld [vmem:[#allocation64_spill] sm:$0xff] }
 0x9ab   :  { %v2731_v39 = vsub.f32 1.0, %v2730_v22  ;;  %vm2755_vm9 = vmor %vm2753_vm10, %vm2754_vm0  ;;  %v2777_v62 = vand.u32 2147483647, %v2767_v55  ;;  %v2780_v32 = vor.u32 1.1754944e-38, %v2779_v42 }
 0x9ac   :  { %v2750_v17 = vsub.f32 1.0, %v2749_v1 }
 0x9ad   :  { %v2732_v16 = vmul.f32 %v3462_v56, %v2731_v39  ;;  %vm2778_vm2 = vcmp.eq.f32.partialorder %v2777_v62, 8.507059e+37 }
 0x9ae   :  { %v2751_v30 = vmul.f32 %v3464_v7, %v2750_v17 }
 0x9af   :  { %v3466_v40 = vpop.eup %3465  ;;  %v2733_v28 = vadd.f32 %v3462_v56, %v2732_v16 }
 0x9b0   :  { %v2752_v60 = vadd.f32 %v3464_v7, %v2751_v30  ;;  %v2769_v12 = vmul.f32 %v3466_v40, %v2767_v55  ;;  %v3468_v11 = vpop.eup %3467  ;;  %vm2774_vm3 = vweird.f32 %v3466_v40 }
 0x9b1   :  { %v2737_v26 = vsel %vm2736_vm12, %v3462_v56, %v2733_v28  ;;  %vm2775_vm5 = vmor %vm2773_vm6, %vm2774_vm3 }
 0x9b2   :  { %v2742_v53 = vsel %vm2739_vm11, %v2741_v51, %v2737_v26  ;;  %v2756_v13 = vsel %vm2755_vm9, %v3464_v7, %v2752_v60  ;;  %v2770_v18 = vsub.f32 1.0, %v2769_v12  ;;  %v1786_v7 = vadd.f32 %v7872_v6, %v7866_v45  ;;  %v3093_v6 = vld [vmem:[%s7074_s8 + $0x30] sm:$0xff] }
 0x9b3   :  { %v2761_v34 = vsel %vm2758_vm15, %v2760_v9, %v2756_v13  ;;  %v2784_v20 = vmul.f32 %v3468_v11, %v2742_v53 }
 0x9b4   :  { %v2783_v10 = vmul.f32 %v2761_v34, %v6878_v31  ;;  %v2771_v38 = vmul.f32 %v3466_v40, %v2770_v18 }
 0x9b6   :  { %v2785_v5 = vadd.f32 %v2784_v20, %v2783_v10  ;;  %v2772_v33 = vadd.f32 %v3466_v40, %v2771_v38 }
 0x9b8   :  { %3469 = vtanh.f32 %v2785_v5  ;;  %v6965_v8 = vsel %vm1271_vm1, %v2785_v5, %v6878_v31  ;;  %v2776_v49 = vsel %vm2775_vm5, %v3466_v40, %v2772_v33  ;;  %v7869_v31 = vld [vmem:[#allocation57_spill] sm:$0xff] }
 0x9b9   :  { %v2781_v50 = vsel %vm2778_vm2, %v2780_v32, %v2776_v49  ;;  %v1704_v58 = vadd.f32 %v7869_v31, %v7860_v24 }
 0x9be   :  { %v3470_v37 = vpop.eup %3469 }
 0x9bf   :  { %v2787_v54 = vmul.f32 %v3470_v37, %v2781_v50 }
 0x9c1   :  { %v6970_v57 = vsel %vm1271_vm1, %v2787_v54, %v6883_v3 }
 0x9c2   :  { %2806 = vmatmul.f32.vlgmr.msra.gmra.mxu0 %v6970_v57  ;;  %2826 = vmatmul.f32.vlgmr.msrb.gmra.mxu1 %v6970_v57 }
 0x9c3   :  { %2846 = vmatmul.f32.vlgmr.msrb.gmra.mxu2 %v6970_v57  ;;  %2866 = vmatmul.f32.vlgmr.msra.gmra.mxu3 %v6970_v57 }
 0xa3f   :  { %v2807_v52 = vpop.f32.mrf.mxu0  ;;  %v2827_v29 = vpop.f32.mrf.mxu1 }
 0xa40   :  { %v2870_v4 = vadd.f32 %v2807_v52, %v1704_v58  ;;  %v2871_v19 = vadd.f32 %v2827_v29, %v1745_v41 }
 0xa42   :  { %v3215_v3 = vmul.f32 -1.442695, %v2870_v4  ;;  %v3216_v48 = vmul.f32 -1.442695, %v2871_v19  ;;  %v3101_v4 = vld [vmem:[%s7074_s8 + $0x70] sm:$0xff]  ;;  %v3099_v19 = vld [vmem:[%s7074_s8 + $0x60] sm:$0xff] }
 0xa44   :  { %3471 = vpow2.f32 %v3215_v3  ;;  %v3098_v3 = vld [vmem:[%s7074_s8 + $0x58] sm:$0xff] }
 0xa45   :  { %3473 = vpow2.f32 %v3216_v48  ;;  %v3097_v48 = vld [vmem:[%s7074_s8 + $0x50] sm:$0xff] }
 0xa46   :  { %v2867_v35 = vpop.f32.mrf.mxu3  ;;  %v2847_v55 = vpop.f32.mrf.mxu2 }
 0xa47   :  { %v2873_v44 = vadd.f32 %v2867_v35, %v1827_v2  ;;  %v2872_v39 = vadd.f32 %v2847_v55, %v1786_v7  ;;  %v3095_v2 = vld [vmem:[%s7074_s8 + $0x40] sm:$0xff]  ;;  %v7874_v35 = vld [vmem:[#allocation42_spill] sm:$0xff] }
 0xa49   :  { %v3217_v61 = vmul.f32 -1.442695, %v2873_v44  ;;  %v1707_v44 = vadd.f32 %v7874_v35, %v7860_v24  ;;  %v3092_v24 = vld [vmem:[%s7074_s8 + $0x28] sm:$0xff] }
 0xa4a   :  { %v3472_v15 = vpop.eup %3471 }
 0xa4b   :  { %v3474_v23 = vpop.eup %3473  ;;  %v2877_v46 = vadd.f32 1.0, %v3472_v15  ;;  %3475 = vpow2.f32 %v3217_v61  ;;  %v7875_v61 = vld [vmem:[#allocation39_spill] sm:$0xff] }
 0xa4c   :  { %v2896_v47 = vadd.f32 1.0, %v3474_v23  ;;  %v1748_v15 = vadd.f32 %v7875_v61, %v7862_v59  ;;  %v3094_v23 = vld [vmem:[%s7074_s8 + $0x38] sm:$0xff]  ;;  %v3091_v59 = vld [vmem:[%s7074_s8 + $0x20] sm:$0xff] }
 0xa4d   :  { %3477 = vrcp.f32 %v2877_v46  ;;  %v2889_v30 = vand.u32 2147483648, %v2877_v46  ;;  %v2887_v28 = vand.u32 2147483647, %v2877_v46  ;;  %vm2883_vm8 = vweird.f32 %v2877_v46 }
 0xa4e   :  { %3479 = vrcp.f32 %v2896_v47  ;;  %v2908_v21 = vand.u32 2147483648, %v2896_v47  ;;  %v2906_v60 = vand.u32 2147483647, %v2896_v47  ;;  %vm2902_vm14 = vweird.f32 %v2896_v47 }
 0xa4f   :  { %v2890_v26 = vor.u32 1.1754944e-38, %v2889_v30  ;;  %vm2888_vm10 = vcmp.eq.f32.partialorder %v2887_v28, 8.507059e+37 }
 0xa50   :  { %v2909_v13 = vor.u32 1.1754944e-38, %v2908_v21  ;;  %vm2907_vm12 = vcmp.eq.f32.partialorder %v2906_v60, 8.507059e+37 }
 0xa51   :  { %v3476_v56 = vpop.eup %3475 }
 0xa52   :  { %v2916_v22 = vadd.f32 1.0, %v3476_v56 }
 0xa53   :  { %v3478_v1 = vpop.eup %3477 }
 0xa54   :  { %v3480_v17 = vpop.eup %3479  ;;  %v2879_v14 = vmul.f32 %v3478_v1, %v2877_v46  ;;  %3481 = vrcp.f32 %v2916_v22  ;;  %vm2884_vm1 = vweird.f32 %v3478_v1  ;;  %v2928_v32 = vand.u32 2147483648, %v2916_v22 }
 0xa55   :  { %v2898_v27 = vmul.f32 %v3480_v17, %v2896_v47  ;;  %3483 = vtanh.f32 %v2872_v39  ;;  %vm2903_vm7 = vweird.f32 %v3480_v17  ;;  %vm2885_vm0 = vmor %vm2883_vm8, %vm2884_vm1  ;;  %vm2922_vm11 = vweird.f32 %v2916_v22  ;;  %v7876_v39 = vld [vmem:[#allocation65_spill] sm:$0xff] }
 0xa56   :  { %v2880_v16 = vsub.f32 1.0, %v2879_v14  ;;  %vm2904_vm13 = vmor %vm2902_vm14, %vm2903_vm7  ;;  %v2926_v54 = vand.u32 2147483647, %v2916_v22  ;;  %v2929_v58 = vor.u32 1.1754944e-38, %v2928_v32 }
 0xa57   :  { %v2899_v25 = vsub.f32 1.0, %v2898_v27  ;;  %v3089_v27 = vld [vmem:[%s7074_s8 + $0x10] sm:$0xff] }
 0xa58   :  { %v2881_v40 = vmul.f32 %v3478_v1, %v2880_v16  ;;  %vm2927_vm3 = vcmp.eq.f32.partialorder %v2926_v54, 8.507059e+37 }
 0xa59   :  { %v2900_v51 = vmul.f32 %v3480_v17, %v2899_v25  ;;  %v3088_v25 = vld [vmem:[%s7074_s8 + $0x8] sm:$0xff] }
 0xa5a   :  { %v3482_v12 = vpop.eup %3481  ;;  %v2882_v9 = vadd.f32 %v3478_v1, %v2881_v40 }
 0xa5b   :  { %v2901_v11 = vadd.f32 %v3480_v17, %v2900_v51  ;;  %v2918_v53 = vmul.f32 %v3482_v12, %v2916_v22  ;;  %v3484_v34 = vpop.eup %3483  ;;  %vm2923_vm9 = vweird.f32 %v3482_v12 }
 0xa5c   :  { %v2886_v18 = vsel %vm2885_vm0, %v3478_v1, %v2882_v9  ;;  %vm2924_vm15 = vmor %vm2922_vm11, %vm2923_vm9  ;;  %v3090_v1 = vld [vmem:[%s7074_s8 + $0x18] sm:$0xff]  ;;  %v7877_v9 = vld [vmem:[#allocation67_spill] sm:$0xff]  ;;  %vm3127_vm11 = vcmask 31744  }
 0xa5d   :  { %v2891_v20 = vsel %vm2888_vm10, %v2890_v26, %v2886_v18  ;;  %v2905_v10 = vsel %vm2904_vm13, %v3480_v17, %v2901_v11  ;;  %v2919_v38 = vsub.f32 1.0, %v2918_v53  ;;  %v1830_v17 = vadd.f32 %v7876_v39, %v7864_v0  ;;  %v3087_v0 = vld [vmem:[%s7074_s8] sm:$0xff] }
 0xa5e   :  { %v2910_v5 = vsel %vm2907_vm12, %v2909_v13, %v2905_v10  ;;  %v2933_v33 = vmul.f32 %v3484_v34, %v2891_v20  ;;  %v1789_v26 = vadd.f32 %v7877_v9, %v7866_v45 }
 0xa5f   :  { %v2932_v42 = vmul.f32 %v2910_v5, %v6965_v8  ;;  %v2920_v36 = vmul.f32 %v3482_v12, %v2919_v38 }
 0xa61   :  { %v2934_v62 = vadd.f32 %v2933_v33, %v2932_v42  ;;  %v2921_v49 = vadd.f32 %v3482_v12, %v2920_v36 }
 0xa63   :  { %3485 = vtanh.f32 %v2934_v62  ;;  %v6988_v50 = vsel %vm1427_vm4, %v2934_v62, %v6965_v8  ;;  %v2925_v31 = vsel %vm2924_vm15, %v3482_v12, %v2921_v49  ;;  %v3102_v8 = vld [vmem:[%s7074_s8 + $0x78] sm:$0xff] }
 0xa64   :  { %v2930_v41 = vsel %vm2927_vm3, %v2929_v58, %v2925_v31  ;;  %3107 = vmatpush.msra.mxu0 %v3102_v8 }
 0xa66   :  { %3108 = vmatpush.msra.mxu0 %v3101_v4 }
 0xa69   :  { %v3486_v63 = vpop.eup %3485 }
 0xa6a   :  { %v2936_v52 = vmul.f32 %v3486_v63, %v2930_v41 }
 0xa6c   :  { %v6993_v29 = vsel %vm1427_vm4, %v2936_v52, %v6970_v57  ;;  %v3100_v57 = vld [vmem:[%s7074_s8 + $0x68] sm:$0xff] }
 0xa6d   :  { %2955 = vmatmul.f32.vlgmr.msrb.gmra.mxu0 %v6993_v29  ;;  %2975 = vmatmul.f32.vlgmr.msra.gmra.mxu1 %v6993_v29 }
 0xa6e   :  { %2995 = vmatmul.f32.vlgmr.msra.gmra.mxu2 %v6993_v29  ;;  %3015 = vmatmul.f32.vlgmr.msrb.gmra.mxu3 %v6993_v29 }
 0xa6f   :  { %3109 = vmatpush.msra.mxu0 %v3100_v57 }
 0xa71   :  { %3110 = vmatpush.msra.mxu0 %v3099_v19 }
 0xa73   :  { %3111 = vmatpush.msra.mxu0 %v3098_v3 }
 0xa75   :  { %3112 = vmatpush.msra.mxu0 %v3097_v48 }
 0xa77   :  { %3113 = vmatpush.msra.mxu0 %v3096_v43 }
 0xa79   :  { %3114 = vmatpush.msra.mxu0 %v3095_v2 }
 0xa7b   :  { %3115 = vmatpush.msra.mxu0 %v3094_v23 }
 0xa7d   :  { %3116 = vmatpush.msra.mxu0 %v3093_v6 }
 0xa7f   :  { %3117 = vmatpush.msra.mxu0 %v3092_v24 }
 0xa81   :  { %3118 = vmatpush.msra.mxu0 %v3091_v59 }
 0xa83   :  { %3119 = vmatpush.msra.mxu0 %v3090_v1 }
 0xa85   :  { %3120 = vmatpush.msra.mxu0 %v3089_v27 }
 0xa87   :  { %3121 = vmatpush.msra.mxu0 %v3088_v25 }
 0xa89   :  { %3122 = vmatpush.msra.mxu0 %v3087_v0 }
 0xaea   :  { %v2956_v46 = vpop.f32.mrf.mxu0  ;;  %v2976_v47 = vpop.f32.mrf.mxu1 }
 0xaeb   :  { %v3019_v55 = vadd.f32 %v2956_v46, %v1707_v44  ;;  %v3020_v56 = vadd.f32 %v2976_v47, %v1748_v15 }
 0xaed   :  { %v3218_v7 = vmul.f32 -1.442695, %v3019_v55  ;;  %v3219_v22 = vmul.f32 -1.442695, %v3020_v56  ;;  %v7878_v55 = vld [vmem:[#allocation23_spill] sm:$0xff] }
 0xaee   :  { %vm7879_vm9 = vcmp.eq.s32.totalorder %v7878_v55, 1 }
 0xaef   :  { %3487 = vpow2.f32 %v3218_v7 }
 0xaf0   :  { %3489 = vpow2.f32 %v3219_v22 }
 0xaf1   :  { %v3016_v14 = vpop.f32.mrf.mxu3  ;;  %v2996_v60 = vpop.f32.mrf.mxu2 }
 0xaf2   :  { %v3022_v16 = vadd.f32 %v3016_v14, %v1830_v17  ;;  %v3021_v13 = vadd.f32 %v2996_v60, %v1789_v26 }
 0xaf4   :  { %v3220_v30 = vmul.f32 -1.442695, %v3022_v16 }
 0xaf5   :  { %v3488_v21 = vpop.eup %3487 }
 0xaf6   :  { %v3490_v40 = vpop.eup %3489  ;;  %v3026_v28 = vadd.f32 1.0, %v3488_v21  ;;  %3491 = vpow2.f32 %v3220_v30 }
 0xaf7   :  { %v3045_v51 = vadd.f32 1.0, %v3490_v40 }
 0xaf8   :  { %3493 = vrcp.f32 %v3026_v28  ;;  %v3038_v5 = vand.u32 2147483648, %v3026_v28  ;;  %v3036_v36 = vand.u32 2147483647, %v3026_v28  ;;  %vm3032_vm5 = vweird.f32 %v3026_v28 }
 0xaf9   :  { %3495 = vrcp.f32 %v3045_v51  ;;  %v3057_v33 = vand.u32 2147483648, %v3045_v51  ;;  %v3055_v49 = vand.u32 2147483647, %v3045_v51  ;;  %vm3051_vm2 = vweird.f32 %v3045_v51 }
 0xafa   :  { %v3039_v37 = vor.u32 1.1754944e-38, %v3038_v5  ;;  %vm3037_vm8 = vcmp.eq.f32.partialorder %v3036_v36, 8.507059e+37 }
 0xafb   :  { %v3058_v58 = vor.u32 1.1754944e-38, %v3057_v33  ;;  %vm3056_vm14 = vcmp.eq.f32.partialorder %v3055_v49, 8.507059e+37 }
 0xafc   :  { %v3492_v12 = vpop.eup %3491 }
 0xafd   :  { %v3065_v11 = vadd.f32 1.0, %v3492_v12 }
 0xafe   :  { %v3494_v53 = vpop.eup %3493 }
 0xaff   :  { %v3496_v18 = vpop.eup %3495  ;;  %v3028_v34 = vmul.f32 %v3494_v53, %v3026_v28  ;;  %3497 = vrcp.f32 %v3065_v11  ;;  %vm3033_vm4 = vweird.f32 %v3494_v53  ;;  %v3077_v35 = vand.u32 2147483648, %v3065_v11 }
 0xb00   :  { %v3047_v20 = vmul.f32 %v3496_v18, %v3045_v51  ;;  %3499 = vtanh.f32 %v3021_v13  ;;  %vm3052_vm6 = vweird.f32 %v3496_v18  ;;  %vm3034_vm1 = vmor %vm3032_vm5, %vm3033_vm4  ;;  %vm3071_vm13 = vweird.f32 %v3065_v11 }
 0xb01   :  { %v3029_v10 = vsub.f32 1.0, %v3028_v34  ;;  %vm3053_vm7 = vmor %vm3051_vm2, %vm3052_vm6  ;;  %v3075_v44 = vand.u32 2147483647, %v3065_v11  ;;  %v3078_v15 = vor.u32 1.1754944e-38, %v3077_v35 }
 0xb02   :  { %v3048_v38 = vsub.f32 1.0, %v3047_v20 }
 0xb03   :  { %v3030_v42 = vmul.f32 %v3494_v53, %v3029_v10  ;;  %vm3076_vm12 = vcmp.eq.f32.partialorder %v3075_v44, 8.507059e+37 }
 0xb04   :  { %v3049_v62 = vmul.f32 %v3496_v18, %v3048_v38 }
 0xb05   :  { %v3498_v32 = vpop.eup %3497  ;;  %v3031_v45 = vadd.f32 %v3494_v53, %v3030_v42 }
 0xb06   :  { %v3050_v54 = vadd.f32 %v3496_v18, %v3049_v62  ;;  %v3067_v31 = vmul.f32 %v3498_v32, %v3065_v11  ;;  %v3500_v41 = vpop.eup %3499  ;;  %vm3072_vm0 = vweird.f32 %v3498_v32 }
 0xb07   :  { %v3035_v63 = vsel %vm3034_vm1, %v3494_v53, %v3031_v45  ;;  %vm3073_vm10 = vmor %vm3071_vm13, %vm3072_vm0 }
 0xb08   :  { %v3040_v52 = vsel %vm3037_vm8, %v3039_v37, %v3035_v63  ;;  %v3054_v8 = vsel %vm3053_vm7, %v3496_v18, %v3050_v54  ;;  %v3068_v4 = vsub.f32 1.0, %v3067_v31 }
 0xb09   :  { %v3059_v57 = vsel %vm3056_vm14, %v3058_v58, %v3054_v8  ;;  %v3082_v19 = vmul.f32 %v3500_v41, %v3040_v52 }
 0xb0a   :  { %v3081_v3 = vmul.f32 %v3059_v57, %v6988_v50  ;;  %v3069_v48 = vmul.f32 %v3498_v32, %v3068_v4  ;;  %v3246_v50 = vld [vmem:[%s7073_s9] ss:$0 sm:$0xff] }
 0xb0c   :  { %v3083_v43 = vadd.f32 %v3082_v19, %v3081_v3  ;;  %v3070_v2 = vadd.f32 %v3498_v32, %v3069_v48 }
 0xb0e   :  { %3501 = vtanh.f32 %v3083_v43  ;;  %v3074_v61 = vsel %vm3073_vm10, %v3498_v32, %v3070_v2 }
 0xb0f   :  { %v3079_v46 = vsel %vm3076_vm12, %v3078_v15, %v3074_v61 }
 0xb14   :  { %v3502_v23 = vpop.eup %3501 }
 0xb15   :  { %v3085_v47 = vmul.f32 %v3502_v23, %v3079_v46 }
 0xb17   :  { %v3086_v56 = vsel %vm7879_vm9, %v3085_v47, %v6993_v29 }
 0xb18   :  { %3123 = vmatmul.f32.vlgmr.msra.gmra.mxu0 %v3086_v56 }
 0xb95   :  { %v3124_v6 = vpop.f32.mrf.mxu0 }
 0xb96   :  { %v3125_v7 = vadd.f32 %v3246_v50, %v3124_v6 }
 0xb98   :  { %3128 = vst.msk [vmem:[%s7075_s10] sm:$0xff] %vm3127_vm11, %v3125_v7 }

</bundles_post_ra>
